<compile_context>
chip_gen: v6e
topology: v6e:2x2x1
jax: 0.10.0
libtpu: 0.0.40
codegen_flags: <defaults>
</compile_context>

<pallas_src>
import functools

import jax
import jax.numpy as jnp
from jax import lax
from jax.experimental import pallas as pl
from jax.experimental.pallas import tpu as pltpu


def _layernorm(x, gamma, beta, eps=1e-5):
    mu = jnp.mean(x, axis=-1, keepdims=True)
    xc = x - mu
    var = jnp.mean(xc * xc, axis=-1, keepdims=True)
    return xc * lax.rsqrt(var + eps) * gamma + beta


# --------------------------------------------------------------------------
# Fused kernel: input projection + all encoder layers, whole batch at once.
# --------------------------------------------------------------------------
def _fused_vis_encoder_kernel(
        x_ref, w_in_ref, b_in_ref, w_fcs_ref, b_fcs_ref,
        wq_ref, bq_ref, wk_ref, bk_ref, wv_ref, bv_ref, wo_ref, bo_ref,
        wf1_ref, bf1_ref, wf2_ref, bf2_ref,
        g1_ref, be1_ref, g2_ref, be2_ref,
        o_ref, act_ref, *, nhead, mxu_dtype, approx_recip):
    B, S, D = act_ref.shape
    hd = D // nhead
    nlayers = wq_ref.shape[0]
    scale = 1.0 / float(hd) ** 0.5

    def mm(a, w):
        # MXU matmul; operands optionally cast to bf16 (v6e/v7x), f32 accum.
        return jnp.dot(a.astype(mxu_dtype), w.astype(mxu_dtype),
                       preferred_element_type=jnp.float32)

    # ---- input projection: (B,D) @ (D,n*D) -> (B,n*D) --(per split)-> (B,S,D)
    # The second Linear is applied split-by-split (w_fcs_ref[s] is the
    # (n*D, D) column block of W_fc for split s) so the result lands directly
    # in the (B, S, D) activation layout: `view(B, n, -1)` is fused into the
    # kernel with no lane->sublane reshape.
    h1 = mm(x_ref[...], w_in_ref[...]) + b_in_ref[...]
    for s in range(S):
        act_ref[:, s, :] = mm(h1, w_fcs_ref[s]) + b_fcs_ref[s]

    # Row-wise work (QKV, FFN, LayerNorm) runs on the flattened (B*S, D) view.
    x2d0 = act_ref[...].reshape(B * S, D)

    def layer_body(li, x2d):
        # ---- multi-head self attention ----
        q = mm(x2d, wq_ref[li]) + bq_ref[li]
        k = mm(x2d, wk_ref[li]) + bk_ref[li]
        v = mm(x2d, wv_ref[li]) + bv_ref[li]
        q3 = q.reshape(B, S, D)
        k3 = k.reshape(B, S, D)
        v3 = v.reshape(B, S, D)
        wo = wo_ref[li]

        attn = jnp.zeros((B * S, D), jnp.float32)
        for h in range(nhead):     # static unroll over heads, batched over B
            lo = h * hd
            qh = q3[:, :, lo:lo + hd]            # (B, S, hd)
            kh = k3[:, :, lo:lo + hd]
            vh = v3[:, :, lo:lo + hd]
            s_ = jnp.einsum('bqd,bkd->bqk',
                            qh.astype(mxu_dtype), kh.astype(mxu_dtype),
                            preferred_element_type=jnp.float32) * scale
            s_ = s_ - jnp.max(s_, axis=-1, keepdims=True)
            p = jnp.exp(s_)
            denom = jnp.sum(p, axis=-1, keepdims=True)
            if approx_recip:
                p = p * pl.reciprocal(denom, approx=True)   # EUP slot
            else:
                p = p / denom
            ctx = jnp.einsum('bqk,bkd->bqd',
                             p.astype(mxu_dtype), vh.astype(mxu_dtype),
                             preferred_element_type=jnp.float32)
            # concat_h(ctx_h) @ Wo  ==  sum_h ctx_h @ Wo[h*hd:(h+1)*hd, :]
            attn = attn + mm(ctx.reshape(B * S, hd), wo[lo:lo + hd, :])
        attn = attn + bo_ref[li]

        # residual + LayerNorm 1 (post-norm; dropout = identity in eval mode)
        y = _layernorm(x2d + attn, g1_ref[li], be1_ref[li])

        # ---- feed-forward (relu) ----
        f = mm(y, wf1_ref[li]) + bf1_ref[li]
        f = jnp.maximum(f, 0.0)
        f = mm(f, wf2_ref[li]) + bf2_ref[li]

        # residual + LayerNorm 2
        return _layernorm(y + f, g2_ref[li], be2_ref[li])

    x2d = lax.fori_loop(0, nlayers, layer_body, x2d0)
    o_ref[...] = x2d.reshape(B, S, D)


def split_vis_encoder_forward(x, params, *, n, nhead, mxu_dtype=jnp.float32):
    """x: (B, D) -> (B, n, D); one fused Pallas kernel, no grid."""
    B, D = x.shape
    nd = n * D
    # Pre-split W_fc / b_fc into per-split column blocks outside the kernel
    # (free XLA reshapes); inside the kernel w_fcs[s] is (n*D, D).
    w_fcs = params["w_fc"].reshape(nd, n, D).transpose(1, 0, 2)    # (n, n*D, D)
    b_fcs = params["b_fc"].reshape(1, n, D).transpose(1, 0, 2)     # (n, 1, D)

    kernel = functools.partial(
        _fused_vis_encoder_kernel, nhead=nhead, mxu_dtype=mxu_dtype,
        approx_recip=(mxu_dtype != jnp.float32))
    return pl.pallas_call(
        kernel,
        out_shape=jax.ShapeDtypeStruct((B, n, D), jnp.float32),
        scratch_shapes=[pltpu.VMEM((B, n, D), jnp.float32)],
    )(x, params["w_in"], params["b_in"], w_fcs, b_fcs,
      params["wq"], params["bq"], params["wk"], params["bk"],
      params["wv"], params["bv"], params["wo"], params["bo"],
      params["wf1"], params["bf1"], params["wf2"], params["bf2"],
      params["g1"], params["be1"], params["g2"], params["be2"])


# --------------------------------------------------------------------------
# Plain-JAX reference (same math) for a correctness sanity check
# --------------------------------------------------------------------------
def _ref_forward(x, params, *, n, nhead):
    B, D = x.shape
    h = x @ params["w_in"] + params["b_in"]
    h = h @ params["w_fc"] + params["b_fc"]
    y = h.reshape(B, n, D)
    hd = D // nhead
    scale = 1.0 / float(hd) ** 0.5
    nlayers = params["wq"].shape[0]
    for li in range(nlayers):
        q = y @ params["wq"][li] + params["bq"][li]
        k = y @ params["wk"][li] + params["bk"][li]
        v = y @ params["wv"][li] + params["bv"][li]
        qh = q.reshape(B, n, nhead, hd).transpose(0, 2, 1, 3)
        kh = k.reshape(B, n, nhead, hd).transpose(0, 2, 1, 3)
        vh = v.reshape(B, n, nhead, hd).transpose(0, 2, 1, 3)
        s = jnp.einsum("bhqd,bhkd->bhqk", qh, kh) * scale
        p = jax.nn.softmax(s, axis=-1)
        a = jnp.einsum("bhqk,bhkd->bhqd", p, vh).transpose(0, 2, 1, 3).reshape(B, n, D)
        a = a @ params["wo"][li] + params["bo"][li]
        z = y + a
        mu = z.mean(-1, keepdims=True)
        var = ((z - mu) ** 2).mean(-1, keepdims=True)
        z = (z - mu) * lax.rsqrt(var + 1e-5) * params["g1"][li] + params["be1"][li]
        f = jnp.maximum(z @ params["wf1"][li] + params["bf1"][li], 0.0)
        f = f @ params["wf2"][li] + params["bf2"][li]
        w = z + f
        mu = w.mean(-1, keepdims=True)
        var = ((w - mu) ** 2).mean(-1, keepdims=True)
        y = (w - mu) * lax.rsqrt(var + 1e-5) * params["g2"][li] + params["be2"][li]
    return y


# --------------------------------------------------------------------------
# Deterministic parameter construction (synthetic weights, stacked per layer)
# --------------------------------------------------------------------------
def init_params(key, *, n, d_model, nhead, ffn, nlayers):
    def dense(k, fan_in, fan_out):
        kw, kb = jax.random.split(k)
        w = jax.random.normal(kw, (fan_in, fan_out), jnp.float32) * (fan_in ** -0.5)
        b = jax.random.normal(kb, (1, fan_out), jnp.float32) * 0.01
        return w, b

    keys = jax.random.split(key, 2 + nlayers)
    w_in, b_in = dense(keys[0], d_model, d_model * n)
    w_fc, b_fc = dense(keys[1], d_model * n, d_model * n)

    specs = (("wq", "bq", d_model, d_model), ("wk", "bk", d_model, d_model),
             ("wv", "bv", d_model, d_model), ("wo", "bo", d_model, d_model),
             ("wf1", "bf1", d_model, ffn), ("wf2", "bf2", ffn, d_model))
    acc = {name: [] for sp in specs for name in sp[:2]}
    for li in range(nlayers):
        ks = jax.random.split(keys[2 + li], len(specs))
        for (wn, bn, fi, fo), kk in zip(specs, ks):
            w, b = dense(kk, fi, fo)
            acc[wn].append(w)
            acc[bn].append(b)

    params = dict(w_in=w_in, b_in=b_in, w_fc=w_fc, b_fc=b_fc)
    params.update({name: jnp.stack(v) for name, v in acc.items()})
    params["g1"] = jnp.ones((nlayers, 1, d_model), jnp.float32)
    params["be1"] = jnp.zeros((nlayers, 1, d_model), jnp.float32)
    params["g2"] = jnp.ones((nlayers, 1, d_model), jnp.float32)
    params["be2"] = jnp.zeros((nlayers, 1, d_model), jnp.float32)
    return params


if __name__ == "__main__":
    # Small but shape-consistent configuration:
    #   d_model=32, n=8 splits (sequence length), nhead=8 (head_dim=4),
    #   dim_feedforward=64, 8 encoder layers (as hardcoded in the module).
    B, D, N, NHEAD, FFN, NLAYERS = 2, 32, 8, 8, 64, 8

    key = jax.random.PRNGKey(0)
    kx, kp = jax.random.split(key)
    x = jax.random.normal(kx, (B, D), jnp.float32)
    params = init_params(kp, n=N, d_model=D, nhead=NHEAD, ffn=FFN, nlayers=NLAYERS)

    # For v6e/v7x: pass mxu_dtype=jnp.bfloat16 to cast MXU operands only
    # (accumulation / LayerNorm / softmax stay f32, as required on v5e).
    out = split_vis_encoder_forward(x, params, n=N, nhead=NHEAD)
    out = jax.block_until_ready(out)
    assert out.shape == (B, N, D), out.shape

    ref = jax.block_until_ready(_ref_forward(x, params, n=N, nhead=NHEAD))
    assert jnp.all(jnp.isfinite(out))
    assert jnp.allclose(out, ref, atol=2e-3, rtol=2e-3), float(jnp.max(jnp.abs(out - ref)))

    # TODO(synk): the pretrained CLIP/DenseNet/BioViL image & text backbones,
    # dropout (train mode), and the contrastive / graph-align losses of LGCLIP
    # are outside this kernel.

    print("KERNEL_OK")
</pallas_src>

<mosaic_0001>
module attributes {stable_mosaic.version = 11 : i64} {
  func.func @_fused_vis_encoder_kernel(%arg0: memref<2x32xf32, #tpu.memory_space<vmem>>, %arg1: memref<32x256xf32, #tpu.memory_space<vmem>>, %arg2: memref<1x256xf32, #tpu.memory_space<vmem>>, %arg3: memref<8x256x32xf32, #tpu.memory_space<vmem>>, %arg4: memref<8x1x32xf32, #tpu.memory_space<vmem>>, %arg5: memref<8x32x32xf32, #tpu.memory_space<vmem>>, %arg6: memref<8x1x32xf32, #tpu.memory_space<vmem>>, %arg7: memref<8x32x32xf32, #tpu.memory_space<vmem>>, %arg8: memref<8x1x32xf32, #tpu.memory_space<vmem>>, %arg9: memref<8x32x32xf32, #tpu.memory_space<vmem>>, %arg10: memref<8x1x32xf32, #tpu.memory_space<vmem>>, %arg11: memref<8x32x32xf32, #tpu.memory_space<vmem>>, %arg12: memref<8x1x32xf32, #tpu.memory_space<vmem>>, %arg13: memref<8x32x64xf32, #tpu.memory_space<vmem>>, %arg14: memref<8x1x64xf32, #tpu.memory_space<vmem>>, %arg15: memref<8x64x32xf32, #tpu.memory_space<vmem>>, %arg16: memref<8x1x32xf32, #tpu.memory_space<vmem>>, %arg17: memref<8x1x32xf32, #tpu.memory_space<vmem>>, %arg18: memref<8x1x32xf32, #tpu.memory_space<vmem>>, %arg19: memref<8x1x32xf32, #tpu.memory_space<vmem>>, %arg20: memref<8x1x32xf32, #tpu.memory_space<vmem>>, %arg21: memref<2x8x32xf32, #tpu.memory_space<vmem>>, %arg22: memref<2x8x32xf32, #tpu.memory_space<vmem>>) attributes {dimension_semantics = [], scalar_prefetch = 0 : i64, scratch_operands = 1 : i64, tpu.core_type = #tpu.core_type<tc>} {
    %c0 = arith.constant 0 : index
    %c0_0 = arith.constant 0 : index
    %0 = vector.load %arg0[%c0, %c0_0] : memref<2x32xf32, #tpu.memory_space<vmem>>, vector<2x32xf32>
    %c0_1 = arith.constant 0 : index
    %c0_2 = arith.constant 0 : index
    %1 = vector.load %arg1[%c0_1, %c0_2] : memref<32x256xf32, #tpu.memory_space<vmem>>, vector<32x256xf32>
    %cst = arith.constant dense<0.000000e+00> : vector<2x256xf32>
    %2 = tpu.matmul %0, %1, %cst {dimension_numbers = #tpu.dot_dimension_numbers<[1], [0], [0], [1], [0, 0, 1, 1], [], []>} : vector<2x32xf32>, vector<32x256xf32>, vector<2x256xf32> -> vector<2x256xf32>
    %c0_3 = arith.constant 0 : index
    %c0_4 = arith.constant 0 : index
    %3 = vector.load %arg2[%c0_3, %c0_4] : memref<1x256xf32, #tpu.memory_space<vmem>>, vector<1x256xf32>
    %4 = vector.broadcast %3 : vector<1x256xf32> to vector<2x256xf32>
    %5 = arith.addf %2, %4 : vector<2x256xf32>
    %c0_5 = arith.constant 0 : index
    %c0_6 = arith.constant 0 : index
    %c0_7 = arith.constant 0 : index
    %6 = vector.load %arg3[%c0_5, %c0_6, %c0_7] : memref<8x256x32xf32, #tpu.memory_space<vmem>>, vector<1x256x32xf32>
    %7 = vector.shape_cast %6 : vector<1x256x32xf32> to vector<256x32xf32>
    %cst_8 = arith.constant dense<0.000000e+00> : vector<2x32xf32>
    %8 = tpu.matmul %5, %7, %cst_8 {dimension_numbers = #tpu.dot_dimension_numbers<[1], [0], [0], [1], [0, 0, 1, 1], [], []>} : vector<2x256xf32>, vector<256x32xf32>, vector<2x32xf32> -> vector<2x32xf32>
    %c0_9 = arith.constant 0 : index
    %c0_10 = arith.constant 0 : index
    %c0_11 = arith.constant 0 : index
    %9 = vector.load %arg4[%c0_9, %c0_10, %c0_11] : memref<8x1x32xf32, #tpu.memory_space<vmem>>, vector<1x1x32xf32>
    %10 = vector.shape_cast %9 : vector<1x1x32xf32> to vector<1x32xf32>
    %11 = vector.broadcast %10 : vector<1x32xf32> to vector<2x32xf32>
    %12 = arith.addf %8, %11 : vector<2x32xf32>
    %c0_12 = arith.constant 0 : index
    %c0_13 = arith.constant 0 : index
    %c0_14 = arith.constant 0 : index
    %13 = vector.load %arg22[%c0_12, %c0_13, %c0_14] : memref<2x8x32xf32, #tpu.memory_space<vmem>>, vector<2x1x32xf32>
    %14 = vector.shape_cast %13 : vector<2x1x32xf32> to vector<2x32xf32>
    %15 = vector.shape_cast %12 : vector<2x32xf32> to vector<2x1x32xf32>
    tpu.vector_store %arg22[%c0_12, %c0_13, %c0_14], %15 {strides = array<i32>} : memref<2x8x32xf32, #tpu.memory_space<vmem>>, vector<2x1x32xf32>,
    %c1 = arith.constant 1 : index
    %c0_15 = arith.constant 0 : index
    %c0_16 = arith.constant 0 : index
    %16 = vector.load %arg3[%c1, %c0_15, %c0_16] : memref<8x256x32xf32, #tpu.memory_space<vmem>>, vector<1x256x32xf32>
    %17 = vector.shape_cast %16 : vector<1x256x32xf32> to vector<256x32xf32>
    %cst_17 = arith.constant dense<0.000000e+00> : vector<2x32xf32>
    %18 = tpu.matmul %5, %17, %cst_17 {dimension_numbers = #tpu.dot_dimension_numbers<[1], [0], [0], [1], [0, 0, 1, 1], [], []>} : vector<2x256xf32>, vector<256x32xf32>, vector<2x32xf32> -> vector<2x32xf32>
    %c1_18 = arith.constant 1 : index
    %c0_19 = arith.constant 0 : index
    %c0_20 = arith.constant 0 : index
    %19 = vector.load %arg4[%c1_18, %c0_19, %c0_20] : memref<8x1x32xf32, #tpu.memory_space<vmem>>, vector<1x1x32xf32>
    %20 = vector.shape_cast %19 : vector<1x1x32xf32> to vector<1x32xf32>
    %21 = vector.broadcast %20 : vector<1x32xf32> to vector<2x32xf32>
    %22 = arith.addf %18, %21 : vector<2x32xf32>
    %c0_21 = arith.constant 0 : index
    %c1_22 = arith.constant 1 : index
    %c0_23 = arith.constant 0 : index
    %23 = vector.load %arg22[%c0_21, %c1_22, %c0_23] : memref<2x8x32xf32, #tpu.memory_space<vmem>>, vector<2x1x32xf32>
    %24 = vector.shape_cast %23 : vector<2x1x32xf32> to vector<2x32xf32>
    %25 = vector.shape_cast %22 : vector<2x32xf32> to vector<2x1x32xf32>
    tpu.vector_store %arg22[%c0_21, %c1_22, %c0_23], %25 {strides = array<i32>} : memref<2x8x32xf32, #tpu.memory_space<vmem>>, vector<2x1x32xf32>,
    %c2 = arith.constant 2 : index
    %c0_24 = arith.constant 0 : index
    %c0_25 = arith.constant 0 : index
    %26 = vector.load %arg3[%c2, %c0_24, %c0_25] : memref<8x256x32xf32, #tpu.memory_space<vmem>>, vector<1x256x32xf32>
    %27 = vector.shape_cast %26 : vector<1x256x32xf32> to vector<256x32xf32>
    %cst_26 = arith.constant dense<0.000000e+00> : vector<2x32xf32>
    %28 = tpu.matmul %5, %27, %cst_26 {dimension_numbers = #tpu.dot_dimension_numbers<[1], [0], [0], [1], [0, 0, 1, 1], [], []>} : vector<2x256xf32>, vector<256x32xf32>, vector<2x32xf32> -> vector<2x32xf32>
    %c2_27 = arith.constant 2 : index
    %c0_28 = arith.constant 0 : index
    %c0_29 = arith.constant 0 : index
    %29 = vector.load %arg4[%c2_27, %c0_28, %c0_29] : memref<8x1x32xf32, #tpu.memory_space<vmem>>, vector<1x1x32xf32>
    %30 = vector.shape_cast %29 : vector<1x1x32xf32> to vector<1x32xf32>
    %31 = vector.broadcast %30 : vector<1x32xf32> to vector<2x32xf32>
    %32 = arith.addf %28, %31 : vector<2x32xf32>
    %c0_30 = arith.constant 0 : index
    %c2_31 = arith.constant 2 : index
    %c0_32 = arith.constant 0 : index
    %33 = vector.load %arg22[%c0_30, %c2_31, %c0_32] : memref<2x8x32xf32, #tpu.memory_space<vmem>>, vector<2x1x32xf32>
    %34 = vector.shape_cast %33 : vector<2x1x32xf32> to vector<2x32xf32>
    %35 = vector.shape_cast %32 : vector<2x32xf32> to vector<2x1x32xf32>
    tpu.vector_store %arg22[%c0_30, %c2_31, %c0_32], %35 {strides = array<i32>} : memref<2x8x32xf32, #tpu.memory_space<vmem>>, vector<2x1x32xf32>,
    %c3 = arith.constant 3 : index
    %c0_33 = arith.constant 0 : index
    %c0_34 = arith.constant 0 : index
    %36 = vector.load %arg3[%c3, %c0_33, %c0_34] : memref<8x256x32xf32, #tpu.memory_space<vmem>>, vector<1x256x32xf32>
    %37 = vector.shape_cast %36 : vector<1x256x32xf32> to vector<256x32xf32>
    %cst_35 = arith.constant dense<0.000000e+00> : vector<2x32xf32>
    %38 = tpu.matmul %5, %37, %cst_35 {dimension_numbers = #tpu.dot_dimension_numbers<[1], [0], [0], [1], [0, 0, 1, 1], [], []>} : vector<2x256xf32>, vector<256x32xf32>, vector<2x32xf32> -> vector<2x32xf32>
    %c3_36 = arith.constant 3 : index
    %c0_37 = arith.constant 0 : index
    %c0_38 = arith.constant 0 : index
    %39 = vector.load %arg4[%c3_36, %c0_37, %c0_38] : memref<8x1x32xf32, #tpu.memory_space<vmem>>, vector<1x1x32xf32>
    %40 = vector.shape_cast %39 : vector<1x1x32xf32> to vector<1x32xf32>
    %41 = vector.broadcast %40 : vector<1x32xf32> to vector<2x32xf32>
    %42 = arith.addf %38, %41 : vector<2x32xf32>
    %c0_39 = arith.constant 0 : index
    %c3_40 = arith.constant 3 : index
    %c0_41 = arith.constant 0 : index
    %43 = vector.load %arg22[%c0_39, %c3_40, %c0_41] : memref<2x8x32xf32, #tpu.memory_space<vmem>>, vector<2x1x32xf32>
    %44 = vector.shape_cast %43 : vector<2x1x32xf32> to vector<2x32xf32>
    %45 = vector.shape_cast %42 : vector<2x32xf32> to vector<2x1x32xf32>
    tpu.vector_store %arg22[%c0_39, %c3_40, %c0_41], %45 {strides = array<i32>} : memref<2x8x32xf32, #tpu.memory_space<vmem>>, vector<2x1x32xf32>,
    %c4 = arith.constant 4 : index
    %c0_42 = arith.constant 0 : index
    %c0_43 = arith.constant 0 : index
    %46 = vector.load %arg3[%c4, %c0_42, %c0_43] : memref<8x256x32xf32, #tpu.memory_space<vmem>>, vector<1x256x32xf32>
    %47 = vector.shape_cast %46 : vector<1x256x32xf32> to vector<256x32xf32>
    %cst_44 = arith.constant dense<0.000000e+00> : vector<2x32xf32>
    %48 = tpu.matmul %5, %47, %cst_44 {dimension_numbers = #tpu.dot_dimension_numbers<[1], [0], [0], [1], [0, 0, 1, 1], [], []>} : vector<2x256xf32>, vector<256x32xf32>, vector<2x32xf32> -> vector<2x32xf32>
    %c4_45 = arith.constant 4 : index
    %c0_46 = arith.constant 0 : index
    %c0_47 = arith.constant 0 : index
    %49 = vector.load %arg4[%c4_45, %c0_46, %c0_47] : memref<8x1x32xf32, #tpu.memory_space<vmem>>, vector<1x1x32xf32>
    %50 = vector.shape_cast %49 : vector<1x1x32xf32> to vector<1x32xf32>
    %51 = vector.broadcast %50 : vector<1x32xf32> to vector<2x32xf32>
    %52 = arith.addf %48, %51 : vector<2x32xf32>
    %c0_48 = arith.constant 0 : index
    %c4_49 = arith.constant 4 : index
    %c0_50 = arith.constant 0 : index
    %53 = vector.load %arg22[%c0_48, %c4_49, %c0_50] : memref<2x8x32xf32, #tpu.memory_space<vmem>>, vector<2x1x32xf32>
    %54 = vector.shape_cast %53 : vector<2x1x32xf32> to vector<2x32xf32>
    %55 = vector.shape_cast %52 : vector<2x32xf32> to vector<2x1x32xf32>
    tpu.vector_store %arg22[%c0_48, %c4_49, %c0_50], %55 {strides = array<i32>} : memref<2x8x32xf32, #tpu.memory_space<vmem>>, vector<2x1x32xf32>,
    %c5 = arith.constant 5 : index
    %c0_51 = arith.constant 0 : index
    %c0_52 = arith.constant 0 : index
    %56 = vector.load %arg3[%c5, %c0_51, %c0_52] : memref<8x256x32xf32, #tpu.memory_space<vmem>>, vector<1x256x32xf32>
    %57 = vector.shape_cast %56 : vector<1x256x32xf32> to vector<256x32xf32>
    %cst_53 = arith.constant dense<0.000000e+00> : vector<2x32xf32>
    %58 = tpu.matmul %5, %57, %cst_53 {dimension_numbers = #tpu.dot_dimension_numbers<[1], [0], [0], [1], [0, 0, 1, 1], [], []>} : vector<2x256xf32>, vector<256x32xf32>, vector<2x32xf32> -> vector<2x32xf32>
    %c5_54 = arith.constant 5 : index
    %c0_55 = arith.constant 0 : index
    %c0_56 = arith.constant 0 : index
    %59 = vector.load %arg4[%c5_54, %c0_55, %c0_56] : memref<8x1x32xf32, #tpu.memory_space<vmem>>, vector<1x1x32xf32>
    %60 = vector.shape_cast %59 : vector<1x1x32xf32> to vector<1x32xf32>
    %61 = vector.broadcast %60 : vector<1x32xf32> to vector<2x32xf32>
    %62 = arith.addf %58, %61 : vector<2x32xf32>
    %c0_57 = arith.constant 0 : index
    %c5_58 = arith.constant 5 : index
    %c0_59 = arith.constant 0 : index
    %63 = vector.load %arg22[%c0_57, %c5_58, %c0_59] : memref<2x8x32xf32, #tpu.memory_space<vmem>>, vector<2x1x32xf32>
    %64 = vector.shape_cast %63 : vector<2x1x32xf32> to vector<2x32xf32>
    %65 = vector.shape_cast %62 : vector<2x32xf32> to vector<2x1x32xf32>
    tpu.vector_store %arg22[%c0_57, %c5_58, %c0_59], %65 {strides = array<i32>} : memref<2x8x32xf32, #tpu.memory_space<vmem>>, vector<2x1x32xf32>,
    %c6 = arith.constant 6 : index
    %c0_60 = arith.constant 0 : index
    %c0_61 = arith.constant 0 : index
    %66 = vector.load %arg3[%c6, %c0_60, %c0_61] : memref<8x256x32xf32, #tpu.memory_space<vmem>>, vector<1x256x32xf32>
    %67 = vector.shape_cast %66 : vector<1x256x32xf32> to vector<256x32xf32>
    %cst_62 = arith.constant dense<0.000000e+00> : vector<2x32xf32>
    %68 = tpu.matmul %5, %67, %cst_62 {dimension_numbers = #tpu.dot_dimension_numbers<[1], [0], [0], [1], [0, 0, 1, 1], [], []>} : vector<2x256xf32>, vector<256x32xf32>, vector<2x32xf32> -> vector<2x32xf32>
    %c6_63 = arith.constant 6 : index
    %c0_64 = arith.constant 0 : index
    %c0_65 = arith.constant 0 : index
    %69 = vector.load %arg4[%c6_63, %c0_64, %c0_65] : memref<8x1x32xf32, #tpu.memory_space<vmem>>, vector<1x1x32xf32>
    %70 = vector.shape_cast %69 : vector<1x1x32xf32> to vector<1x32xf32>
    %71 = vector.broadcast %70 : vector<1x32xf32> to vector<2x32xf32>
    %72 = arith.addf %68, %71 : vector<2x32xf32>
    %c0_66 = arith.constant 0 : index
    %c6_67 = arith.constant 6 : index
    %c0_68 = arith.constant 0 : index
    %73 = vector.load %arg22[%c0_66, %c6_67, %c0_68] : memref<2x8x32xf32, #tpu.memory_space<vmem>>, vector<2x1x32xf32>
    %74 = vector.shape_cast %73 : vector<2x1x32xf32> to vector<2x32xf32>
    %75 = vector.shape_cast %72 : vector<2x32xf32> to vector<2x1x32xf32>
    tpu.vector_store %arg22[%c0_66, %c6_67, %c0_68], %75 {strides = array<i32>} : memref<2x8x32xf32, #tpu.memory_space<vmem>>, vector<2x1x32xf32>,
    %c7 = arith.constant 7 : index
    %c0_69 = arith.constant 0 : index
    %c0_70 = arith.constant 0 : index
    %76 = vector.load %arg3[%c7, %c0_69, %c0_70] : memref<8x256x32xf32, #tpu.memory_space<vmem>>, vector<1x256x32xf32>
    %77 = vector.shape_cast %76 : vector<1x256x32xf32> to vector<256x32xf32>
    %cst_71 = arith.constant dense<0.000000e+00> : vector<2x32xf32>
    %78 = tpu.matmul %5, %77, %cst_71 {dimension_numbers = #tpu.dot_dimension_numbers<[1], [0], [0], [1], [0, 0, 1, 1], [], []>} : vector<2x256xf32>, vector<256x32xf32>, vector<2x32xf32> -> vector<2x32xf32>
    %c7_72 = arith.constant 7 : index
    %c0_73 = arith.constant 0 : index
    %c0_74 = arith.constant 0 : index
    %79 = vector.load %arg4[%c7_72, %c0_73, %c0_74] : memref<8x1x32xf32, #tpu.memory_space<vmem>>, vector<1x1x32xf32>
    %80 = vector.shape_cast %79 : vector<1x1x32xf32> to vector<1x32xf32>
    %81 = vector.broadcast %80 : vector<1x32xf32> to vector<2x32xf32>
    %82 = arith.addf %78, %81 : vector<2x32xf32>
    %c0_75 = arith.constant 0 : index
    %c7_76 = arith.constant 7 : index
    %c0_77 = arith.constant 0 : index
    %83 = vector.load %arg22[%c0_75, %c7_76, %c0_77] : memref<2x8x32xf32, #tpu.memory_space<vmem>>, vector<2x1x32xf32>
    %84 = vector.shape_cast %83 : vector<2x1x32xf32> to vector<2x32xf32>
    %85 = vector.shape_cast %82 : vector<2x32xf32> to vector<2x1x32xf32>
    tpu.vector_store %arg22[%c0_75, %c7_76, %c0_77], %85 {strides = array<i32>} : memref<2x8x32xf32, #tpu.memory_space<vmem>>, vector<2x1x32xf32>,
    %c0_78 = arith.constant 0 : index
    %c0_79 = arith.constant 0 : index
    %c0_80 = arith.constant 0 : index
    %86 = vector.load %arg22[%c0_78, %c0_79, %c0_80] : memref<2x8x32xf32, #tpu.memory_space<vmem>>, vector<2x8x32xf32>
    %87 = vector.shape_cast %86 : vector<2x8x32xf32> to vector<16x32xf32>
    %c0_i32 = arith.constant 0 : i32
    %c8_i32 = arith.constant 8 : i32
    %88 = arith.addi %c0_i32, %c8_i32 : i32
    %c1_i32 = arith.constant 1 : i32
    %89 = scf.for %arg23 = %c0_i32 to %88 step %c1_i32 iter_args(%arg24 = %87) -> (vector<16x32xf32>)  : i32 {
      %92 = arith.index_cast %arg23 : i32 to index
      %c0_85 = arith.constant 0 : index
      %c0_86 = arith.constant 0 : index
      %93 = vector.load %arg5[%92, %c0_85, %c0_86] : memref<8x32x32xf32, #tpu.memory_space<vmem>>, vector<1x32x32xf32>
      %94 = vector.shape_cast %93 : vector<1x32x32xf32> to vector<32x32xf32>
      %cst_87 = arith.constant dense<0.000000e+00> : vector<16x32xf32>
      %95 = tpu.matmul %arg24, %94, %cst_87 {dimension_numbers = #tpu.dot_dimension_numbers<[1], [0], [0], [1], [0, 0, 1, 1], [], []>} : vector<16x32xf32>, vector<32x32xf32>, vector<16x32xf32> -> vector<16x32xf32>
      %96 = arith.index_cast %arg23 : i32 to index
      %c0_88 = arith.constant 0 : index
      %c0_89 = arith.constant 0 : index
      %97 = vector.load %arg6[%96, %c0_88, %c0_89] : memref<8x1x32xf32, #tpu.memory_space<vmem>>, vector<1x1x32xf32>
      %98 = vector.shape_cast %97 : vector<1x1x32xf32> to vector<1x32xf32>
      %99 = vector.broadcast %98 : vector<1x32xf32> to vector<16x32xf32>
      %100 = arith.addf %95, %99 : vector<16x32xf32>
      %101 = arith.index_cast %arg23 : i32 to index
      %c0_90 = arith.constant 0 : index
      %c0_91 = arith.constant 0 : index
      %102 = vector.load %arg7[%101, %c0_90, %c0_91] : memref<8x32x32xf32, #tpu.memory_space<vmem>>, vector<1x32x32xf32>
      %103 = vector.shape_cast %102 : vector<1x32x32xf32> to vector<32x32xf32>
      %cst_92 = arith.constant dense<0.000000e+00> : vector<16x32xf32>
      %104 = tpu.matmul %arg24, %103, %cst_92 {dimension_numbers = #tpu.dot_dimension_numbers<[1], [0], [0], [1], [0, 0, 1, 1], [], []>} : vector<16x32xf32>, vector<32x32xf32>, vector<16x32xf32> -> vector<16x32xf32>
      %105 = arith.index_cast %arg23 : i32 to index
      %c0_93 = arith.constant 0 : index
      %c0_94 = arith.constant 0 : index
      %106 = vector.load %arg8[%105, %c0_93, %c0_94] : memref<8x1x32xf32, #tpu.memory_space<vmem>>, vector<1x1x32xf32>
      %107 = vector.shape_cast %106 : vector<1x1x32xf32> to vector<1x32xf32>
      %108 = vector.broadcast %107 : vector<1x32xf32> to vector<16x32xf32>
      %109 = arith.addf %104, %108 : vector<16x32xf32>
      %110 = arith.index_cast %arg23 : i32 to index
      %c0_95 = arith.constant 0 : index
      %c0_96 = arith.constant 0 : index
      %111 = vector.load %arg9[%110, %c0_95, %c0_96] : memref<8x32x32xf32, #tpu.memory_space<vmem>>, vector<1x32x32xf32>
      %112 = vector.shape_cast %111 : vector<1x32x32xf32> to vector<32x32xf32>
      %cst_97 = arith.constant dense<0.000000e+00> : vector<16x32xf32>
      %113 = tpu.matmul %arg24, %112, %cst_97 {dimension_numbers = #tpu.dot_dimension_numbers<[1], [0], [0], [1], [0, 0, 1, 1], [], []>} : vector<16x32xf32>, vector<32x32xf32>, vector<16x32xf32> -> vector<16x32xf32>
      %114 = arith.index_cast %arg23 : i32 to index
      %c0_98 = arith.constant 0 : index
      %c0_99 = arith.constant 0 : index
      %115 = vector.load %arg10[%114, %c0_98, %c0_99] : memref<8x1x32xf32, #tpu.memory_space<vmem>>, vector<1x1x32xf32>
      %116 = vector.shape_cast %115 : vector<1x1x32xf32> to vector<1x32xf32>
      %117 = vector.broadcast %116 : vector<1x32xf32> to vector<16x32xf32>
      %118 = arith.addf %113, %117 : vector<16x32xf32>
      %119 = vector.shape_cast %100 : vector<16x32xf32> to vector<2x8x32xf32>
      %120 = vector.shape_cast %109 : vector<16x32xf32> to vector<2x8x32xf32>
      %121 = vector.shape_cast %118 : vector<16x32xf32> to vector<2x8x32xf32>
      %122 = arith.index_cast %arg23 : i32 to index
      %c0_100 = arith.constant 0 : index
      %c0_101 = arith.constant 0 : index
      %123 = vector.load %arg11[%122, %c0_100, %c0_101] : memref<8x32x32xf32, #tpu.memory_space<vmem>>, vector<1x32x32xf32>
      %124 = vector.shape_cast %123 : vector<1x32x32xf32> to vector<32x32xf32>
      %cst_102 = arith.constant 0.000000e+00 : f32
      %125 = vector.broadcast %cst_102 : f32 to vector<16x32xf32>
      %126 = vector.extract_strided_slice %119 {offsets = [0, 0, 0], sizes = [2, 8, 4], strides = [1, 1, 1]} : vector<2x8x32xf32> to vector<2x8x4xf32>
      %127 = vector.extract_strided_slice %120 {offsets = [0, 0, 0], sizes = [2, 8, 4], strides = [1, 1, 1]} : vector<2x8x32xf32> to vector<2x8x4xf32>
      %128 = vector.extract_strided_slice %121 {offsets = [0, 0, 0], sizes = [2, 8, 4], strides = [1, 1, 1]} : vector<2x8x32xf32> to vector<2x8x4xf32>
      "tpu.trace_start"() <{level = 10 : i32, message = "bqd,bkd->bqk"}> : () -> ()
      %cst_103 = arith.constant dense<0.000000e+00> : vector<2x8x8xf32>
      %129 = tpu.matmul %126, %127, %cst_103 {dimension_numbers = #tpu.dot_dimension_numbers<[2], [2], [1], [1], [0, 0, 0, 1, 1, 1], [0], [0]>} : vector<2x8x4xf32>, vector<2x8x4xf32>, vector<2x8x8xf32> -> vector<2x8x8xf32>
      "tpu.trace_stop"() : () -> ()
      %cst_104 = arith.constant 5.000000e-01 : f32
      %130 = vector.broadcast %cst_104 : f32 to vector<2x8x8xf32>
      %131 = arith.mulf %129, %130 : vector<2x8x8xf32>
      %cst_105 = arith.constant dense<0xFF800000> : vector<2x8xf32>
      %132 = vector.multi_reduction <maximumf>, %131, %cst_105 [2] : vector<2x8x8xf32> to vector<2x8xf32>
      %133 = vector.shape_cast %132 : vector<2x8xf32> to vector<2x8x1xf32>
      %134 = vector.broadcast %133 : vector<2x8x1xf32> to vector<2x8x8xf32>
      %135 = arith.subf %131, %134 : vector<2x8x8xf32>
      %136 = math.exp %135 : vector<2x8x8xf32>
      %cst_106 = arith.constant dense<0.000000e+00> : vector<2x8xf32>
      %137 = vector.multi_reduction <add>, %136, %cst_106 [2] : vector<2x8x8xf32> to vector<2x8xf32>
      %138 = vector.shape_cast %137 : vector<2x8xf32> to vector<2x8x1xf32>
      %139 = vector.broadcast %138 : vector<2x8x1xf32> to vector<2x8x8xf32>
      %140 = arith.divf %136, %139 : vector<2x8x8xf32>
      "tpu.trace_start"() <{level = 10 : i32, message = "bqk,bkd->bqd"}> : () -> ()
      %cst_107 = arith.constant dense<0.000000e+00> : vector<2x8x4xf32>
      %141 = tpu.matmul %140, %128, %cst_107 {dimension_numbers = #tpu.dot_dimension_numbers<[2], [1], [1], [2], [0, 0, 0, 1, 1, 2], [0], [0]>} : vector<2x8x8xf32>, vector<2x8x4xf32>, vector<2x8x4xf32> -> vector<2x8x4xf32>
      "tpu.trace_stop"() : () -> ()
      %142 = vector.shape_cast %141 : vector<2x8x4xf32> to vector<16x4xf32>
      %143 = vector.extract_strided_slice %124 {offsets = [0, 0], sizes = [4, 32], strides = [1, 1]} : vector<32x32xf32> to vector<4x32xf32>
      %cst_108 = arith.constant dense<0.000000e+00> : vector<16x32xf32>
      %144 = tpu.matmul %142, %143, %cst_108 {dimension_numbers = #tpu.dot_dimension_numbers<[1], [0], [0], [1], [0, 0, 1, 1], [], []>} : vector<16x4xf32>, vector<4x32xf32>, vector<16x32xf32> -> vector<16x32xf32>
      %145 = arith.addf %125, %144 : vector<16x32xf32>
      %146 = vector.extract_strided_slice %119 {offsets = [0, 0, 4], sizes = [2, 8, 4], strides = [1, 1, 1]} : vector<2x8x32xf32> to vector<2x8x4xf32>
      %147 = vector.extract_strided_slice %120 {offsets = [0, 0, 4], sizes = [2, 8, 4], strides = [1, 1, 1]} : vector<2x8x32xf32> to vector<2x8x4xf32>
      %148 = vector.extract_strided_slice %121 {offsets = [0, 0, 4], sizes = [2, 8, 4], strides = [1, 1, 1]} : vector<2x8x32xf32> to vector<2x8x4xf32>
      "tpu.trace_start"() <{level = 10 : i32, message = "bqd,bkd->bqk"}> : () -> ()
      %cst_109 = arith.constant dense<0.000000e+00> : vector<2x8x8xf32>
      %149 = tpu.matmul %146, %147, %cst_109 {dimension_numbers = #tpu.dot_dimension_numbers<[2], [2], [1], [1], [0, 0, 0, 1, 1, 1], [0], [0]>} : vector<2x8x4xf32>, vector<2x8x4xf32>, vector<2x8x8xf32> -> vector<2x8x8xf32>
      "tpu.trace_stop"() : () -> ()
      %cst_110 = arith.constant 5.000000e-01 : f32
      %150 = vector.broadcast %cst_110 : f32 to vector<2x8x8xf32>
      %151 = arith.mulf %149, %150 : vector<2x8x8xf32>
      %cst_111 = arith.constant dense<0xFF800000> : vector<2x8xf32>
      %152 = vector.multi_reduction <maximumf>, %151, %cst_111 [2] : vector<2x8x8xf32> to vector<2x8xf32>
      %153 = vector.shape_cast %152 : vector<2x8xf32> to vector<2x8x1xf32>
      %154 = vector.broadcast %153 : vector<2x8x1xf32> to vector<2x8x8xf32>
      %155 = arith.subf %151, %154 : vector<2x8x8xf32>
      %156 = math.exp %155 : vector<2x8x8xf32>
      %cst_112 = arith.constant dense<0.000000e+00> : vector<2x8xf32>
      %157 = vector.multi_reduction <add>, %156, %cst_112 [2] : vector<2x8x8xf32> to vector<2x8xf32>
      %158 = vector.shape_cast %157 : vector<2x8xf32> to vector<2x8x1xf32>
      %159 = vector.broadcast %158 : vector<2x8x1xf32> to vector<2x8x8xf32>
      %160 = arith.divf %156, %159 : vector<2x8x8xf32>
      "tpu.trace_start"() <{level = 10 : i32, message = "bqk,bkd->bqd"}> : () -> ()
      %cst_113 = arith.constant dense<0.000000e+00> : vector<2x8x4xf32>
      %161 = tpu.matmul %160, %148, %cst_113 {dimension_numbers = #tpu.dot_dimension_numbers<[2], [1], [1], [2], [0, 0, 0, 1, 1, 2], [0], [0]>} : vector<2x8x8xf32>, vector<2x8x4xf32>, vector<2x8x4xf32> -> vector<2x8x4xf32>
      "tpu.trace_stop"() : () -> ()
      %162 = vector.shape_cast %161 : vector<2x8x4xf32> to vector<16x4xf32>
      %163 = vector.extract_strided_slice %124 {offsets = [4, 0], sizes = [4, 32], strides = [1, 1]} : vector<32x32xf32> to vector<4x32xf32>
      %cst_114 = arith.constant dense<0.000000e+00> : vector<16x32xf32>
      %164 = tpu.matmul %162, %163, %cst_114 {dimension_numbers = #tpu.dot_dimension_numbers<[1], [0], [0], [1], [0, 0, 1, 1], [], []>} : vector<16x4xf32>, vector<4x32xf32>, vector<16x32xf32> -> vector<16x32xf32>
      %165 = arith.addf %145, %164 : vector<16x32xf32>
      %166 = vector.extract_strided_slice %119 {offsets = [0, 0, 8], sizes = [2, 8, 4], strides = [1, 1, 1]} : vector<2x8x32xf32> to vector<2x8x4xf32>
      %167 = vector.extract_strided_slice %120 {offsets = [0, 0, 8], sizes = [2, 8, 4], strides = [1, 1, 1]} : vector<2x8x32xf32> to vector<2x8x4xf32>
      %168 = vector.extract_strided_slice %121 {offsets = [0, 0, 8], sizes = [2, 8, 4], strides = [1, 1, 1]} : vector<2x8x32xf32> to vector<2x8x4xf32>
      "tpu.trace_start"() <{level = 10 : i32, message = "bqd,bkd->bqk"}> : () -> ()
      %cst_115 = arith.constant dense<0.000000e+00> : vector<2x8x8xf32>
      %169 = tpu.matmul %166, %167, %cst_115 {dimension_numbers = #tpu.dot_dimension_numbers<[2], [2], [1], [1], [0, 0, 0, 1, 1, 1], [0], [0]>} : vector<2x8x4xf32>, vector<2x8x4xf32>, vector<2x8x8xf32> -> vector<2x8x8xf32>
      "tpu.trace_stop"() : () -> ()
      %cst_116 = arith.constant 5.000000e-01 : f32
      %170 = vector.broadcast %cst_116 : f32 to vector<2x8x8xf32>
      %171 = arith.mulf %169, %170 : vector<2x8x8xf32>
      %cst_117 = arith.constant dense<0xFF800000> : vector<2x8xf32>
      %172 = vector.multi_reduction <maximumf>, %171, %cst_117 [2] : vector<2x8x8xf32> to vector<2x8xf32>
      %173 = vector.shape_cast %172 : vector<2x8xf32> to vector<2x8x1xf32>
      %174 = vector.broadcast %173 : vector<2x8x1xf32> to vector<2x8x8xf32>
      %175 = arith.subf %171, %174 : vector<2x8x8xf32>
      %176 = math.exp %175 : vector<2x8x8xf32>
      %cst_118 = arith.constant dense<0.000000e+00> : vector<2x8xf32>
      %177 = vector.multi_reduction <add>, %176, %cst_118 [2] : vector<2x8x8xf32> to vector<2x8xf32>
      %178 = vector.shape_cast %177 : vector<2x8xf32> to vector<2x8x1xf32>
      %179 = vector.broadcast %178 : vector<2x8x1xf32> to vector<2x8x8xf32>
      %180 = arith.divf %176, %179 : vector<2x8x8xf32>
      "tpu.trace_start"() <{level = 10 : i32, message = "bqk,bkd->bqd"}> : () -> ()
      %cst_119 = arith.constant dense<0.000000e+00> : vector<2x8x4xf32>
      %181 = tpu.matmul %180, %168, %cst_119 {dimension_numbers = #tpu.dot_dimension_numbers<[2], [1], [1], [2], [0, 0, 0, 1, 1, 2], [0], [0]>} : vector<2x8x8xf32>, vector<2x8x4xf32>, vector<2x8x4xf32> -> vector<2x8x4xf32>
      "tpu.trace_stop"() : () -> ()
      %182 = vector.shape_cast %181 : vector<2x8x4xf32> to vector<16x4xf32>
      %183 = vector.extract_strided_slice %124 {offsets = [8, 0], sizes = [4, 32], strides = [1, 1]} : vector<32x32xf32> to vector<4x32xf32>
      %cst_120 = arith.constant dense<0.000000e+00> : vector<16x32xf32>
      %184 = tpu.matmul %182, %183, %cst_120 {dimension_numbers = #tpu.dot_dimension_numbers<[1], [0], [0], [1], [0, 0, 1, 1], [], []>} : vector<16x4xf32>, vector<4x32xf32>, vector<16x32xf32> -> vector<16x32xf32>
      %185 = arith.addf %165, %184 : vector<16x32xf32>
      %186 = vector.extract_strided_slice %119 {offsets = [0, 0, 12], sizes = [2, 8, 4], strides = [1, 1, 1]} : vector<2x8x32xf32> to vector<2x8x4xf32>
      %187 = vector.extract_strided_slice %120 {offsets = [0, 0, 12], sizes = [2, 8, 4], strides = [1, 1, 1]} : vector<2x8x32xf32> to vector<2x8x4xf32>
      %188 = vector.extract_strided_slice %121 {offsets = [0, 0, 12], sizes = [2, 8, 4], strides = [1, 1, 1]} : vector<2x8x32xf32> to vector<2x8x4xf32>
      "tpu.trace_start"() <{level = 10 : i32, message = "bqd,bkd->bqk"}> : () -> ()
      %cst_121 = arith.constant dense<0.000000e+00> : vector<2x8x8xf32>
      %189 = tpu.matmul %186, %187, %cst_121 {dimension_numbers = #tpu.dot_dimension_numbers<[2], [2], [1], [1], [0, 0, 0, 1, 1, 1], [0], [0]>} : vector<2x8x4xf32>, vector<2x8x4xf32>, vector<2x8x8xf32> -> vector<2x8x8xf32>
      "tpu.trace_stop"() : () -> ()
      %cst_122 = arith.constant 5.000000e-01 : f32
      %190 = vector.broadcast %cst_122 : f32 to vector<2x8x8xf32>
      %191 = arith.mulf %189, %190 : vector<2x8x8xf32>
      %cst_123 = arith.constant dense<0xFF800000> : vector<2x8xf32>
      %192 = vector.multi_reduction <maximumf>, %191, %cst_123 [2] : vector<2x8x8xf32> to vector<2x8xf32>
      %193 = vector.shape_cast %192 : vector<2x8xf32> to vector<2x8x1xf32>
      %194 = vector.broadcast %193 : vector<2x8x1xf32> to vector<2x8x8xf32>
      %195 = arith.subf %191, %194 : vector<2x8x8xf32>
      %196 = math.exp %195 : vector<2x8x8xf32>
      %cst_124 = arith.constant dense<0.000000e+00> : vector<2x8xf32>
      %197 = vector.multi_reduction <add>, %196, %cst_124 [2] : vector<2x8x8xf32> to vector<2x8xf32>
      %198 = vector.shape_cast %197 : vector<2x8xf32> to vector<2x8x1xf32>
      %199 = vector.broadcast %198 : vector<2x8x1xf32> to vector<2x8x8xf32>
      %200 = arith.divf %196, %199 : vector<2x8x8xf32>
      "tpu.trace_start"() <{level = 10 : i32, message = "bqk,bkd->bqd"}> : () -> ()
      %cst_125 = arith.constant dense<0.000000e+00> : vector<2x8x4xf32>
      %201 = tpu.matmul %200, %188, %cst_125 {dimension_numbers = #tpu.dot_dimension_numbers<[2], [1], [1], [2], [0, 0, 0, 1, 1, 2], [0], [0]>} : vector<2x8x8xf32>, vector<2x8x4xf32>, vector<2x8x4xf32> -> vector<2x8x4xf32>
      "tpu.trace_stop"() : () -> ()
      %202 = vector.shape_cast %201 : vector<2x8x4xf32> to vector<16x4xf32>
      %203 = vector.extract_strided_slice %124 {offsets = [12, 0], sizes = [4, 32], strides = [1, 1]} : vector<32x32xf32> to vector<4x32xf32>
      %cst_126 = arith.constant dense<0.000000e+00> : vector<16x32xf32>
      %204 = tpu.matmul %202, %203, %cst_126 {dimension_numbers = #tpu.dot_dimension_numbers<[1], [0], [0], [1], [0, 0, 1, 1], [], []>} : vector<16x4xf32>, vector<4x32xf32>, vector<16x32xf32> -> vector<16x32xf32>
      %205 = arith.addf %185, %204 : vector<16x32xf32>
      %206 = vector.extract_strided_slice %119 {offsets = [0, 0, 16], sizes = [2, 8, 4], strides = [1, 1, 1]} : vector<2x8x32xf32> to vector<2x8x4xf32>
      %207 = vector.extract_strided_slice %120 {offsets = [0, 0, 16], sizes = [2, 8, 4], strides = [1, 1, 1]} : vector<2x8x32xf32> to vector<2x8x4xf32>
      %208 = vector.extract_strided_slice %121 {offsets = [0, 0, 16], sizes = [2, 8, 4], strides = [1, 1, 1]} : vector<2x8x32xf32> to vector<2x8x4xf32>
      "tpu.trace_start"() <{level = 10 : i32, message = "bqd,bkd->bqk"}> : () -> ()
      %cst_127 = arith.constant dense<0.000000e+00> : vector<2x8x8xf32>
      %209 = tpu.matmul %206, %207, %cst_127 {dimension_numbers = #tpu.dot_dimension_numbers<[2], [2], [1], [1], [0, 0, 0, 1, 1, 1], [0], [0]>} : vector<2x8x4xf32>, vector<2x8x4xf32>, vector<2x8x8xf32> -> vector<2x8x8xf32>
      "tpu.trace_stop"() : () -> ()
      %cst_128 = arith.constant 5.000000e-01 : f32
      %210 = vector.broadcast %cst_128 : f32 to vector<2x8x8xf32>
      %211 = arith.mulf %209, %210 : vector<2x8x8xf32>
      %cst_129 = arith.constant dense<0xFF800000> : vector<2x8xf32>
      %212 = vector.multi_reduction <maximumf>, %211, %cst_129 [2] : vector<2x8x8xf32> to vector<2x8xf32>
      %213 = vector.shape_cast %212 : vector<2x8xf32> to vector<2x8x1xf32>
      %214 = vector.broadcast %213 : vector<2x8x1xf32> to vector<2x8x8xf32>
      %215 = arith.subf %211, %214 : vector<2x8x8xf32>
      %216 = math.exp %215 : vector<2x8x8xf32>
      %cst_130 = arith.constant dense<0.000000e+00> : vector<2x8xf32>
      %217 = vector.multi_reduction <add>, %216, %cst_130 [2] : vector<2x8x8xf32> to vector<2x8xf32>
      %218 = vector.shape_cast %217 : vector<2x8xf32> to vector<2x8x1xf32>
      %219 = vector.broadcast %218 : vector<2x8x1xf32> to vector<2x8x8xf32>
      %220 = arith.divf %216, %219 : vector<2x8x8xf32>
      "tpu.trace_start"() <{level = 10 : i32, message = "bqk,bkd->bqd"}> : () -> ()
      %cst_131 = arith.constant dense<0.000000e+00> : vector<2x8x4xf32>
      %221 = tpu.matmul %220, %208, %cst_131 {dimension_numbers = #tpu.dot_dimension_numbers<[2], [1], [1], [2], [0, 0, 0, 1, 1, 2], [0], [0]>} : vector<2x8x8xf32>, vector<2x8x4xf32>, vector<2x8x4xf32> -> vector<2x8x4xf32>
      "tpu.trace_stop"() : () -> ()
      %222 = vector.shape_cast %221 : vector<2x8x4xf32> to vector<16x4xf32>
      %223 = vector.extract_strided_slice %124 {offsets = [16, 0], sizes = [4, 32], strides = [1, 1]} : vector<32x32xf32> to vector<4x32xf32>
      %cst_132 = arith.constant dense<0.000000e+00> : vector<16x32xf32>
      %224 = tpu.matmul %222, %223, %cst_132 {dimension_numbers = #tpu.dot_dimension_numbers<[1], [0], [0], [1], [0, 0, 1, 1], [], []>} : vector<16x4xf32>, vector<4x32xf32>, vector<16x32xf32> -> vector<16x32xf32>
      %225 = arith.addf %205, %224 : vector<16x32xf32>
      %226 = vector.extract_strided_slice %119 {offsets = [0, 0, 20], sizes = [2, 8, 4], strides = [1, 1, 1]} : vector<2x8x32xf32> to vector<2x8x4xf32>
      %227 = vector.extract_strided_slice %120 {offsets = [0, 0, 20], sizes = [2, 8, 4], strides = [1, 1, 1]} : vector<2x8x32xf32> to vector<2x8x4xf32>
      %228 = vector.extract_strided_slice %121 {offsets = [0, 0, 20], sizes = [2, 8, 4], strides = [1, 1, 1]} : vector<2x8x32xf32> to vector<2x8x4xf32>
      "tpu.trace_start"() <{level = 10 : i32, message = "bqd,bkd->bqk"}> : () -> ()
      %cst_133 = arith.constant dense<0.000000e+00> : vector<2x8x8xf32>
      %229 = tpu.matmul %226, %227, %cst_133 {dimension_numbers = #tpu.dot_dimension_numbers<[2], [2], [1], [1], [0, 0, 0, 1, 1, 1], [0], [0]>} : vector<2x8x4xf32>, vector<2x8x4xf32>, vector<2x8x8xf32> -> vector<2x8x8xf32>
      "tpu.trace_stop"() : () -> ()
      %cst_134 = arith.constant 5.000000e-01 : f32
      %230 = vector.broadcast %cst_134 : f32 to vector<2x8x8xf32>
      %231 = arith.mulf %229, %230 : vector<2x8x8xf32>
      %cst_135 = arith.constant dense<0xFF800000> : vector<2x8xf32>
      %232 = vector.multi_reduction <maximumf>, %231, %cst_135 [2] : vector<2x8x8xf32> to vector<2x8xf32>
      %233 = vector.shape_cast %232 : vector<2x8xf32> to vector<2x8x1xf32>
      %234 = vector.broadcast %233 : vector<2x8x1xf32> to vector<2x8x8xf32>
      %235 = arith.subf %231, %234 : vector<2x8x8xf32>
      %236 = math.exp %235 : vector<2x8x8xf32>
      %cst_136 = arith.constant dense<0.000000e+00> : vector<2x8xf32>
      %237 = vector.multi_reduction <add>, %236, %cst_136 [2] : vector<2x8x8xf32> to vector<2x8xf32>
      %238 = vector.shape_cast %237 : vector<2x8xf32> to vector<2x8x1xf32>
      %239 = vector.broadcast %238 : vector<2x8x1xf32> to vector<2x8x8xf32>
      %240 = arith.divf %236, %239 : vector<2x8x8xf32>
      "tpu.trace_start"() <{level = 10 : i32, message = "bqk,bkd->bqd"}> : () -> ()
      %cst_137 = arith.constant dense<0.000000e+00> : vector<2x8x4xf32>
      %241 = tpu.matmul %240, %228, %cst_137 {dimension_numbers = #tpu.dot_dimension_numbers<[2], [1], [1], [2], [0, 0, 0, 1, 1, 2], [0], [0]>} : vector<2x8x8xf32>, vector<2x8x4xf32>, vector<2x8x4xf32> -> vector<2x8x4xf32>
      "tpu.trace_stop"() : () -> ()
      %242 = vector.shape_cast %241 : vector<2x8x4xf32> to vector<16x4xf32>
      %243 = vector.extract_strided_slice %124 {offsets = [20, 0], sizes = [4, 32], strides = [1, 1]} : vector<32x32xf32> to vector<4x32xf32>
      %cst_138 = arith.constant dense<0.000000e+00> : vector<16x32xf32>
      %244 = tpu.matmul %242, %243, %cst_138 {dimension_numbers = #tpu.dot_dimension_numbers<[1], [0], [0], [1], [0, 0, 1, 1], [], []>} : vector<16x4xf32>, vector<4x32xf32>, vector<16x32xf32> -> vector<16x32xf32>
      %245 = arith.addf %225, %244 : vector<16x32xf32>
      %246 = vector.extract_strided_slice %119 {offsets = [0, 0, 24], sizes = [2, 8, 4], strides = [1, 1, 1]} : vector<2x8x32xf32> to vector<2x8x4xf32>
      %247 = vector.extract_strided_slice %120 {offsets = [0, 0, 24], sizes = [2, 8, 4], strides = [1, 1, 1]} : vector<2x8x32xf32> to vector<2x8x4xf32>
      %248 = vector.extract_strided_slice %121 {offsets = [0, 0, 24], sizes = [2, 8, 4], strides = [1, 1, 1]} : vector<2x8x32xf32> to vector<2x8x4xf32>
      "tpu.trace_start"() <{level = 10 : i32, message = "bqd,bkd->bqk"}> : () -> ()
      %cst_139 = arith.constant dense<0.000000e+00> : vector<2x8x8xf32>
      %249 = tpu.matmul %246, %247, %cst_139 {dimension_numbers = #tpu.dot_dimension_numbers<[2], [2], [1], [1], [0, 0, 0, 1, 1, 1], [0], [0]>} : vector<2x8x4xf32>, vector<2x8x4xf32>, vector<2x8x8xf32> -> vector<2x8x8xf32>
      "tpu.trace_stop"() : () -> ()
      %cst_140 = arith.constant 5.000000e-01 : f32
      %250 = vector.broadcast %cst_140 : f32 to vector<2x8x8xf32>
      %251 = arith.mulf %249, %250 : vector<2x8x8xf32>
      %cst_141 = arith.constant dense<0xFF800000> : vector<2x8xf32>
      %252 = vector.multi_reduction <maximumf>, %251, %cst_141 [2] : vector<2x8x8xf32> to vector<2x8xf32>
      %253 = vector.shape_cast %252 : vector<2x8xf32> to vector<2x8x1xf32>
      %254 = vector.broadcast %253 : vector<2x8x1xf32> to vector<2x8x8xf32>
      %255 = arith.subf %251, %254 : vector<2x8x8xf32>
      %256 = math.exp %255 : vector<2x8x8xf32>
      %cst_142 = arith.constant dense<0.000000e+00> : vector<2x8xf32>
      %257 = vector.multi_reduction <add>, %256, %cst_142 [2] : vector<2x8x8xf32> to vector<2x8xf32>
      %258 = vector.shape_cast %257 : vector<2x8xf32> to vector<2x8x1xf32>
      %259 = vector.broadcast %258 : vector<2x8x1xf32> to vector<2x8x8xf32>
      %260 = arith.divf %256, %259 : vector<2x8x8xf32>
      "tpu.trace_start"() <{level = 10 : i32, message = "bqk,bkd->bqd"}> : () -> ()
      %cst_143 = arith.constant dense<0.000000e+00> : vector<2x8x4xf32>
      %261 = tpu.matmul %260, %248, %cst_143 {dimension_numbers = #tpu.dot_dimension_numbers<[2], [1], [1], [2], [0, 0, 0, 1, 1, 2], [0], [0]>} : vector<2x8x8xf32>, vector<2x8x4xf32>, vector<2x8x4xf32> -> vector<2x8x4xf32>
      "tpu.trace_stop"() : () -> ()
      %262 = vector.shape_cast %261 : vector<2x8x4xf32> to vector<16x4xf32>
      %263 = vector.extract_strided_slice %124 {offsets = [24, 0], sizes = [4, 32], strides = [1, 1]} : vector<32x32xf32> to vector<4x32xf32>
      %cst_144 = arith.constant dense<0.000000e+00> : vector<16x32xf32>
      %264 = tpu.matmul %262, %263, %cst_144 {dimension_numbers = #tpu.dot_dimension_numbers<[1], [0], [0], [1], [0, 0, 1, 1], [], []>} : vector<16x4xf32>, vector<4x32xf32>, vector<16x32xf32> -> vector<16x32xf32>
      %265 = arith.addf %245, %264 : vector<16x32xf32>
      %266 = vector.extract_strided_slice %119 {offsets = [0, 0, 28], sizes = [2, 8, 4], strides = [1, 1, 1]} : vector<2x8x32xf32> to vector<2x8x4xf32>
      %267 = vector.extract_strided_slice %120 {offsets = [0, 0, 28], sizes = [2, 8, 4], strides = [1, 1, 1]} : vector<2x8x32xf32> to vector<2x8x4xf32>
      %268 = vector.extract_strided_slice %121 {offsets = [0, 0, 28], sizes = [2, 8, 4], strides = [1, 1, 1]} : vector<2x8x32xf32> to vector<2x8x4xf32>
      "tpu.trace_start"() <{level = 10 : i32, message = "bqd,bkd->bqk"}> : () -> ()
      %cst_145 = arith.constant dense<0.000000e+00> : vector<2x8x8xf32>
      %269 = tpu.matmul %266, %267, %cst_145 {dimension_numbers = #tpu.dot_dimension_numbers<[2], [2], [1], [1], [0, 0, 0, 1, 1, 1], [0], [0]>} : vector<2x8x4xf32>, vector<2x8x4xf32>, vector<2x8x8xf32> -> vector<2x8x8xf32>
      "tpu.trace_stop"() : () -> ()
      %cst_146 = arith.constant 5.000000e-01 : f32
      %270 = vector.broadcast %cst_146 : f32 to vector<2x8x8xf32>
      %271 = arith.mulf %269, %270 : vector<2x8x8xf32>
      %cst_147 = arith.constant dense<0xFF800000> : vector<2x8xf32>
      %272 = vector.multi_reduction <maximumf>, %271, %cst_147 [2] : vector<2x8x8xf32> to vector<2x8xf32>
      %273 = vector.shape_cast %272 : vector<2x8xf32> to vector<2x8x1xf32>
      %274 = vector.broadcast %273 : vector<2x8x1xf32> to vector<2x8x8xf32>
      %275 = arith.subf %271, %274 : vector<2x8x8xf32>
      %276 = math.exp %275 : vector<2x8x8xf32>
      %cst_148 = arith.constant dense<0.000000e+00> : vector<2x8xf32>
      %277 = vector.multi_reduction <add>, %276, %cst_148 [2] : vector<2x8x8xf32> to vector<2x8xf32>
      %278 = vector.shape_cast %277 : vector<2x8xf32> to vector<2x8x1xf32>
      %279 = vector.broadcast %278 : vector<2x8x1xf32> to vector<2x8x8xf32>
      %280 = arith.divf %276, %279 : vector<2x8x8xf32>
      "tpu.trace_start"() <{level = 10 : i32, message = "bqk,bkd->bqd"}> : () -> ()
      %cst_149 = arith.constant dense<0.000000e+00> : vector<2x8x4xf32>
      %281 = tpu.matmul %280, %268, %cst_149 {dimension_numbers = #tpu.dot_dimension_numbers<[2], [1], [1], [2], [0, 0, 0, 1, 1, 2], [0], [0]>} : vector<2x8x8xf32>, vector<2x8x4xf32>, vector<2x8x4xf32> -> vector<2x8x4xf32>
      "tpu.trace_stop"() : () -> ()
      %282 = vector.shape_cast %281 : vector<2x8x4xf32> to vector<16x4xf32>
      %283 = vector.extract_strided_slice %124 {offsets = [28, 0], sizes = [4, 32], strides = [1, 1]} : vector<32x32xf32> to vector<4x32xf32>
      %cst_150 = arith.constant dense<0.000000e+00> : vector<16x32xf32>
      %284 = tpu.matmul %282, %283, %cst_150 {dimension_numbers = #tpu.dot_dimension_numbers<[1], [0], [0], [1], [0, 0, 1, 1], [], []>} : vector<16x4xf32>, vector<4x32xf32>, vector<16x32xf32> -> vector<16x32xf32>
      %285 = arith.addf %265, %284 : vector<16x32xf32>
      %286 = arith.index_cast %arg23 : i32 to index
      %c0_151 = arith.constant 0 : index
      %c0_152 = arith.constant 0 : index
      %287 = vector.load %arg12[%286, %c0_151, %c0_152] : memref<8x1x32xf32, #tpu.memory_space<vmem>>, vector<1x1x32xf32>
      %288 = vector.shape_cast %287 : vector<1x1x32xf32> to vector<1x32xf32>
      %289 = vector.broadcast %288 : vector<1x32xf32> to vector<16x32xf32>
      %290 = arith.addf %285, %289 : vector<16x32xf32>
      %291 = arith.addf %arg24, %290 : vector<16x32xf32>
      %292 = arith.index_cast %arg23 : i32 to index
      %c0_153 = arith.constant 0 : index
      %c0_154 = arith.constant 0 : index
      %293 = vector.load %arg17[%292, %c0_153, %c0_154] : memref<8x1x32xf32, #tpu.memory_space<vmem>>, vector<1x1x32xf32>
      %294 = vector.shape_cast %293 : vector<1x1x32xf32> to vector<1x32xf32>
      %295 = arith.index_cast %arg23 : i32 to index
      %c0_155 = arith.constant 0 : index
      %c0_156 = arith.constant 0 : index
      %296 = vector.load %arg18[%295, %c0_155, %c0_156] : memref<8x1x32xf32, #tpu.memory_space<vmem>>, vector<1x1x32xf32>
      %297 = vector.shape_cast %296 : vector<1x1x32xf32> to vector<1x32xf32>
      %cst_157 = arith.constant dense<0.000000e+00> : vector<16xf32>
      %298 = vector.multi_reduction <add>, %291, %cst_157 [1] : vector<16x32xf32> to vector<16xf32>
      %299 = vector.shape_cast %298 : vector<16xf32> to vector<16x1xf32>
      %cst_158 = arith.constant 3.200000e+01 : f32
      %300 = vector.broadcast %cst_158 : f32 to vector<16x1xf32>
      %301 = arith.divf %299, %300 : vector<16x1xf32>
      %302 = vector.broadcast %301 : vector<16x1xf32> to vector<16x32xf32>
      %303 = arith.subf %291, %302 : vector<16x32xf32>
      %304 = arith.mulf %303, %303 : vector<16x32xf32>
      %cst_159 = arith.constant dense<0.000000e+00> : vector<16xf32>
      %305 = vector.multi_reduction <add>, %304, %cst_159 [1] : vector<16x32xf32> to vector<16xf32>
      %306 = vector.shape_cast %305 : vector<16xf32> to vector<16x1xf32>
      %cst_160 = arith.constant 3.200000e+01 : f32
      %307 = vector.broadcast %cst_160 : f32 to vector<16x1xf32>
      %308 = arith.divf %306, %307 : vector<16x1xf32>
      %cst_161 = arith.constant 9.99999974E-6 : f32
      %309 = vector.broadcast %cst_161 : f32 to vector<16x1xf32>
      %310 = arith.addf %308, %309 : vector<16x1xf32>
      %311 = math.rsqrt %310 : vector<16x1xf32>
      %312 = vector.broadcast %311 : vector<16x1xf32> to vector<16x32xf32>
      %313 = arith.mulf %303, %312 : vector<16x32xf32>
      %314 = vector.broadcast %294 : vector<1x32xf32> to vector<16x32xf32>
      %315 = arith.mulf %313, %314 : vector<16x32xf32>
      %316 = vector.broadcast %297 : vector<1x32xf32> to vector<16x32xf32>
      %317 = arith.addf %315, %316 : vector<16x32xf32>
      %318 = arith.index_cast %arg23 : i32 to index
      %c0_162 = arith.constant 0 : index
      %c0_163 = arith.constant 0 : index
      %319 = vector.load %arg13[%318, %c0_162, %c0_163] : memref<8x32x64xf32, #tpu.memory_space<vmem>>, vector<1x32x64xf32>
      %320 = vector.shape_cast %319 : vector<1x32x64xf32> to vector<32x64xf32>
      %cst_164 = arith.constant dense<0.000000e+00> : vector<16x64xf32>
      %321 = tpu.matmul %317, %320, %cst_164 {dimension_numbers = #tpu.dot_dimension_numbers<[1], [0], [0], [1], [0, 0, 1, 1], [], []>} : vector<16x32xf32>, vector<32x64xf32>, vector<16x64xf32> -> vector<16x64xf32>
      %322 = arith.index_cast %arg23 : i32 to index
      %c0_165 = arith.constant 0 : index
      %c0_166 = arith.constant 0 : index
      %323 = vector.load %arg14[%322, %c0_165, %c0_166] : memref<8x1x64xf32, #tpu.memory_space<vmem>>, vector<1x1x64xf32>
      %324 = vector.shape_cast %323 : vector<1x1x64xf32> to vector<1x64xf32>
      %325 = vector.broadcast %324 : vector<1x64xf32> to vector<16x64xf32>
      %326 = arith.addf %321, %325 : vector<16x64xf32>
      %cst_167 = arith.constant 0.000000e+00 : f32
      %327 = vector.broadcast %cst_167 : f32 to vector<16x64xf32>
      %328 = arith.maximumf %326, %327 : vector<16x64xf32>
      %329 = arith.index_cast %arg23 : i32 to index
      %c0_168 = arith.constant 0 : index
      %c0_169 = arith.constant 0 : index
      %330 = vector.load %arg15[%329, %c0_168, %c0_169] : memref<8x64x32xf32, #tpu.memory_space<vmem>>, vector<1x64x32xf32>
      %331 = vector.shape_cast %330 : vector<1x64x32xf32> to vector<64x32xf32>
      %cst_170 = arith.constant dense<0.000000e+00> : vector<16x32xf32>
      %332 = tpu.matmul %328, %331, %cst_170 {dimension_numbers = #tpu.dot_dimension_numbers<[1], [0], [0], [1], [0, 0, 1, 1], [], []>} : vector<16x64xf32>, vector<64x32xf32>, vector<16x32xf32> -> vector<16x32xf32>
      %333 = arith.index_cast %arg23 : i32 to index
      %c0_171 = arith.constant 0 : index
      %c0_172 = arith.constant 0 : index
      %334 = vector.load %arg16[%333, %c0_171, %c0_172] : memref<8x1x32xf32, #tpu.memory_space<vmem>>, vector<1x1x32xf32>
      %335 = vector.shape_cast %334 : vector<1x1x32xf32> to vector<1x32xf32>
      %336 = vector.broadcast %335 : vector<1x32xf32> to vector<16x32xf32>
      %337 = arith.addf %332, %336 : vector<16x32xf32>
      %338 = arith.addf %317, %337 : vector<16x32xf32>
      %339 = arith.index_cast %arg23 : i32 to index
      %c0_173 = arith.constant 0 : index
      %c0_174 = arith.constant 0 : index
      %340 = vector.load %arg19[%339, %c0_173, %c0_174] : memref<8x1x32xf32, #tpu.memory_space<vmem>>, vector<1x1x32xf32>
      %341 = vector.shape_cast %340 : vector<1x1x32xf32> to vector<1x32xf32>
      %342 = arith.index_cast %arg23 : i32 to index
      %c0_175 = arith.constant 0 : index
      %c0_176 = arith.constant 0 : index
      %343 = vector.load %arg20[%342, %c0_175, %c0_176] : memref<8x1x32xf32, #tpu.memory_space<vmem>>, vector<1x1x32xf32>
      %344 = vector.shape_cast %343 : vector<1x1x32xf32> to vector<1x32xf32>
      %cst_177 = arith.constant dense<0.000000e+00> : vector<16xf32>
      %345 = vector.multi_reduction <add>, %338, %cst_177 [1] : vector<16x32xf32> to vector<16xf32>
      %346 = vector.shape_cast %345 : vector<16xf32> to vector<16x1xf32>
      %cst_178 = arith.constant 3.200000e+01 : f32
      %347 = vector.broadcast %cst_178 : f32 to vector<16x1xf32>
      %348 = arith.divf %346, %347 : vector<16x1xf32>
      %349 = vector.broadcast %348 : vector<16x1xf32> to vector<16x32xf32>
      %350 = arith.subf %338, %349 : vector<16x32xf32>
      %351 = arith.mulf %350, %350 : vector<16x32xf32>
      %cst_179 = arith.constant dense<0.000000e+00> : vector<16xf32>
      %352 = vector.multi_reduction <add>, %351, %cst_179 [1] : vector<16x32xf32> to vector<16xf32>
      %353 = vector.shape_cast %352 : vector<16xf32> to vector<16x1xf32>
      %cst_180 = arith.constant 3.200000e+01 : f32
      %354 = vector.broadcast %cst_180 : f32 to vector<16x1xf32>
      %355 = arith.divf %353, %354 : vector<16x1xf32>
      %cst_181 = arith.constant 9.99999974E-6 : f32
      %356 = vector.broadcast %cst_181 : f32 to vector<16x1xf32>
      %357 = arith.addf %355, %356 : vector<16x1xf32>
      %358 = math.rsqrt %357 : vector<16x1xf32>
      %359 = vector.broadcast %358 : vector<16x1xf32> to vector<16x32xf32>
      %360 = arith.mulf %350, %359 : vector<16x32xf32>
      %361 = vector.broadcast %341 : vector<1x32xf32> to vector<16x32xf32>
      %362 = arith.mulf %360, %361 : vector<16x32xf32>
      %363 = vector.broadcast %344 : vector<1x32xf32> to vector<16x32xf32>
      %364 = arith.addf %362, %363 : vector<16x32xf32>
      scf.yield %364 : vector<16x32xf32>
    }
    %c8_i32_81 = arith.constant 8 : i32
    %90 = vector.shape_cast %89 : vector<16x32xf32> to vector<2x8x32xf32>
    %c0_82 = arith.constant 0 : index
    %c0_83 = arith.constant 0 : index
    %c0_84 = arith.constant 0 : index
    %91 = vector.load %arg21[%c0_82, %c0_83, %c0_84] : memref<2x8x32xf32, #tpu.memory_space<vmem>>, vector<2x8x32xf32>
    tpu.vector_store %arg21[%c0_82, %c0_83, %c0_84], %90 {strides = array<i32>} : memref<2x8x32xf32, #tpu.memory_space<vmem>>, vector<2x8x32xf32>,
    return
  }
}

</mosaic_0001>

<bundles_post_ra>
// kernel: tpu_custom_call.1
= control target key start
LH: loop header
LB: loop body
LE: loop exit
PB: predicated region body
PF: predicated region fallthrough
CT: control target
= control target key end

     0   :  { %s7902_s0 = inlined_call_operand.vmem [shape: f32[2,32], index: 0, kind: input, shape index: {}]   ;;  %s7903_s1 = inlined_call_operand.vmem [shape: f32[32,256], index: 1, kind: input, shape index: {}]   ;;  %s7904_s2 = inlined_call_operand.vmem [shape: f32[1,256], index: 2, kind: input, shape index: {}]   ;;  %s7905_s3 = inlined_call_operand.vmem [shape: f32[8,256,32], index: 3, kind: input, shape index: {}]   ;;  %s7906_s4 = inlined_call_operand.vmem [shape: f32[8,1,32], index: 4, kind: input, shape index: {}]   ;;  %s7907_s5 = inlined_call_operand.vmem [shape: f32[8,32,32], index: 5, kind: input, shape index: {}]   ;;  %s7908_s6 = inlined_call_operand.vmem [shape: f32[8,1,32], index: 6, kind: input, shape index: {}]   ;;  %s7909_s7 = inlined_call_operand.vmem [shape: f32[8,32,32], index: 7, kind: input, shape index: {}]   ;;  %s7910_s8 = inlined_call_operand.vmem [shape: f32[8,1,32], index: 8, kind: input, shape index: {}]   ;;  %s7911_s9 = inlined_call_operand.vmem [shape: f32[8,32,32], index: 9, kind: input, shape index: {}]   ;;  %s7912_s10 = inlined_call_operand.vmem [shape: f32[8,1,32], index: 10, kind: input, shape index: {}]   ;;  %s7913_s11 = inlined_call_operand.vmem [shape: f32[8,32,32], index: 11, kind: input, shape index: {}]   ;;  %s7914_s12 = inlined_call_operand.vmem [shape: f32[8,1,32], index: 12, kind: input, shape index: {}]   ;;  %s7915_s13 = inlined_call_operand.vmem [shape: f32[8,32,64], index: 13, kind: input, shape index: {}]   ;;  %s7916_s14 = inlined_call_operand.vmem [shape: f32[8,1,64], index: 14, kind: input, shape index: {}]   ;;  %s7917_s15 = inlined_call_operand.vmem [shape: f32[8,64,32], index: 15, kind: input, shape index: {}]   ;;  %s7918_s16 = inlined_call_operand.vmem [shape: f32[8,1,32], index: 16, kind: input, shape index: {}]   ;;  %s7919_s17 = inlined_call_operand.vmem [shape: f32[8,1,32], index: 17, kind: input, shape index: {}]   ;;  %s7920_s18 = inlined_call_operand.vmem [shape: f32[8,1,32], index: 18, kind: input, shape index: {}]   ;;  %s7921_s19 = inlined_call_operand.vmem [shape: f32[8,1,32], index: 19, kind: input, shape index: {}]   ;;  %s7922_s20 = inlined_call_operand.vmem [shape: f32[8,1,32], index: 20, kind: input, shape index: {}]   ;;  %s7923_s21 = inlined_call_operand.hbm [shape: f32[2,8,32], index: 21, kind: output, shape index: {}]  }
   0x1   :  { %7927 = sst [smem:[#allocation6_spill]] %s7902_s0 }
   0x2   :  { %7928 = sst [smem:[#allocation7_spill]] %s7903_s1 }
   0x3   :  { %7929 = sst [smem:[#allocation8_spill]] %s7904_s2 }
   0x4   :  { %7930 = sst [smem:[#allocation9_spill]] %s7905_s3 }
   0x5   :  { %7931 = sst [smem:[#allocation10_spill]] %s7906_s4 }
   0x6   :  { %7932 = sst [smem:[#allocation11_spill]] %s7907_s5 }
   0x7   :  { %26 = vsyncpa [#allocation4], 0  ;;  %s7933_s26 = sld [smem:[#allocation7_spill]]  ;;  %v6398_v4 = vmov 0.0   ;;  %vm90_vm0 = vcmask 261120   ;;  %vm299_vm1 = vcmask 253952  }
   0x8   :  { %158 = vmatprep.mubr.f32.mxu0 %v6398_v4  ;;  %s7934_s2 = sld [smem:[#allocation9_spill]] }
   0x9   :  { %s7935_s24 = sld [smem:[#allocation6_spill]] }
   0xa   :  { %s7936_s25 = sld [smem:[#allocation8_spill]] }
   0xb   :  { %s7937_s29 = sld [smem:[#allocation10_spill]] }
   0xd   :  { %v77_v0 = vld [vmem:[%s7933_s26 + $0x38] sm:$0xff]  ;;  %v76_v1 = vld [vmem:[%s7933_s26 + $0x30] sm:$0xff]  ;;  %v75_v2 = vld [vmem:[%s7933_s26 + $0x28] sm:$0xff] }
   0xe   :  { %118 = vmatprep.subr.mxu0 %v77_v0  ;;  %v74_v3 = vld [vmem:[%s7933_s26 + $0x20] sm:$0xff]  ;;  %v73_v5 = vld [vmem:[%s7933_s26 + $0x18] sm:$0xff]  ;;  %v72_v6 = vld [vmem:[%s7933_s26 + $0x10] sm:$0xff] }
   0xf   :  { %119 = vmatpush1.msra.mxu0 %v76_v1  ;;  %v196_v7 = vld [vmem:[%s7934_s2 + $0xf8] sm:$0xff]  ;;  %v71_v8 = vld [vmem:[%s7933_s26 + $0x8] sm:$0xff]  ;;  %v195_v10 = vld [vmem:[%s7934_s2 + $0xf0] sm:$0xff] }
  0x10   :  { %120 = vmatprep.subr.mxu0 %v75_v2  ;;  %5577 = vmatprep.subr.mxu1 %v196_v7  ;;  %v180_v9 = vld [vmem:[%s7934_s2 + $0x78] sm:$0xff]  ;;  %v70_v11 = vld [vmem:[%s7933_s26] sm:$0xff]  ;;  %v179_v12 = vld [vmem:[%s7934_s2 + $0x70] sm:$0xff] }
  0x11   :  { %121 = vmatpush1.msra.mxu0 %v74_v3  ;;  %5578 = vmatpush3.msra.mxu1 %v180_v9  ;;  %v69_v13 = vld [vmem:[%s7935_s24] sm:$0x3]  ;;  %v5276_v14 = vld [vmem:[%s7934_s2 + $0x1f8] sm:$0xff]  ;;  %v194_v15 = vld [vmem:[%s7934_s2 + $0xe8] sm:$0xff] }
  0x12   :  { %122 = vmatprep.subr.mxu0 %v73_v5  ;;  %5579 = vmatprep.subr.mxu1 %v195_v10  ;;  %v5260_v16 = vld [vmem:[%s7934_s2 + $0x178] sm:$0xff]  ;;  %v178_v17 = vld [vmem:[%s7934_s2 + $0x68] sm:$0xff]  ;;  %v5275_v18 = vld [vmem:[%s7934_s2 + $0x1f0] sm:$0xff] }
  0x13   :  { %123 = vmatpush1.msra.mxu0 %v72_v6  ;;  %5580 = vmatpush3.msra.mxu1 %v179_v12  ;;  %v193_v19 = vld [vmem:[%s7934_s2 + $0xe0] sm:$0xff]  ;;  %v5259_v20 = vld [vmem:[%s7934_s2 + $0x170] sm:$0xff]  ;;  %v5274_v22 = vld [vmem:[%s7934_s2 + $0x1e8] sm:$0xff]  ;;  %v80_v12 = vlaneseq }
  0x14   :  { %124 = vmatprep.subr.mxu0 %v71_v8  ;;  %5581 = vmatprep.subr.mxu1 %v194_v15  ;;  %v177_v21 = vld [vmem:[%s7934_s2 + $0x60] sm:$0xff]  ;;  %v192_v23 = vld [vmem:[%s7934_s2 + $0xd8] sm:$0xff]  ;;  %v5258_v24 = vld [vmem:[%s7934_s2 + $0x168] sm:$0xff] }
  0x15   :  { %125 = vmatpush1.msra.mxu0 %v70_v11  ;;  %5582 = vmatpush3.msra.mxu1 %v178_v17  ;;  %v176_v25 = vld [vmem:[%s7934_s2 + $0x58] sm:$0xff]  ;;  %v5273_v26 = vld [vmem:[%s7934_s2 + $0x1e0] sm:$0xff]  ;;  %v191_v27 = vld [vmem:[%s7934_s2 + $0xd0] sm:$0xff] }
  0x16   :  { %5243 = vmatmul.mubr.msk.f32.vlgmr.msra.gmra.mxu0 %vm90_vm0, %v69_v13  ;;  %5612 = vmatprep.subr.mxu0 %v5276_v14  ;;  %v5257_v28 = vld [vmem:[%s7934_s2 + $0x160] sm:$0xff]  ;;  %v175_v29 = vld [vmem:[%s7934_s2 + $0x50] sm:$0xff]  ;;  %v5272_v30 = vld [vmem:[%s7934_s2 + $0x1d8] sm:$0xff]  ;;  %v6748_v13 = vshrl.u32 %v80_v12, 7 }
  0x17   :  { %5613 = vmatpush3.msra.mxu0 %v5260_v16  ;;  %5583 = vmatprep.subr.mxu1 %v193_v19  ;;  %v190_v31 = vld [vmem:[%s7934_s2 + $0xc8] sm:$0xff]  ;;  %v5256_v32 = vld [vmem:[%s7934_s2 + $0x158] sm:$0xff]  ;;  %v5271_v34 = vld [vmem:[%s7934_s2 + $0x1d0] sm:$0xff] }
  0x18   :  { %5614 = vmatprep.subr.mxu0 %v5275_v18  ;;  %5584 = vmatpush3.msra.mxu1 %v177_v21  ;;  %v174_v33 = vld [vmem:[%s7934_s2 + $0x48] sm:$0xff]  ;;  %v189_v35 = vld [vmem:[%s7934_s2 + $0xc0] sm:$0xff]  ;;  %v5255_v36 = vld [vmem:[%s7934_s2 + $0x150] sm:$0xff]  ;;  %v86_v14 = vsub.s32 1, %v6748_v13  ;;  %v82_v15 = vsub.s32 0, %v6748_v13 }
  0x19   :  { %5615 = vmatpush3.msra.mxu0 %v5259_v20  ;;  %5585 = vmatprep.subr.mxu1 %v192_v23  ;;  %v173_v37 = vld [vmem:[%s7934_s2 + $0x40] sm:$0xff]  ;;  %v5270_v38 = vld [vmem:[%s7934_s2 + $0x1c8] sm:$0xff]  ;;  %v188_v39 = vld [vmem:[%s7934_s2 + $0xb8] sm:$0xff] }
  0x1a   :  { %5616 = vmatprep.subr.mxu0 %v5274_v22  ;;  %5586 = vmatpush3.msra.mxu1 %v176_v25  ;;  %v5254_v40 = vld [vmem:[%s7934_s2 + $0x148] sm:$0xff]  ;;  %v172_v41 = vld [vmem:[%s7934_s2 + $0x38] sm:$0xff]  ;;  %v5269_v42 = vld [vmem:[%s7934_s2 + $0x1c0] sm:$0xff] }
  0x1b   :  { %5617 = vmatpush3.msra.mxu0 %v5258_v24  ;;  %5587 = vmatprep.subr.mxu1 %v191_v27  ;;  %v187_v43 = vld [vmem:[%s7934_s2 + $0xb0] sm:$0xff]  ;;  %v5253_v44 = vld [vmem:[%s7934_s2 + $0x140] sm:$0xff]  ;;  %v5268_v46 = vld [vmem:[%s7934_s2 + $0x1b8] sm:$0xff] }
  0x1c   :  { %5618 = vmatprep.subr.mxu0 %v5273_v26  ;;  %5588 = vmatpush3.msra.mxu1 %v175_v29  ;;  %v171_v45 = vld [vmem:[%s7934_s2 + $0x30] sm:$0xff]  ;;  %v186_v47 = vld [vmem:[%s7934_s2 + $0xa8] sm:$0xff]  ;;  %v5252_v48 = vld [vmem:[%s7934_s2 + $0x138] sm:$0xff] }
  0x1d   :  { %5619 = vmatpush3.msra.mxu0 %v5257_v28  ;;  %5589 = vmatprep.subr.mxu1 %v190_v31  ;;  %v170_v49 = vld [vmem:[%s7934_s2 + $0x28] sm:$0xff]  ;;  %v5267_v50 = vld [vmem:[%s7934_s2 + $0x1b0] sm:$0xff]  ;;  %v185_v51 = vld [vmem:[%s7934_s2 + $0xa0] sm:$0xff] }
  0x1e   :  { %5620 = vmatprep.subr.mxu0 %v5272_v30  ;;  %5590 = vmatpush3.msra.mxu1 %v174_v33  ;;  %v5251_v52 = vld [vmem:[%s7934_s2 + $0x130] sm:$0xff]  ;;  %v169_v53 = vld [vmem:[%s7934_s2 + $0x20] sm:$0xff]  ;;  %v5266_v54 = vld [vmem:[%s7934_s2 + $0x1a8] sm:$0xff] }
  0x1f   :  { %5621 = vmatpush3.msra.mxu0 %v5256_v32  ;;  %5591 = vmatprep.subr.mxu1 %v189_v35  ;;  %v184_v55 = vld [vmem:[%s7934_s2 + $0x98] sm:$0xff]  ;;  %v5250_v56 = vld [vmem:[%s7934_s2 + $0x128] sm:$0xff]  ;;  %v5265_v58 = vld [vmem:[%s7934_s2 + $0x1a0] sm:$0xff] }
  0x20   :  { %5622 = vmatprep.subr.mxu0 %v5271_v34  ;;  %5592 = vmatpush3.msra.mxu1 %v173_v37  ;;  %v168_v57 = vld [vmem:[%s7934_s2 + $0x18] sm:$0xff]  ;;  %v183_v59 = vld [vmem:[%s7934_s2 + $0x90] sm:$0xff]  ;;  %v5249_v60 = vld [vmem:[%s7934_s2 + $0x120] sm:$0xff] }
  0x21   :  { %5623 = vmatpush3.msra.mxu0 %v5255_v36  ;;  %5593 = vmatprep.subr.mxu1 %v188_v39  ;;  %v5264_v61 = vld [vmem:[%s7934_s2 + $0x198] sm:$0xff]  ;;  %v5263_v63 = vld [vmem:[%s7934_s2 + $0x190] sm:$0xff]  ;;  %v182_v2 = vld [vmem:[%s7934_s2 + $0x88] sm:$0xff] }
  0x22   :  { %5624 = vmatprep.subr.mxu0 %v5270_v38  ;;  %5594 = vmatpush3.msra.mxu1 %v172_v41  ;;  %v5248_v62 = vld [vmem:[%s7934_s2 + $0x118] sm:$0xff]  ;;  %v167_v0 = vld [vmem:[%s7934_s2 + $0x10] sm:$0xff]  ;;  %v5262_v3 = vld [vmem:[%s7934_s2 + $0x188] sm:$0xff] }
  0x23   :  { %5625 = vmatpush3.msra.mxu0 %v5254_v40  ;;  %5595 = vmatprep.subr.mxu1 %v187_v43  ;;  %v5247_v1 = vld [vmem:[%s7934_s2 + $0x110] sm:$0xff]  ;;  %v166_v4 = vld [vmem:[%s7934_s2 + $0x8] sm:$0xff]  ;;  %v181_v6 = vld [vmem:[%s7934_s2 + $0x80] sm:$0xff] }
  0x24   :  { %5626 = vmatprep.subr.mxu0 %v5269_v42  ;;  %5596 = vmatpush3.msra.mxu1 %v171_v45  ;;  %v5246_v5 = vld [vmem:[%s7934_s2 + $0x108] sm:$0xff]  ;;  %v5261_v7 = vld [vmem:[%s7934_s2 + $0x180] sm:$0xff]  ;;  %v5310_v10 = vld [vmem:[%s7934_s2 + $0x2f8] sm:$0xff] }
  0x25   :  { %5627 = vmatpush3.msra.mxu0 %v5253_v44  ;;  %5597 = vmatprep.subr.mxu1 %v186_v47  ;;  %v165_v8 = vld [vmem:[%s7934_s2] sm:$0xff]  ;;  %v5344_v11 = vld [vmem:[%s7934_s2 + $0x3f8] sm:$0xff]  ;;  %v5309_v25 = vld [vmem:[%s7934_s2 + $0x2f0] sm:$0xff] }
  0x26   :  { %5628 = vmatprep.subr.mxu0 %v5268_v46  ;;  %5598 = vmatpush3.msra.mxu1 %v170_v49  ;;  %v5245_v9 = vld [vmem:[%s7934_s2 + $0x100] sm:$0xff]  ;;  %v5294_v23 = vld [vmem:[%s7934_s2 + $0x278] sm:$0xff]  ;;  %v5343_v26 = vld [vmem:[%s7934_s2 + $0x3f0] sm:$0xff] }
  0x27   :  { %5629 = vmatpush3.msra.mxu0 %v5252_v48  ;;  %5599 = vmatprep.subr.mxu1 %v185_v51  ;;  %v78_v16 = vld [vmem:[%s7936_s25] sm:$0x3]  ;;  %v5328_v24 = vld [vmem:[%s7934_s2 + $0x378] sm:$0xff]  ;;  %v5293_v27 = vld [vmem:[%s7934_s2 + $0x270] sm:$0xff] }
  0x28   :  { %5630 = vmatprep.subr.mxu0 %v5267_v50  ;;  %5600 = vmatpush3.msra.mxu1 %v169_v53  ;;  %v87_v17 = vrot.slane %v78_v16, %v86_v14  ;;  %v83_v18 = vrot.slane %v78_v16, %v82_v15  ;;  %v5327_v28 = vld [vmem:[%s7934_s2 + $0x370] sm:$0xff]  ;;  %v5308_v29 = vld [vmem:[%s7934_s2 + $0x2e8] sm:$0xff]  ;;  %v5307_v33 = vld [vmem:[%s7934_s2 + $0x2e0] sm:$0xff] }
  0x29   :  { %5631 = vmatpush3.msra.mxu0 %v5251_v52  ;;  %5601 = vmatprep.subr.mxu1 %v184_v55  ;;  %v5342_v30 = vld [vmem:[%s7934_s2 + $0x3e8] sm:$0xff]  ;;  %v5341_v34 = vld [vmem:[%s7934_s2 + $0x3e0] sm:$0xff]  ;;  %v5306_v37 = vld [vmem:[%s7934_s2 + $0x2d8] sm:$0xff] }
  0x2a   :  { %5632 = vmatprep.subr.mxu0 %v5266_v54  ;;  %5602 = vmatpush3.msra.mxu1 %v168_v57  ;;  %v5292_v31 = vld [vmem:[%s7934_s2 + $0x268] sm:$0xff]  ;;  %v5291_v35 = vld [vmem:[%s7934_s2 + $0x260] sm:$0xff]  ;;  %v5340_v38 = vld [vmem:[%s7934_s2 + $0x3d8] sm:$0xff] }
  0x2b   :  { %5633 = vmatpush3.msra.mxu0 %v5250_v56  ;;  %5603 = vmatprep.subr.mxu1 %v183_v59  ;;  %v5326_v32 = vld [vmem:[%s7934_s2 + $0x368] sm:$0xff]  ;;  %v5325_v36 = vld [vmem:[%s7934_s2 + $0x360] sm:$0xff]  ;;  %v5290_v39 = vld [vmem:[%s7934_s2 + $0x258] sm:$0xff] }
  0x2c   :  { %5634 = vmatprep.subr.mxu0 %v5265_v58  ;;  %5604 = vmatpush3.msra.mxu1 %v167_v0  ;;  %v5324_v40 = vld [vmem:[%s7934_s2 + $0x358] sm:$0xff]  ;;  %v5305_v41 = vld [vmem:[%s7934_s2 + $0x2d0] sm:$0xff]  ;;  %v5304_v45 = vld [vmem:[%s7934_s2 + $0x2c8] sm:$0xff] }
  0x2d   :  { %5635 = vmatpush3.msra.mxu0 %v5249_v60  ;;  %5605 = vmatprep.subr.mxu1 %v182_v2  ;;  %v5339_v42 = vld [vmem:[%s7934_s2 + $0x3d0] sm:$0xff]  ;;  %v5338_v46 = vld [vmem:[%s7934_s2 + $0x3c8] sm:$0xff]  ;;  %v5303_v49 = vld [vmem:[%s7934_s2 + $0x2c0] sm:$0xff] }
  0x2e   :  { %5636 = vmatprep.subr.mxu0 %v5264_v61  ;;  %5606 = vmatpush3.msra.mxu1 %v166_v4  ;;  %v5289_v43 = vld [vmem:[%s7934_s2 + $0x250] sm:$0xff]  ;;  %v5288_v47 = vld [vmem:[%s7934_s2 + $0x248] sm:$0xff]  ;;  %v5337_v50 = vld [vmem:[%s7934_s2 + $0x3c0] sm:$0xff] }
  0x2f   :  { %5637 = vmatpush3.msra.mxu0 %v5248_v62  ;;  %5607 = vmatprep.subr.mxu1 %v181_v6  ;;  %v5323_v44 = vld [vmem:[%s7934_s2 + $0x350] sm:$0xff]  ;;  %v5322_v48 = vld [vmem:[%s7934_s2 + $0x348] sm:$0xff]  ;;  %v5287_v51 = vld [vmem:[%s7934_s2 + $0x240] sm:$0xff] }
  0x30   :  { %5638 = vmatprep.subr.mxu0 %v5263_v63  ;;  %5608 = vmatpush3.msra.mxu1 %v165_v8  ;;  %v5321_v52 = vld [vmem:[%s7934_s2 + $0x340] sm:$0xff]  ;;  %v5302_v53 = vld [vmem:[%s7934_s2 + $0x2b8] sm:$0xff]  ;;  %v5301_v57 = vld [vmem:[%s7934_s2 + $0x2b0] sm:$0xff] }
  0x31   :  { %5639 = vmatpush3.msra.mxu0 %v5247_v1  ;;  %5647 = vmatprep.subr.mxu1 %v5310_v10  ;;  %v5336_v54 = vld [vmem:[%s7934_s2 + $0x3b8] sm:$0xff]  ;;  %v5335_v58 = vld [vmem:[%s7934_s2 + $0x3b0] sm:$0xff]  ;;  %v5300_v61 = vld [vmem:[%s7934_s2 + $0x2a8] sm:$0xff] }
  0x32   :  { %5640 = vmatprep.subr.mxu0 %v5262_v3  ;;  %v5286_v55 = vld [vmem:[%s7934_s2 + $0x238] sm:$0xff]  ;;  %v5285_v59 = vld [vmem:[%s7934_s2 + $0x230] sm:$0xff]  ;;  %v5334_v62 = vld [vmem:[%s7934_s2 + $0x3a8] sm:$0xff] }
  0x33   :  { %5641 = vmatpush3.msra.mxu0 %v5246_v5  ;;  %v5320_v56 = vld [vmem:[%s7934_s2 + $0x338] sm:$0xff]  ;;  %v5319_v60 = vld [vmem:[%s7934_s2 + $0x330] sm:$0xff]  ;;  %v5284_v63 = vld [vmem:[%s7934_s2 + $0x228] sm:$0xff] }
  0x34   :  { %5642 = vmatprep.subr.mxu0 %v5261_v7  ;;  %v5318_v0 = vld [vmem:[%s7934_s2 + $0x328] sm:$0xff]  ;;  %v5299_v1 = vld [vmem:[%s7934_s2 + $0x2a0] sm:$0xff]  ;;  %v5298_v5 = vld [vmem:[%s7934_s2 + $0x298] sm:$0xff] }
  0x35   :  { %5643 = vmatpush3.msra.mxu0 %v5245_v9  ;;  %v5333_v2 = vld [vmem:[%s7934_s2 + $0x3a0] sm:$0xff]  ;;  %v5332_v6 = vld [vmem:[%s7934_s2 + $0x398] sm:$0xff]  ;;  %v5297_v9 = vld [vmem:[%s7934_s2 + $0x290] sm:$0xff] }
  0x36   :  { %5682 = vmatprep.subr.mxu0 %v5344_v11  ;;  %v5283_v3 = vld [vmem:[%s7934_s2 + $0x220] sm:$0xff]  ;;  %v5282_v7 = vld [vmem:[%s7934_s2 + $0x218] sm:$0xff]  ;;  %v5331_v10 = vld [vmem:[%s7934_s2 + $0x390] sm:$0xff] }
  0x37   :  { %v5317_v4 = vld [vmem:[%s7934_s2 + $0x320] sm:$0xff]  ;;  %v5316_v8 = vld [vmem:[%s7934_s2 + $0x318] sm:$0xff]  ;;  %v5281_v11 = vld [vmem:[%s7934_s2 + $0x210] sm:$0xff] }
  0x38   :  { %v5315_v12 = vld [vmem:[%s7934_s2 + $0x310] sm:$0xff]  ;;  %v5296_v14 = vld [vmem:[%s7934_s2 + $0x288] sm:$0xff] }
  0x39   :  { %v5330_v15 = vld [vmem:[%s7934_s2 + $0x388] sm:$0xff] }
  0x3a   :  { %v5280_v16 = vld [vmem:[%s7934_s2 + $0x208] sm:$0xff] }
  0xd6   :  { %v160_v19 = vpop.f32.mrf.mxu0 }
  0xd7   :  { %v6757_v22 = vadd.f32 %v160_v19, %v83_v18  ;;  %v5295_v18 = vld [vmem:[%s7934_s2 + $0x280] sm:$0xff] }
  0xd8   :  { %v162_v20 = vpop.f32.mrf.mxu0  ;;  %v5329_v19 = vld [vmem:[%s7934_s2 + $0x380] sm:$0xff] }
  0xd9   :  { %v6755_v21 = vadd.f32 %v162_v20, %v87_v17  ;;  %v5314_v17 = vld [vmem:[%s7934_s2 + $0x308] sm:$0xff]  ;;  %v5279_v20 = vld [vmem:[%s7934_s2 + $0x200] sm:$0xff] }
  0xdb   :  { %268 = vmatprep.mubr.f32.mxu1 %v6755_v21  ;;  %407 = vmatprep.mubr.f32.mxu0 %v6755_v21 }
  0xdc   :  { %269 = vmatmul.mubr.f32.vlgmr.msra.gmra.mxu1 %v6757_v22  ;;  %408 = vmatmul.mubr.f32.vlgmr.msra.gmra.mxu0 %v6757_v22 }
  0xdd   :  { %5648 = vmatpush3.msra.mxu1 %v5294_v23  ;;  %5683 = vmatpush3.msra.mxu0 %v5328_v24  ;;  %v5313_v23 = vld [vmem:[%s7934_s2 + $0x300] sm:$0xff]  ;;  %v5378_v24 = vld [vmem:[%s7934_s2 + $0x4f8] sm:$0xff] }
  0xde   :  { %5649 = vmatprep.subr.mxu1 %v5309_v25  ;;  %545 = vmatprep.mubr.f32.mxu1 %v6755_v21  ;;  %v5412_v25 = vld [vmem:[%s7934_s2 + $0x5f8] sm:$0xff] }
  0xdf   :  { %5684 = vmatprep.subr.mxu0 %v5343_v26  ;;  %683 = vmatprep.mubr.f32.mxu0 %v6755_v21  ;;  %v5362_v26 = vld [vmem:[%s7934_s2 + $0x478] sm:$0xff] }
  0xe0   :  { %5650 = vmatpush3.msra.mxu1 %v5293_v27  ;;  %5685 = vmatpush3.msra.mxu0 %v5327_v28  ;;  %v5396_v27 = vld [vmem:[%s7934_s2 + $0x578] sm:$0xff]  ;;  %v5377_v28 = vld [vmem:[%s7934_s2 + $0x4f0] sm:$0xff] }
  0xe1   :  { %5651 = vmatprep.subr.mxu1 %v5308_v29  ;;  %5686 = vmatprep.subr.mxu0 %v5342_v30  ;;  %v5411_v29 = vld [vmem:[%s7934_s2 + $0x5f0] sm:$0xff] }
  0xe2   :  { %5652 = vmatpush3.msra.mxu1 %v5292_v31  ;;  %5687 = vmatpush3.msra.mxu0 %v5326_v32  ;;  %v5361_v30 = vld [vmem:[%s7934_s2 + $0x470] sm:$0xff]  ;;  %v5376_v32 = vld [vmem:[%s7934_s2 + $0x4e8] sm:$0xff] }
  0xe3   :  { %5653 = vmatprep.subr.mxu1 %v5307_v33  ;;  %5688 = vmatprep.subr.mxu0 %v5341_v34  ;;  %v5395_v31 = vld [vmem:[%s7934_s2 + $0x570] sm:$0xff]  ;;  %v5410_v33 = vld [vmem:[%s7934_s2 + $0x5e8] sm:$0xff] }
  0xe4   :  { %5654 = vmatpush3.msra.mxu1 %v5291_v35  ;;  %5689 = vmatpush3.msra.mxu0 %v5325_v36  ;;  %v5360_v34 = vld [vmem:[%s7934_s2 + $0x468] sm:$0xff]  ;;  %v5375_v36 = vld [vmem:[%s7934_s2 + $0x4e0] sm:$0xff] }
  0xe5   :  { %5655 = vmatprep.subr.mxu1 %v5306_v37  ;;  %5690 = vmatprep.subr.mxu0 %v5340_v38  ;;  %v5394_v35 = vld [vmem:[%s7934_s2 + $0x568] sm:$0xff]  ;;  %v5409_v37 = vld [vmem:[%s7934_s2 + $0x5e0] sm:$0xff] }
  0xe6   :  { %5656 = vmatpush3.msra.mxu1 %v5290_v39  ;;  %5691 = vmatpush3.msra.mxu0 %v5324_v40  ;;  %v5359_v38 = vld [vmem:[%s7934_s2 + $0x460] sm:$0xff]  ;;  %v5374_v40 = vld [vmem:[%s7934_s2 + $0x4d8] sm:$0xff] }
  0xe7   :  { %5657 = vmatprep.subr.mxu1 %v5305_v41  ;;  %5692 = vmatprep.subr.mxu0 %v5339_v42  ;;  %v5393_v39 = vld [vmem:[%s7934_s2 + $0x560] sm:$0xff]  ;;  %v5408_v41 = vld [vmem:[%s7934_s2 + $0x5d8] sm:$0xff] }
  0xe8   :  { %5658 = vmatpush3.msra.mxu1 %v5289_v43  ;;  %5693 = vmatpush3.msra.mxu0 %v5323_v44  ;;  %v5358_v42 = vld [vmem:[%s7934_s2 + $0x458] sm:$0xff]  ;;  %v5373_v44 = vld [vmem:[%s7934_s2 + $0x4d0] sm:$0xff] }
  0xe9   :  { %5659 = vmatprep.subr.mxu1 %v5304_v45  ;;  %5694 = vmatprep.subr.mxu0 %v5338_v46  ;;  %v5392_v43 = vld [vmem:[%s7934_s2 + $0x558] sm:$0xff]  ;;  %v5407_v45 = vld [vmem:[%s7934_s2 + $0x5d0] sm:$0xff] }
  0xea   :  { %5660 = vmatpush3.msra.mxu1 %v5288_v47  ;;  %5695 = vmatpush3.msra.mxu0 %v5322_v48  ;;  %v5357_v46 = vld [vmem:[%s7934_s2 + $0x450] sm:$0xff]  ;;  %v5372_v48 = vld [vmem:[%s7934_s2 + $0x4c8] sm:$0xff] }
  0xeb   :  { %5661 = vmatprep.subr.mxu1 %v5303_v49  ;;  %5696 = vmatprep.subr.mxu0 %v5337_v50  ;;  %v5391_v47 = vld [vmem:[%s7934_s2 + $0x550] sm:$0xff]  ;;  %v5406_v49 = vld [vmem:[%s7934_s2 + $0x5c8] sm:$0xff] }
  0xec   :  { %5662 = vmatpush3.msra.mxu1 %v5287_v51  ;;  %5697 = vmatpush3.msra.mxu0 %v5321_v52  ;;  %v5356_v50 = vld [vmem:[%s7934_s2 + $0x448] sm:$0xff]  ;;  %v5371_v52 = vld [vmem:[%s7934_s2 + $0x4c0] sm:$0xff] }
  0xed   :  { %5663 = vmatprep.subr.mxu1 %v5302_v53  ;;  %5698 = vmatprep.subr.mxu0 %v5336_v54  ;;  %v5390_v51 = vld [vmem:[%s7934_s2 + $0x548] sm:$0xff]  ;;  %v5405_v53 = vld [vmem:[%s7934_s2 + $0x5c0] sm:$0xff] }
  0xee   :  { %5664 = vmatpush3.msra.mxu1 %v5286_v55  ;;  %5699 = vmatpush3.msra.mxu0 %v5320_v56  ;;  %v5355_v54 = vld [vmem:[%s7934_s2 + $0x440] sm:$0xff]  ;;  %v5370_v56 = vld [vmem:[%s7934_s2 + $0x4b8] sm:$0xff] }
  0xef   :  { %5665 = vmatprep.subr.mxu1 %v5301_v57  ;;  %5700 = vmatprep.subr.mxu0 %v5335_v58  ;;  %v5389_v55 = vld [vmem:[%s7934_s2 + $0x540] sm:$0xff]  ;;  %v5404_v57 = vld [vmem:[%s7934_s2 + $0x5b8] sm:$0xff] }
  0xf0   :  { %5666 = vmatpush3.msra.mxu1 %v5285_v59  ;;  %5701 = vmatpush3.msra.mxu0 %v5319_v60  ;;  %v5354_v58 = vld [vmem:[%s7934_s2 + $0x438] sm:$0xff]  ;;  %v5369_v60 = vld [vmem:[%s7934_s2 + $0x4b0] sm:$0xff] }
  0xf1   :  { %5667 = vmatprep.subr.mxu1 %v5300_v61  ;;  %5702 = vmatprep.subr.mxu0 %v5334_v62  ;;  %v5388_v59 = vld [vmem:[%s7934_s2 + $0x538] sm:$0xff]  ;;  %v5403_v61 = vld [vmem:[%s7934_s2 + $0x5b0] sm:$0xff] }
  0xf2   :  { %5668 = vmatpush3.msra.mxu1 %v5284_v63  ;;  %5703 = vmatpush3.msra.mxu0 %v5318_v0  ;;  %v5353_v62 = vld [vmem:[%s7934_s2 + $0x430] sm:$0xff]  ;;  %v5368_v0 = vld [vmem:[%s7934_s2 + $0x4a8] sm:$0xff] }
  0xf3   :  { %5669 = vmatprep.subr.mxu1 %v5299_v1  ;;  %5704 = vmatprep.subr.mxu0 %v5333_v2  ;;  %v5387_v63 = vld [vmem:[%s7934_s2 + $0x530] sm:$0xff]  ;;  %v5402_v1 = vld [vmem:[%s7934_s2 + $0x5a8] sm:$0xff] }
  0xf4   :  { %5670 = vmatpush3.msra.mxu1 %v5283_v3  ;;  %5705 = vmatpush3.msra.mxu0 %v5317_v4  ;;  %v5352_v2 = vld [vmem:[%s7934_s2 + $0x428] sm:$0xff]  ;;  %v5367_v4 = vld [vmem:[%s7934_s2 + $0x4a0] sm:$0xff] }
  0xf5   :  { %5671 = vmatprep.subr.mxu1 %v5298_v5  ;;  %5706 = vmatprep.subr.mxu0 %v5332_v6  ;;  %v5386_v3 = vld [vmem:[%s7934_s2 + $0x528] sm:$0xff]  ;;  %v5401_v5 = vld [vmem:[%s7934_s2 + $0x5a0] sm:$0xff] }
  0xf6   :  { %5672 = vmatpush3.msra.mxu1 %v5282_v7  ;;  %5707 = vmatpush3.msra.mxu0 %v5316_v8  ;;  %v5351_v6 = vld [vmem:[%s7934_s2 + $0x420] sm:$0xff]  ;;  %v5366_v8 = vld [vmem:[%s7934_s2 + $0x498] sm:$0xff] }
  0xf7   :  { %5673 = vmatprep.subr.mxu1 %v5297_v9  ;;  %5708 = vmatprep.subr.mxu0 %v5331_v10  ;;  %v5385_v7 = vld [vmem:[%s7934_s2 + $0x520] sm:$0xff]  ;;  %v5400_v9 = vld [vmem:[%s7934_s2 + $0x598] sm:$0xff] }
  0xf8   :  { %5674 = vmatpush3.msra.mxu1 %v5281_v11  ;;  %5709 = vmatpush3.msra.mxu0 %v5315_v12  ;;  %v5350_v10 = vld [vmem:[%s7934_s2 + $0x418] sm:$0xff]  ;;  %v5365_v12 = vld [vmem:[%s7934_s2 + $0x490] sm:$0xff] }
  0xf9   :  { %5675 = vmatprep.subr.mxu1 %v5296_v14  ;;  %5710 = vmatprep.subr.mxu0 %v5330_v15  ;;  %v5384_v11 = vld [vmem:[%s7934_s2 + $0x518] sm:$0xff]  ;;  %v5399_v14 = vld [vmem:[%s7934_s2 + $0x590] sm:$0xff] }
  0xfa   :  { %5676 = vmatpush3.msra.mxu1 %v5280_v16  ;;  %5711 = vmatpush3.msra.mxu0 %v5314_v17  ;;  %v5349_v15 = vld [vmem:[%s7934_s2 + $0x410] sm:$0xff]  ;;  %v5364_v17 = vld [vmem:[%s7934_s2 + $0x488] sm:$0xff] }
  0xfb   :  { %5677 = vmatprep.subr.mxu1 %v5295_v18  ;;  %5712 = vmatprep.subr.mxu0 %v5329_v19  ;;  %v5383_v16 = vld [vmem:[%s7934_s2 + $0x510] sm:$0xff]  ;;  %v5398_v18 = vld [vmem:[%s7934_s2 + $0x588] sm:$0xff] }
  0xfc   :  { %5678 = vmatpush3.msra.mxu1 %v5279_v20  ;;  %5713 = vmatpush3.msra.mxu0 %v5313_v23  ;;  %v5348_v19 = vld [vmem:[%s7934_s2 + $0x408] sm:$0xff]  ;;  %v5363_v23 = vld [vmem:[%s7934_s2 + $0x480] sm:$0xff] }
  0xfd   :  { %546 = vmatmul.mubr.f32.vlgmr.msra.gmra.mxu1 %v6757_v22  ;;  %684 = vmatmul.mubr.f32.vlgmr.msra.gmra.mxu0 %v6757_v22  ;;  %v5382_v20 = vld [vmem:[%s7934_s2 + $0x508] sm:$0xff] }
  0xfe   :  { %5717 = vmatprep.subr.mxu1 %v5378_v24  ;;  %5752 = vmatprep.subr.mxu0 %v5412_v25  ;;  %v5397_v24 = vld [vmem:[%s7934_s2 + $0x580] sm:$0xff] }
  0xff   :  { %5718 = vmatpush3.msra.mxu1 %v5362_v26  ;;  %821 = vmatprep.mubr.f32.mxu1 %v6755_v21  ;;  %v5347_v25 = vld [vmem:[%s7934_s2 + $0x400] sm:$0xff] }
 0x100   :  { %5753 = vmatpush3.msra.mxu0 %v5396_v27  ;;  %959 = vmatprep.mubr.f32.mxu0 %v6755_v21  ;;  %v5381_v26 = vld [vmem:[%s7934_s2 + $0x500] sm:$0xff]  ;;  %v5446_v27 = vld [vmem:[%s7934_s2 + $0x6f8] sm:$0xff] }
 0x101   :  { %5719 = vmatprep.subr.mxu1 %v5377_v28  ;;  %5754 = vmatprep.subr.mxu0 %v5411_v29  ;;  %v5480_v28 = vld [vmem:[%s7934_s2 + $0x7f8] sm:$0xff] }
 0x102   :  { %5720 = vmatpush3.msra.mxu1 %v5361_v30  ;;  %5755 = vmatpush3.msra.mxu0 %v5395_v31  ;;  %v5430_v29 = vld [vmem:[%s7934_s2 + $0x678] sm:$0xff]  ;;  %v5445_v31 = vld [vmem:[%s7934_s2 + $0x6f0] sm:$0xff] }
 0x103   :  { %5721 = vmatprep.subr.mxu1 %v5376_v32  ;;  %5756 = vmatprep.subr.mxu0 %v5410_v33  ;;  %v5464_v30 = vld [vmem:[%s7934_s2 + $0x778] sm:$0xff]  ;;  %v5479_v32 = vld [vmem:[%s7934_s2 + $0x7f0] sm:$0xff] }
 0x104   :  { %5722 = vmatpush3.msra.mxu1 %v5360_v34  ;;  %5757 = vmatpush3.msra.mxu0 %v5394_v35  ;;  %v5429_v33 = vld [vmem:[%s7934_s2 + $0x670] sm:$0xff]  ;;  %v5444_v35 = vld [vmem:[%s7934_s2 + $0x6e8] sm:$0xff] }
 0x105   :  { %5723 = vmatprep.subr.mxu1 %v5375_v36  ;;  %5758 = vmatprep.subr.mxu0 %v5409_v37  ;;  %v5463_v34 = vld [vmem:[%s7934_s2 + $0x770] sm:$0xff]  ;;  %v5478_v36 = vld [vmem:[%s7934_s2 + $0x7e8] sm:$0xff] }
 0x106   :  { %5724 = vmatpush3.msra.mxu1 %v5359_v38  ;;  %5759 = vmatpush3.msra.mxu0 %v5393_v39  ;;  %v5428_v37 = vld [vmem:[%s7934_s2 + $0x668] sm:$0xff]  ;;  %v5477_v39 = vld [vmem:[%s7934_s2 + $0x7e0] sm:$0xff] }
 0x107   :  { %5725 = vmatprep.subr.mxu1 %v5374_v40  ;;  %5760 = vmatprep.subr.mxu0 %v5408_v41  ;;  %v5462_v38 = vld [vmem:[%s7934_s2 + $0x768] sm:$0xff]  ;;  %v5427_v40 = vld [vmem:[%s7934_s2 + $0x660] sm:$0xff] }
 0x108   :  { %5726 = vmatpush3.msra.mxu1 %v5358_v42  ;;  %5761 = vmatpush3.msra.mxu0 %v5392_v43  ;;  %v5461_v41 = vld [vmem:[%s7934_s2 + $0x760] sm:$0xff]  ;;  %v5442_v42 = vld [vmem:[%s7934_s2 + $0x6d8] sm:$0xff] }
 0x109   :  { %5727 = vmatprep.subr.mxu1 %v5373_v44  ;;  %5762 = vmatprep.subr.mxu0 %v5407_v45  ;;  %v5476_v43 = vld [vmem:[%s7934_s2 + $0x7d8] sm:$0xff] }
 0x10a   :  { %5728 = vmatpush3.msra.mxu1 %v5357_v46  ;;  %5763 = vmatpush3.msra.mxu0 %v5391_v47  ;;  %v5426_v44 = vld [vmem:[%s7934_s2 + $0x658] sm:$0xff]  ;;  %v5441_v46 = vld [vmem:[%s7934_s2 + $0x6d0] sm:$0xff] }
 0x10b   :  { %5729 = vmatprep.subr.mxu1 %v5372_v48  ;;  %5764 = vmatprep.subr.mxu0 %v5406_v49  ;;  %v5460_v45 = vld [vmem:[%s7934_s2 + $0x758] sm:$0xff]  ;;  %v5475_v47 = vld [vmem:[%s7934_s2 + $0x7d0] sm:$0xff] }
 0x10c   :  { %5730 = vmatpush3.msra.mxu1 %v5356_v50  ;;  %5765 = vmatpush3.msra.mxu0 %v5390_v51  ;;  %v5425_v48 = vld [vmem:[%s7934_s2 + $0x650] sm:$0xff]  ;;  %v5440_v50 = vld [vmem:[%s7934_s2 + $0x6c8] sm:$0xff] }
 0x10d   :  { %5731 = vmatprep.subr.mxu1 %v5371_v52  ;;  %5766 = vmatprep.subr.mxu0 %v5405_v53  ;;  %v5459_v49 = vld [vmem:[%s7934_s2 + $0x750] sm:$0xff]  ;;  %v5474_v51 = vld [vmem:[%s7934_s2 + $0x7c8] sm:$0xff] }
 0x10e   :  { %5732 = vmatpush3.msra.mxu1 %v5355_v54  ;;  %5767 = vmatpush3.msra.mxu0 %v5389_v55  ;;  %v5424_v52 = vld [vmem:[%s7934_s2 + $0x648] sm:$0xff]  ;;  %v5439_v54 = vld [vmem:[%s7934_s2 + $0x6c0] sm:$0xff] }
 0x10f   :  { %5733 = vmatprep.subr.mxu1 %v5370_v56  ;;  %5768 = vmatprep.subr.mxu0 %v5404_v57  ;;  %v5458_v53 = vld [vmem:[%s7934_s2 + $0x748] sm:$0xff]  ;;  %v5473_v55 = vld [vmem:[%s7934_s2 + $0x7c0] sm:$0xff] }
 0x110   :  { %5734 = vmatpush3.msra.mxu1 %v5354_v58  ;;  %5769 = vmatpush3.msra.mxu0 %v5388_v59  ;;  %v5423_v56 = vld [vmem:[%s7934_s2 + $0x640] sm:$0xff]  ;;  %v5438_v58 = vld [vmem:[%s7934_s2 + $0x6b8] sm:$0xff] }
 0x111   :  { %5735 = vmatprep.subr.mxu1 %v5369_v60  ;;  %5770 = vmatprep.subr.mxu0 %v5403_v61  ;;  %v5457_v57 = vld [vmem:[%s7934_s2 + $0x740] sm:$0xff]  ;;  %v5472_v59 = vld [vmem:[%s7934_s2 + $0x7b8] sm:$0xff] }
 0x112   :  { %5736 = vmatpush3.msra.mxu1 %v5353_v62  ;;  %5771 = vmatpush3.msra.mxu0 %v5387_v63  ;;  %v5422_v60 = vld [vmem:[%s7934_s2 + $0x638] sm:$0xff]  ;;  %v5437_v62 = vld [vmem:[%s7934_s2 + $0x6b0] sm:$0xff] }
 0x113   :  { %5737 = vmatprep.subr.mxu1 %v5368_v0  ;;  %5772 = vmatprep.subr.mxu0 %v5402_v1  ;;  %v5456_v61 = vld [vmem:[%s7934_s2 + $0x738] sm:$0xff]  ;;  %v5471_v63 = vld [vmem:[%s7934_s2 + $0x7b0] sm:$0xff] }
 0x114   :  { %5738 = vmatpush3.msra.mxu1 %v5352_v2  ;;  %5773 = vmatpush3.msra.mxu0 %v5386_v3  ;;  %v5421_v0 = vld [vmem:[%s7934_s2 + $0x630] sm:$0xff]  ;;  %v5436_v2 = vld [vmem:[%s7934_s2 + $0x6a8] sm:$0xff] }
 0x115   :  { %5739 = vmatprep.subr.mxu1 %v5367_v4  ;;  %5774 = vmatprep.subr.mxu0 %v5401_v5  ;;  %v5455_v1 = vld [vmem:[%s7934_s2 + $0x730] sm:$0xff]  ;;  %v5470_v3 = vld [vmem:[%s7934_s2 + $0x7a8] sm:$0xff] }
 0x116   :  { %5740 = vmatpush3.msra.mxu1 %v5351_v6  ;;  %5775 = vmatpush3.msra.mxu0 %v5385_v7  ;;  %v5420_v4 = vld [vmem:[%s7934_s2 + $0x628] sm:$0xff]  ;;  %v5435_v6 = vld [vmem:[%s7934_s2 + $0x6a0] sm:$0xff] }
 0x117   :  { %5741 = vmatprep.subr.mxu1 %v5366_v8  ;;  %5776 = vmatprep.subr.mxu0 %v5400_v9  ;;  %v5454_v5 = vld [vmem:[%s7934_s2 + $0x728] sm:$0xff]  ;;  %v5469_v7 = vld [vmem:[%s7934_s2 + $0x7a0] sm:$0xff] }
 0x118   :  { %5742 = vmatpush3.msra.mxu1 %v5350_v10  ;;  %5777 = vmatpush3.msra.mxu0 %v5384_v11  ;;  %v5419_v8 = vld [vmem:[%s7934_s2 + $0x620] sm:$0xff]  ;;  %v5434_v10 = vld [vmem:[%s7934_s2 + $0x698] sm:$0xff] }
 0x119   :  { %5743 = vmatprep.subr.mxu1 %v5365_v12  ;;  %5778 = vmatprep.subr.mxu0 %v5399_v14  ;;  %v5453_v9 = vld [vmem:[%s7934_s2 + $0x720] sm:$0xff]  ;;  %v5468_v11 = vld [vmem:[%s7934_s2 + $0x798] sm:$0xff] }
 0x11a   :  { %5744 = vmatpush3.msra.mxu1 %v5349_v15  ;;  %5779 = vmatpush3.msra.mxu0 %v5383_v16  ;;  %v5418_v12 = vld [vmem:[%s7934_s2 + $0x618] sm:$0xff]  ;;  %v5433_v15 = vld [vmem:[%s7934_s2 + $0x690] sm:$0xff] }
 0x11b   :  { %5745 = vmatprep.subr.mxu1 %v5364_v17  ;;  %5780 = vmatprep.subr.mxu0 %v5398_v18  ;;  %v5452_v14 = vld [vmem:[%s7934_s2 + $0x718] sm:$0xff]  ;;  %v5467_v16 = vld [vmem:[%s7934_s2 + $0x790] sm:$0xff] }
 0x11c   :  { %5746 = vmatpush3.msra.mxu1 %v5348_v19  ;;  %5781 = vmatpush3.msra.mxu0 %v5382_v20  ;;  %v5417_v17 = vld [vmem:[%s7934_s2 + $0x610] sm:$0xff]  ;;  %v5432_v19 = vld [vmem:[%s7934_s2 + $0x688] sm:$0xff] }
 0x11d   :  { %5747 = vmatprep.subr.mxu1 %v5363_v23  ;;  %5782 = vmatprep.subr.mxu0 %v5397_v24  ;;  %v5451_v18 = vld [vmem:[%s7934_s2 + $0x710] sm:$0xff]  ;;  %v5466_v20 = vld [vmem:[%s7934_s2 + $0x788] sm:$0xff] }
 0x11e   :  { %5748 = vmatpush3.msra.mxu1 %v5347_v25  ;;  %5783 = vmatpush3.msra.mxu0 %v5381_v26  ;;  %v5416_v23 = vld [vmem:[%s7934_s2 + $0x608] sm:$0xff]  ;;  %v5431_v25 = vld [vmem:[%s7934_s2 + $0x680] sm:$0xff] }
 0x11f   :  { %822 = vmatmul.mubr.f32.vlgmr.msra.gmra.mxu1 %v6757_v22  ;;  %960 = vmatmul.mubr.f32.vlgmr.msra.gmra.mxu0 %v6757_v22  ;;  %v5450_v24 = vld [vmem:[%s7934_s2 + $0x708] sm:$0xff]  ;;  %v5465_v26 = vld [vmem:[%s7934_s2 + $0x780] sm:$0xff] }
 0x120   :  { %5787 = vmatprep.subr.mxu1 %v5446_v27  ;;  %5822 = vmatprep.subr.mxu0 %v5480_v28  ;;  %v5415_v27 = vld [vmem:[%s7934_s2 + $0x600] sm:$0xff] }
 0x121   :  { %5788 = vmatpush3.msra.mxu1 %v5430_v29  ;;  %1097 = vmatprep.mubr.f32.mxu1 %v6755_v21  ;;  %v5449_v28 = vld [vmem:[%s7934_s2 + $0x700] sm:$0xff]  ;;  %v6399_v29 = vmov 1966171168  }
 0x122   :  { %5823 = vmatpush3.msra.mxu0 %v5464_v30  ;;  %1235 = vmatprep.mubr.f32.mxu0 %v6755_v21  ;;  %v5443_v21 = vld [vmem:[%s7934_s2 + $0x6e0] sm:$0xff]  ;;  %v276_v30 = vunpack.c.l.s4 %v6399_v29 }
 0x123   :  { %5789 = vmatprep.subr.mxu1 %v5445_v31  ;;  %5824 = vmatprep.subr.mxu0 %v5479_v32 }
 0x124   :  { %5790 = vmatpush3.msra.mxu1 %v5429_v33  ;;  %5825 = vmatpush3.msra.mxu0 %v5463_v34  ;;  %v277_v31 = vunpack.c.0.s8 %v276_v30  ;;  %v5244_v34 = vld [vmem:[%s7937_s29] ss:$0 sm:$0xff] }
 0x125   :  { %5791 = vmatprep.subr.mxu1 %v5444_v35  ;;  %5826 = vmatprep.subr.mxu0 %v5478_v36  ;;  %v5278_v36 = vld [vmem:[%s7937_s29 + $0x1] ss:$0 sm:$0xff] }
 0x126   :  { %5792 = vmatpush3.msra.mxu1 %v5428_v37  ;;  %5827 = vmatpush3.msra.mxu0 %v5462_v38  ;;  %v7352_v38 = vsub.s32 %v277_v31, %v6748_v13 }
 0x127   :  { %5793 = vmatprep.subr.mxu1 %v5443_v21  ;;  %5828 = vmatprep.subr.mxu0 %v5477_v39 }
 0x128   :  { %5794 = vmatpush3.msra.mxu1 %v5427_v40  ;;  %5829 = vmatpush3.msra.mxu0 %v5461_v41 }
 0x129   :  { %5795 = vmatprep.subr.mxu1 %v5442_v42  ;;  %5830 = vmatprep.subr.mxu0 %v5476_v43 }
 0x12a   :  { %5796 = vmatpush3.msra.mxu1 %v5426_v44  ;;  %5831 = vmatpush3.msra.mxu0 %v5460_v45 }
 0x12b   :  { %5797 = vmatprep.subr.mxu1 %v5441_v46  ;;  %5832 = vmatprep.subr.mxu0 %v5475_v47 }
 0x12c   :  { %5798 = vmatpush3.msra.mxu1 %v5425_v48  ;;  %5833 = vmatpush3.msra.mxu0 %v5459_v49 }
 0x12d   :  { %5799 = vmatprep.subr.mxu1 %v5440_v50  ;;  %5834 = vmatprep.subr.mxu0 %v5474_v51  ;;  %v5312_v50 = vld [vmem:[%s7937_s29 + $0x2] ss:$0 sm:$0xff] }
 0x12e   :  { %5800 = vmatpush3.msra.mxu1 %v5424_v52  ;;  %5835 = vmatpush3.msra.mxu0 %v5458_v53  ;;  %v5346_v52 = vld [vmem:[%s7937_s29 + $0x3] ss:$0 sm:$0xff] }
 0x12f   :  { %5801 = vmatprep.subr.mxu1 %v5439_v54  ;;  %5836 = vmatprep.subr.mxu0 %v5473_v55 }
 0x130   :  { %5802 = vmatpush3.msra.mxu1 %v5423_v56  ;;  %5837 = vmatpush3.msra.mxu0 %v5457_v57 }
 0x131   :  { %5803 = vmatprep.subr.mxu1 %v5438_v58  ;;  %5838 = vmatprep.subr.mxu0 %v5472_v59 }
 0x132   :  { %5804 = vmatpush3.msra.mxu1 %v5422_v60  ;;  %5839 = vmatpush3.msra.mxu0 %v5456_v61 }
 0x133   :  { %5805 = vmatprep.subr.mxu1 %v5437_v62  ;;  %5840 = vmatprep.subr.mxu0 %v5471_v63 }
 0x134   :  { %5806 = vmatpush3.msra.mxu1 %v5421_v0  ;;  %5841 = vmatpush3.msra.mxu0 %v5455_v1 }
 0x135   :  { %5807 = vmatprep.subr.mxu1 %v5436_v2  ;;  %5842 = vmatprep.subr.mxu0 %v5470_v3 }
 0x136   :  { %5808 = vmatpush3.msra.mxu1 %v5420_v4  ;;  %5843 = vmatpush3.msra.mxu0 %v5454_v5  ;;  %v5380_v4 = vld [vmem:[%s7937_s29 + $0x4] ss:$0 sm:$0xff] }
 0x137   :  { %5809 = vmatprep.subr.mxu1 %v5435_v6  ;;  %5844 = vmatprep.subr.mxu0 %v5469_v7  ;;  %v5414_v6 = vld [vmem:[%s7937_s29 + $0x5] ss:$0 sm:$0xff] }
 0x138   :  { %5810 = vmatpush3.msra.mxu1 %v5419_v8  ;;  %5845 = vmatpush3.msra.mxu0 %v5453_v9 }
 0x139   :  { %5811 = vmatprep.subr.mxu1 %v5434_v10  ;;  %5846 = vmatprep.subr.mxu0 %v5468_v11 }
 0x13a   :  { %5812 = vmatpush3.msra.mxu1 %v5418_v12  ;;  %5847 = vmatpush3.msra.mxu0 %v5452_v14 }
 0x13b   :  { %5813 = vmatprep.subr.mxu1 %v5433_v15  ;;  %5848 = vmatprep.subr.mxu0 %v5467_v16 }
 0x13c   :  { %5814 = vmatpush3.msra.mxu1 %v5417_v17  ;;  %5849 = vmatpush3.msra.mxu0 %v5451_v18 }
 0x13d   :  { %5815 = vmatprep.subr.mxu1 %v5432_v19  ;;  %5850 = vmatprep.subr.mxu0 %v5466_v20 }
 0x13e   :  { %5816 = vmatpush3.msra.mxu1 %v5416_v23  ;;  %5851 = vmatpush3.msra.mxu0 %v5450_v24 }
 0x13f   :  { %5817 = vmatprep.subr.mxu1 %v5431_v25  ;;  %5852 = vmatprep.subr.mxu0 %v5465_v26  ;;  %v5448_v25 = vld [vmem:[%s7937_s29 + $0x6] ss:$0 sm:$0xff] }
 0x140   :  { %5818 = vmatpush3.msra.mxu1 %v5415_v27  ;;  %5853 = vmatpush3.msra.mxu0 %v5449_v28  ;;  %v5482_v27 = vld [vmem:[%s7937_s29 + $0x7] ss:$0 sm:$0xff]  ;;  %s7416_s29 = smov 0  }
 0x141   :  { %1098 = vmatmul.mubr.f32.vlgmr.msra.gmra.mxu1 %v6757_v22  ;;  %1236 = vmatmul.mubr.f32.vlgmr.msra.gmra.mxu0 %v6757_v22 }
 0x19c   :  { %v5609_v32 = vpop.f32.mrf.mxu1  ;;  %v5644_v33 = vpop.f32.mrf.mxu0 }
 0x19e   :  { %v5610_v35 = vpop.f32.mrf.mxu1  ;;  %v5645_v37 = vpop.f32.mrf.mxu0 }
 0x19f   :  { %v5611_v21 = vadd.f32 %v5610_v35, %v5609_v32  ;;  %v5646_v22 = vadd.f32 %v5645_v37, %v5644_v33 }
 0x1a1   :  { %v271_v39 = vadd.f32 %v5611_v21, %v5244_v34  ;;  %v410_v40 = vadd.f32 %v5646_v22, %v5278_v36 }
 0x1a3   :  { %v281_v41 = vrot.slane %v271_v39, %v7352_v38  ;;  %v420_v42 = vrot.slane %v410_v40, %v7352_v38 }
 0x1a5   :  { %v282_v43 = vcombine.high %v281_v41, %v281_v41  ;;  %v289_v44 = vrot.slane %v281_v41, %v7352_v38  ;;  %v421_v45 = vcombine.high %v420_v42, %v420_v42  ;;  %v428_v46 = vrot.slane %v420_v42, %v7352_v38 }
 0x1a7   :  { %v296_v47 = vrot.slane %v282_v43, %v7352_v38  ;;  %300 = vst.msk [vmem:[#allocation2] sm:$0x1] %vm299_vm1, %v289_v44  ;;  %v435_v13 = vrot.slane %v421_v45, %v7352_v38  ;;  %438 = vst.msk [vmem:[#allocation2 + $0x1] sm:$0x1] %vm299_vm1, %v428_v46 }
 0x1a9   :  { %301 = vst.msk [vmem:[#allocation2 + $0x8] sm:$0x1] %vm299_vm1, %v296_v47  ;;  %439 = vst.msk [vmem:[#allocation2 + $0x9] sm:$0x1] %vm299_vm1, %v435_v13 }
 0x1bd   :  { %v5679_v48 = vpop.f32.mrf.mxu1  ;;  %v5714_v49 = vpop.f32.mrf.mxu0 }
 0x1bf   :  { %v5680_v51 = vpop.f32.mrf.mxu1  ;;  %v5715_v53 = vpop.f32.mrf.mxu0 }
 0x1c0   :  { %v5681_v54 = vadd.f32 %v5680_v51, %v5679_v48  ;;  %v5716_v55 = vadd.f32 %v5715_v53, %v5714_v49 }
 0x1c2   :  { %v548_v56 = vadd.f32 %v5681_v54, %v5312_v50  ;;  %v686_v57 = vadd.f32 %v5716_v55, %v5346_v52 }
 0x1c4   :  { %v558_v58 = vrot.slane %v548_v56, %v7352_v38  ;;  %v696_v59 = vrot.slane %v686_v57, %v7352_v38 }
 0x1c6   :  { %v559_v60 = vcombine.high %v558_v58, %v558_v58  ;;  %v566_v61 = vrot.slane %v558_v58, %v7352_v38  ;;  %v697_v62 = vcombine.high %v696_v59, %v696_v59  ;;  %v704_v63 = vrot.slane %v696_v59, %v7352_v38 }
 0x1c8   :  { %v573_v0 = vrot.slane %v559_v60, %v7352_v38  ;;  %576 = vst.msk [vmem:[#allocation2 + $0x2] sm:$0x1] %vm299_vm1, %v566_v61  ;;  %v711_v1 = vrot.slane %v697_v62, %v7352_v38  ;;  %714 = vst.msk [vmem:[#allocation2 + $0x3] sm:$0x1] %vm299_vm1, %v704_v63 }
 0x1ca   :  { %577 = vst.msk [vmem:[#allocation2 + $0xa] sm:$0x1] %vm299_vm1, %v573_v0  ;;  %715 = vst.msk [vmem:[#allocation2 + $0xb] sm:$0x1] %vm299_vm1, %v711_v1 }
 0x1df   :  { %v5749_v2 = vpop.f32.mrf.mxu1  ;;  %v5784_v3 = vpop.f32.mrf.mxu0 }
 0x1e1   :  { %v5750_v5 = vpop.f32.mrf.mxu1  ;;  %v5785_v7 = vpop.f32.mrf.mxu0 }
 0x1e2   :  { %v5751_v8 = vadd.f32 %v5750_v5, %v5749_v2  ;;  %v5786_v9 = vadd.f32 %v5785_v7, %v5784_v3 }
 0x1e4   :  { %v824_v10 = vadd.f32 %v5751_v8, %v5380_v4  ;;  %v962_v11 = vadd.f32 %v5786_v9, %v5414_v6 }
 0x1e6   :  { %v834_v12 = vrot.slane %v824_v10, %v7352_v38  ;;  %v972_v14 = vrot.slane %v962_v11, %v7352_v38 }
 0x1e8   :  { %v835_v15 = vcombine.high %v834_v12, %v834_v12  ;;  %v842_v16 = vrot.slane %v834_v12, %v7352_v38  ;;  %v973_v17 = vcombine.high %v972_v14, %v972_v14  ;;  %v980_v18 = vrot.slane %v972_v14, %v7352_v38 }
 0x1ea   :  { %v849_v19 = vrot.slane %v835_v15, %v7352_v38  ;;  %852 = vst.msk [vmem:[#allocation2 + $0x4] sm:$0x1] %vm299_vm1, %v842_v16  ;;  %v987_v20 = vrot.slane %v973_v17, %v7352_v38  ;;  %990 = vst.msk [vmem:[#allocation2 + $0x5] sm:$0x1] %vm299_vm1, %v980_v18 }
 0x1ec   :  { %853 = vst.msk [vmem:[#allocation2 + $0xc] sm:$0x1] %vm299_vm1, %v849_v19  ;;  %991 = vst.msk [vmem:[#allocation2 + $0xd] sm:$0x1] %vm299_vm1, %v987_v20 }
 0x201   :  { %v5819_v23 = vpop.f32.mrf.mxu1  ;;  %v5854_v24 = vpop.f32.mrf.mxu0 }
 0x203   :  { %v5820_v26 = vpop.f32.mrf.mxu1  ;;  %v5855_v28 = vpop.f32.mrf.mxu0 }
 0x204   :  { %v5821_v29 = vadd.f32 %v5820_v26, %v5819_v23  ;;  %v5856_v30 = vadd.f32 %v5855_v28, %v5854_v24 }
 0x206   :  { %v1100_v31 = vadd.f32 %v5821_v29, %v5448_v25  ;;  %v1238_v32 = vadd.f32 %v5856_v30, %v5482_v27 }
 0x208   :  { %v1110_v33 = vrot.slane %v1100_v31, %v7352_v38  ;;  %v1248_v34 = vrot.slane %v1238_v32, %v7352_v38 }
 0x20a   :  { %v1111_v35 = vcombine.high %v1110_v33, %v1110_v33  ;;  %v1118_v36 = vrot.slane %v1110_v33, %v7352_v38  ;;  %v1249_v37 = vcombine.high %v1248_v34, %v1248_v34  ;;  %v1256_v21 = vrot.slane %v1248_v34, %v7352_v38 }
 0x20c   :  { %v1125_v22 = vrot.slane %v1111_v35, %v7352_v38  ;;  %1128 = vst.msk [vmem:[#allocation2 + $0x6] sm:$0x1] %vm299_vm1, %v1118_v36  ;;  %v1263_v39 = vrot.slane %v1249_v37, %v7352_v38  ;;  %1266 = vst.msk [vmem:[#allocation2 + $0x7] sm:$0x1] %vm299_vm1, %v1256_v21 }
 0x20e   :  { %1129 = vst.msk [vmem:[#allocation2 + $0xe] sm:$0x1] %vm299_vm1, %v1125_v22  ;;  %1267 = vst.msk [vmem:[#allocation2 + $0xf] sm:$0x1] %vm299_vm1, %v1263_v39 }
 0x213   :  { %v1268_v40 = vld [vmem:[#allocation2] sm:$0xff]  }
 0x215   :  { %v1269_v41 = vld [vmem:[#allocation2 + $0x8] sm:$0xff]  }
 0x216 LB: > { %s7428_s2 = sshll.u32 %s6396_s29, 5  ;;  %5998 = vmatprep.mubr.msk.f32.mxu1 %vm90_vm0, %v6392_v40  ;;  %5987 = vmatprep.mubr.msk.f32.mxu0 %vm90_vm0, %v6392_v40  ;;  %s7938_s23 = sld [smem:[#allocation11_spill]]  ;;  %v6400_v52 = vmov 0.0   ;;  %vm6401_vm2 = vmmov 0   ;;  %vm1554_vm3 = vcmask 31744   ;;  %vm1709_vm4 = vcmask 64512   ;;  %s6396_s29 = sphi %s7416_s29, %s1275_s29   ;;  %v6392_v40 = vphi %v1268_v40, %v7940_v40   ;;  %v6388_v41 = vphi %v1269_v41, %v7939_v41  }
 0x217   : > { %s1373_s30 = scalar_lea.vmem %s7909_s7, %s7428_s2  ;;  %s1461_s27 = scalar_lea.vmem %s7911_s9, %s7428_s2  ;;  %vm2220_vm5 = vcmask 1043456   ;;  %vm5062_vm6 = vcmask 523264  }
 0x218   : > { %v1377_v38 = vld [vmem:[%s1373_s30 + $0x18] sm:$0xff]  ;;  %v1376_v43 = vld [vmem:[%s1373_s30 + $0x10] sm:$0xff]  ;;  %v1375_v45 = vld [vmem:[%s1373_s30 + $0x8] sm:$0xff]  ;;  %s1378_s26 = scalar_lea.vmem %s7910_s8, %s6396_s29  ;;  %s6402_s5 = smov 124  }
 0x219   : > { %5990 = vmatprep.subr.mxu1 %v1377_v38  ;;  %v1374_v47 = vld [vmem:[%s1373_s30] sm:$0xff]  ;;  %v1465_v48 = vld [vmem:[%s1461_s27 + $0x18] sm:$0xff]  ;;  %v1464_v49 = vld [vmem:[%s1461_s27 + $0x10] sm:$0xff]  ;;  %s1284_s30 = scalar_lea.vmem %s7908_s6, %s6396_s29  ;;  %s6403_s24 = smov 120  }
 0x21a   : > { %5991 = vmatpush3.msra.mxu1 %v1377_v38  ;;  %v1463_v50 = vld [vmem:[%s1461_s27 + $0x8] sm:$0xff]  ;;  %v1462_v51 = vld [vmem:[%s1461_s27] sm:$0xff]  ;;  %s7548_s3 = scalar_lea.vmem %s7913_s11, %s7428_s2  ;;  %s6404_s28 = smov 116  }
 0x21b   : > { %5992 = vmatprep.subr.mxu1 %v1376_v43  ;;  %v5487_v53 = vld [vmem:[%s1378_s26] ss:$0 sm:$0xff]  ;;  %s6405_s26 = smov 112   ;;  %s6406_s0 = smov 108  }
 0x21c   : > { %s1279_s1 = scalar_lea.vmem %s7938_s23, %s7428_s2  ;;  %5993 = vmatpush3.msra.mxu1 %v1376_v43  ;;  %v5484_v54 = vld [vmem:[%s1284_s30] ss:$0 sm:$0xff]  ;;  %s6407_s4 = smov 104  }
 0x21d   : > { %v1283_v42 = vld [vmem:[%s1279_s1 + $0x18] sm:$0xff]  ;;  %v1282_v44 = vld [vmem:[%s1279_s1 + $0x10] sm:$0xff]  ;;  %v1281_v46 = vld [vmem:[%s1279_s1 + $0x8] sm:$0xff]  ;;  %5994 = vmatprep.subr.mxu1 %v1375_v45  ;;  %s6408_s30 = smov 100   ;;  %s4889_s23 = scalar_lea.vmem %s7914_s12, %s6396_s29 }
 0x21e   : > { %5979 = vmatprep.subr.mxu0 %v1283_v42  ;;  %v1280_v13 = vld [vmem:[%s1279_s1] sm:$0xff]  ;;  %5995 = vmatpush3.msra.mxu1 %v1375_v45  ;;  %s1466_s1 = scalar_lea.vmem %s7912_s10, %s6396_s29  ;;  %s4948_s25 = scalar_lea.vmem %s7915_s13, %s7428_s2 }
 0x21f   : > { %5980 = vmatpush3.msra.mxu0 %v1283_v42  ;;  %5996 = vmatprep.subr.mxu1 %v1374_v47  ;;  %v5490_v63 = vld [vmem:[%s1466_s1] ss:$0 sm:$0xff]  ;;  %s5571_s27 = sshll.u32 %s6396_s29, 6  ;;  %s4903_s22 = scalar_lea.vmem %s7920_s18, %s6396_s29 }
 0x220   : > { %5981 = vmatprep.subr.mxu0 %v1282_v44  ;;  %5997 = vmatpush3.msra.mxu1 %v1374_v47  ;;  %s5146_s2 = scalar_lea.vmem %s7921_s19, %s6396_s29 }
 0x221   : > { %5982 = vmatpush3.msra.mxu0 %v1282_v44  ;;  %5999 = vmatmul.mubr.msk.f32.vlgmr.msra.gmra.mxu1 %vm90_vm0, %v6388_v41 }
 0x222   : > { %5983 = vmatprep.subr.mxu0 %v1281_v46  ;;  %6017 = vmatprep.subr.mxu1 %v6400_v52 }
 0x223   : > { %5984 = vmatpush3.msra.mxu0 %v1281_v46  ;;  %6019 = vmatprep.mubr.msk.f32.mxu1 %vm6401_vm2, %v6400_v52 }
 0x224   : > { %5985 = vmatprep.subr.mxu0 %v1280_v13 }
 0x225   : > { %5986 = vmatpush3.msra.mxu0 %v1280_v13 }
 0x226   : > { %5988 = vmatmul.mubr.msk.f32.vlgmr.msra.gmra.mxu0 %vm90_vm0, %v6388_v41  ;;  %6001 = vmatprep.subr.mxu0 %v1465_v48 }
 0x227   : > { %6009 = vmatprep.mubr.msk.f32.mxu0 %vm90_vm0, %v6392_v40  ;;  %6002 = vmatpush3.msra.mxu0 %v1465_v48 }
 0x228   : > { %6003 = vmatprep.subr.mxu0 %v1464_v49 }
 0x229   : > { %6004 = vmatpush3.msra.mxu0 %v1464_v49 }
 0x22a   : > { %6005 = vmatprep.subr.mxu0 %v1463_v50 }
 0x22b   : > { %6006 = vmatpush3.msra.mxu0 %v1463_v50 }
 0x22c   : > { %6007 = vmatprep.subr.mxu0 %v1462_v51 }
 0x22d   : > { %6008 = vmatpush3.msra.mxu0 %v1462_v51 }
 0x22e   : > { %6010 = vmatmul.mubr.msk.f32.vlgmr.msra.gmra.mxu0 %vm90_vm0, %v6388_v41  ;;  %6012 = vmatprep.subr.mxu0 %v6400_v52 }
 0x22f   : > { %6014 = vmatprep.mubr.msk.f32.mxu0 %vm6401_vm2, %v6400_v52 }
 0x2e1   : > { %v6000_v55 = vpop.f32.mrf.mxu1 }
 0x2e2   : > { %v7468_v57 = vadd.f32 %v6000_v55, %v5487_v53 }
 0x2e3   : > { %v1452_v59 = vpop.f32.mrf.mxu1 }
 0x2e4   : > { %v7472_v61 = vadd.f32 %v5487_v53, %v1452_v59  ;;  %1958 = vrot.lane.b32.xlu1 %v7468_v57, %s6402_s5  ;;  %6018 = vmatpush3.xpose.msk.msra.mxu1 %vm1554_vm3, %v7468_v57 }
 0x2e5   : > { %6027 = vmatprep.subr.mxu1 %v6400_v52 }
 0x2e6   : > { %v5989_v56 = vpop.f32.mrf.mxu0  ;;  %6013 = vmatpush3.xpose.msk.msra.mxu0 %vm1554_vm3, %v7472_v61 }
 0x2e7   : > { %v7470_v58 = vadd.f32 %v5989_v56, %v5484_v54  ;;  %6022 = vmatprep.subr.mxu0 %v6400_v52 }
 0x2e8   : > { %v1364_v60 = vpop.f32.mrf.mxu0 }
 0x2e9   : > { %v7478_v62 = vadd.f32 %v5484_v54, %v1364_v60  ;;  %6020 = vmatmul.mubr.msk.f32.vlgmr.msra.gmra.mxu1 %vm1554_vm3, %v7470_v58  ;;  %v1550_v60 = vld [vmem:[%s7548_s3] sm:$0xff] }
 0x2ea   : > { %6029 = vmatprep.mubr.msk.f32.mxu1 %vm6401_vm2, %v6400_v52 }
 0x2eb   : > { %1878 = vrot.lane.b32.xlu1 %v7478_v62, %s6402_s5  ;;  %6015 = vmatmul.mubr.msk.f32.vlgmr.msra.gmra.mxu0 %vm1554_vm3, %v7478_v62 }
 0x2ec   : > { %6024 = vmatprep.mubr.msk.f32.mxu0 %vm6401_vm2, %v6400_v52 }
 0x2ee   : > { %v6011_v0 = vpop.f32.mrf.mxu0 }
 0x2ef   : > { %v7498_v1 = vadd.f32 %v6011_v0, %v5490_v63 }
 0x2f0   : > { %v1540_v2 = vpop.f32.mrf.mxu0 }
 0x2f1   : > { %v7500_v3 = vadd.f32 %v5490_v63, %v1540_v2  ;;  %6028 = vmatpush3.msra.mxu1 %v7498_v1  ;;  %v2213_v2 = vrot.slane %v1550_v60, 4 }
 0x2f2   : > { %6037 = vmatprep.subr.mxu1 %v6400_v52 }
 0x2f3   : > { %6023 = vmatpush3.msra.mxu0 %v7500_v3 }
 0x2f4   : > { %6032 = vmatprep.subr.mxu0 %v6400_v52 }
 0x356   : > { %v1959_v25 = vpop.permute.xlu1 %1958 }
 0x35d   : > { %v1879_v26 = vpop.permute.xlu1 %1878 }
 0x3a9   : > { %v1703_v4 = vpop.f32.mrf.mxu1 }
 0x3aa   : > { %v1708_v9 = vmul.f32 0.5, %v1703_v4 }
 0x3ab   : > { %v1627_v5 = vpop.f32.mrf.mxu0  ;;  %v6021_v6 = vpop.f32.mrf.mxu1 }
 0x3ac   : > { %v1707_v7 = vmul.f32 0.5, %v1627_v5  ;;  %v1713_v11 = vsel %vm1709_vm4, %v1708_v9, -inf }
 0x3ad   : > { %v6016_v8 = vpop.f32.mrf.mxu0 }
 0x3ae   : > { %v1710_v10 = vsel %vm1709_vm4, %v1707_v7, -inf }
 0x3af   : > { %1711 = vmax.xlane.f32.xlu0 %v1710_v10 }
 0x3b3   : > { %1714 = vmax.xlane.f32.xlu0 %v1713_v11 }
 0x3c9   : > { %1880 = vrot.lane.b32.xlu0 %v7472_v61, %s6402_s5 }
 0x438   : > { %v1712_v12 = vpop.xlane.xlu0 %1711 }
 0x439   : > { %v1716_v14 = vsub.f32 %v1707_v7, %v1712_v12 }
 0x43b   : > { %v1718_v17 = vmul.f32 1.442695, %v1716_v14 }
 0x43c   : > { %v1715_v15 = vpop.xlane.xlu0 %1714 }
 0x43d   : > { %v1717_v16 = vsub.f32 %v1708_v9, %v1715_v15 }
 0x43f   : > { %v1720_v18 = vmul.f32 1.442695, %v1717_v16 }
 0x440   : > { %v1881_v34 = vpop.permute.xlu0 %1880 }
 0x441   : > { %6280 = vpow2.f32 %v1720_v18 }
 0x442   : > { %6282 = vpow2.f32 %v1718_v17 }
 0x44e   : > { %v6281_v19 = vpop.eup %6280 }
 0x44f   : > { %v1725_v20 = vsel %vm1709_vm4, %v6281_v19, 0.0  ;;  %v6283_v23 = vpop.eup %6282 }
 0x450   : > { %1726 = vadd.xlane.f32.xlu1 %v1725_v20  ;;  %v1722_v24 = vsel %vm1709_vm4, %v6283_v23, 0.0 }
 0x454   : > { %1723 = vadd.xlane.f32.xlu1 %v1722_v24 }
 0x465   : > { %1956 = vrot.lane.b32.xlu1 %v7470_v58, %s6402_s5 }
 0x4d9   : > { %v1727_v27 = vpop.xlane.xlu1 %1726 }
 0x4da   : > { %6284 = vrcp.f32 %v1727_v27 }
 0x4dd   : > { %v1724_v28 = vpop.xlane.xlu1 %1723 }
 0x4de   : > { %6286 = vrcp.f32 %v1724_v28 }
 0x4e1   : > { %v1957_v33 = vpop.permute.xlu1 %1956 }
 0x4e7   : > { %v6285_v29 = vpop.eup %6284 }
 0x4e8   : > { %v1731_v30 = vmul.f32 %v6285_v29, %v6281_v19 }
 0x4ea   : > { %6030 = vmatmul.mubr.msk.f32.vlgmr.msra.gmra.mxu1 %vm1709_vm4, %v1731_v30 }
 0x4eb   : > { %v6287_v31 = vpop.eup %6286  ;;  %6038 = vmatpush3.xpose.msk.msra.mxu1 %vm1554_vm3, %v1959_v25  ;;  %6039 = vmatprep.mubr.msk.f32.mxu1 %vm6401_vm2, %v6400_v52 }
 0x4ec   : > { %v1729_v32 = vmul.f32 %v6287_v31, %v6283_v23  ;;  %6047 = vmatprep.subr.mxu1 %v6400_v52 }
 0x4ee   : > { %6025 = vmatmul.mubr.msk.f32.vlgmr.msra.gmra.mxu0 %vm1709_vm4, %v1729_v32  ;;  %6040 = vmatmul.mubr.msk.f32.vlgmr.msra.gmra.mxu1 %vm1554_vm3, %v1957_v33 }
 0x4ef   : > { %6033 = vmatpush3.xpose.msk.msra.mxu0 %vm1554_vm3, %v1881_v34  ;;  %6034 = vmatprep.mubr.msk.f32.mxu0 %vm6401_vm2, %v6400_v52 }
 0x4f0   : > { %6042 = vmatprep.subr.mxu0 %v6400_v52  ;;  %6049 = vmatprep.mubr.msk.f32.mxu1 %vm6401_vm2, %v6400_v52 }
 0x4f2   : > { %6035 = vmatmul.mubr.msk.f32.vlgmr.msra.gmra.mxu0 %vm1554_vm3, %v1879_v26 }
 0x4f3   : > { %6044 = vmatprep.mubr.msk.f32.mxu0 %vm6401_vm2, %v6400_v52 }
 0x5aa   : > { %v1874_v35 = vpop.f32.mrf.mxu1 }
 0x5ac   : > { %v6031_v36 = vpop.f32.mrf.mxu1 }
 0x5ae   : > { %v1801_v37 = vpop.f32.mrf.mxu0  ;;  %v2030_v21 = vpop.f32.mrf.mxu1 }
 0x5af   : > { %v2035_v22 = vmul.f32 0.5, %v2030_v21 }
 0x5b0   : > { %v6026_v39 = vpop.f32.mrf.mxu0  ;;  %v6041_v38 = vpop.f32.mrf.mxu1 }
 0x5b1   : > { %v2039_v42 = vsel %vm1709_vm4, %v2035_v22, -inf }
 0x5b2   : > { %2040 = vmax.xlane.f32.xlu1 %v2039_v42  ;;  %v1952_v43 = vpop.f32.mrf.mxu0 }
 0x5b3   : > { %v2034_v44 = vmul.f32 0.5, %v1952_v43 }
 0x5b4   : > { %v6036_v45 = vpop.f32.mrf.mxu0 }
 0x5b5   : > { %v2036_v46 = vsel %vm1709_vm4, %v2034_v44, -inf }
 0x5b6   : > { %2037 = vmax.xlane.f32.xlu0 %v2036_v46 }
 0x5c3   : > { %2136 = vrot.lane.b32.xlu1 %v7498_v1, %s6402_s5 }
 0x5c7   : > { %2383 = vrot.lane.b32.xlu1 %v7472_v61, %s6403_s24 }
 0x5cb   : > { %2461 = vrot.lane.b32.xlu1 %v7468_v57, %s6403_s24 }
 0x5cf   : > { %2459 = vrot.lane.b32.xlu1 %v7470_v58, %s6403_s24 }
 0x63b   : > { %v2041_v47 = vpop.xlane.xlu1 %2040 }
 0x63c   : > { %v2043_v13 = vsub.f32 %v2035_v22, %v2041_v47 }
 0x63e   : > { %v2046_v48 = vmul.f32 1.442695, %v2043_v13 }
 0x63f   : > { %v2137_v49 = vpop.permute.xlu1 %2136  ;;  %v2038_v50 = vpop.xlane.xlu0 %2037 }
 0x640   : > { %6288 = vpow2.f32 %v2046_v48  ;;  %v2042_v51 = vsub.f32 %v2034_v44, %v2038_v50  ;;  %6048 = vmatpush3.msra.mxu1 %v2137_v49 }
 0x641   : > { %6057 = vmatprep.subr.msk.mxu1 %vm2220_vm5, %v1550_v60 }
 0x642   : > { %v2044_v53 = vmul.f32 1.442695, %v2042_v51 }
 0x643   : > { %v2384_v5 = vpop.permute.xlu1 %2383 }
 0x644   : > { %6290 = vpow2.f32 %v2044_v53 }
 0x647   : > { %v2462_v9 = vpop.permute.xlu1 %2461 }
 0x64b   : > { %v2460_v11 = vpop.permute.xlu1 %2459 }
 0x64d   : > { %v6289_v54 = vpop.eup %6288 }
 0x64e   : > { %v2051_v55 = vsel %vm1709_vm4, %v6289_v54, 0.0 }
 0x64f   : > { %2052 = vadd.xlane.f32.xlu0 %v2051_v55 }
 0x651   : > { %v6291_v56 = vpop.eup %6290 }
 0x652   : > { %v2048_v59 = vsel %vm1709_vm4, %v6291_v56, 0.0 }
 0x653   : > { %2049 = vadd.xlane.f32.xlu0 %v2048_v59 }
 0x669   : > { %2059 = vrot.lane.b32.xlu0 %v7500_v3, %s6402_s5 }
 0x66d   : > { %2381 = vrot.lane.b32.xlu0 %v7478_v62, %s6403_s24 }
 0x6d8   : > { %v2053_v63 = vpop.xlane.xlu0 %2052 }
 0x6d9   : > { %6292 = vrcp.f32 %v2053_v63 }
 0x6dc   : > { %v2050_v0 = vpop.xlane.xlu0 %2049 }
 0x6dd   : > { %6294 = vrcp.f32 %v2050_v0 }
 0x6e0   : > { %v2060_v4 = vpop.permute.xlu0 %2059 }
 0x6e1   : > { %6043 = vmatpush3.msra.mxu0 %v2060_v4 }
 0x6e2   : > { %6052 = vmatprep.subr.msk.mxu0 %vm2220_vm5, %v2213_v2 }
 0x6e4   : > { %v2382_v20 = vpop.permute.xlu0 %2381 }
 0x6e6   : > { %v6293_v6 = vpop.eup %6292 }
 0x6e7   : > { %v2057_v7 = vmul.f32 %v6293_v6, %v6289_v54  ;;  %v7614_v54 = vld [vmem:[%s7548_s3 + $0x8] sm:$0xff] }
 0x6e9   : > { %6050 = vmatmul.mubr.msk.f32.vlgmr.msra.gmra.mxu1 %vm1709_vm4, %v2057_v7 }
 0x6ea   : > { %v6295_v8 = vpop.eup %6294  ;;  %6059 = vmatprep.mubr.msk.f32.mxu1 %vm1554_vm3, %v1801_v37  ;;  %6058 = vmatpush3.msk.msra.mxu1 %vm2220_vm5, %v1550_v60 }
 0x6eb   : > { %6067 = vmatprep.subr.mxu1 %v6400_v52  ;;  %v2055_v10 = vmul.f32 %v6295_v8, %v6291_v56 }
 0x6ed   : > { %6045 = vmatmul.mubr.msk.f32.vlgmr.msra.gmra.mxu0 %vm1709_vm4, %v2055_v10  ;;  %6060 = vmatmul.mubr.msk.f32.vlgmr.msra.gmra.mxu1 %vm1554_vm3, %v1874_v35 }
 0x6ee   : > { %6068 = vmatpush3.xpose.msk.msra.mxu1 %vm1554_vm3, %v2462_v9  ;;  %6069 = vmatprep.mubr.msk.f32.mxu1 %vm6401_vm2, %v6400_v52 }
 0x6ef   : > { %6053 = vmatpush3.msk.msra.mxu0 %vm2220_vm5, %v2213_v2  ;;  %6077 = vmatprep.subr.mxu1 %v6400_v52 }
 0x6f0   : > { %6062 = vmatprep.subr.mxu0 %v6400_v52 }
 0x6f1   : > { %6070 = vmatmul.mubr.msk.f32.vlgmr.msra.gmra.mxu1 %vm1554_vm3, %v2460_v11 }
 0x6f2   : > { %6079 = vmatprep.mubr.msk.f32.mxu1 %vm6401_vm2, %v6400_v52 }
 0x7a9   : > { %v2208_v12 = vpop.f32.mrf.mxu1 }
 0x7ab   : > { %v6051_v14 = vpop.f32.mrf.mxu1 }
 0x7ad   : > { %v2131_v15 = vpop.f32.mrf.mxu0  ;;  %v7570_v16 = vpop.f32.mrf.mxu1 }
 0x7ae   : > { %6054 = vmatprep.mubr.msk.f32.mxu0 %vm1554_vm3, %v2131_v15 }
 0x7af   : > { %v6046_v17 = vpop.f32.mrf.mxu0  ;;  %6055 = vmatmul.mubr.msk.f32.vlgmr.msra.gmra.mxu0 %vm1554_vm3, %v2208_v12  ;;  %v7574_v18 = vpop.f32.mrf.mxu1 }
 0x7b0   : > { %6063 = vmatpush3.xpose.msk.msra.mxu0 %vm1554_vm3, %v2384_v5  ;;  %6064 = vmatprep.mubr.msk.f32.mxu0 %vm6401_vm2, %v6400_v52 }
 0x7b1   : > { %v2533_v19 = vpop.f32.mrf.mxu1  ;;  %6072 = vmatprep.subr.mxu0 %v6400_v52 }
 0x7b2   : > { %v2538_v23 = vmul.f32 0.5, %v2533_v19 }
 0x7b3   : > { %6065 = vmatmul.mubr.msk.f32.vlgmr.msra.gmra.mxu0 %vm1554_vm3, %v2382_v20  ;;  %v6071_v24 = vpop.f32.mrf.mxu1 }
 0x7b4   : > { %v2542_v25 = vsel %vm1709_vm4, %v2538_v23, -inf  ;;  %6074 = vmatprep.mubr.msk.f32.mxu0 %vm6401_vm2, %v6400_v52 }
 0x7b5   : > { %2543 = vmax.xlane.f32.xlu1 %v2542_v25 }
 0x7c6   : > { %2637 = vrot.lane.b32.xlu1 %v7498_v1, %s6403_s24 }
 0x7ca   : > { %2801 = vrot.lane.b32.xlu1 %v7472_v61, %s6404_s28 }
 0x7ce   : > { %2879 = vrot.lane.b32.xlu1 %v7468_v57, %s6404_s28 }
 0x7d2   : > { %2877 = vrot.lane.b32.xlu1 %v7470_v58, %s6404_s28 }
 0x83e   : > { %v2544_v26 = vpop.xlane.xlu1 %2543 }
 0x83f   : > { %v2546_v28 = vsub.f32 %v2538_v23, %v2544_v26 }
 0x841   : > { %v2549_v29 = vmul.f32 1.442695, %v2546_v28 }
 0x842   : > { %v2638_v27 = vpop.permute.xlu1 %2637 }
 0x843   : > { %6078 = vmatpush3.msra.mxu1 %v2638_v27  ;;  %6296 = vpow2.f32 %v2549_v29 }
 0x844   : > { %6087 = vmatprep.subr.mxu1 %v6400_v52 }
 0x846   : > { %v2802_v46 = vpop.permute.xlu1 %2801 }
 0x84a   : > { %v2880_v63 = vpop.permute.xlu1 %2879 }
 0x84e   : > { %v2878_v4 = vpop.permute.xlu1 %2877 }
 0x850   : > { %v6297_v36 = vpop.eup %6296 }
 0x851   : > { %v2554_v37 = vsel %vm1709_vm4, %v6297_v36, 0.0 }
 0x86f   : > { %v7593_v30 = vpop.f32.mrf.mxu0 }
 0x870   : > { %v2378_v10 = vadd.f32 %v7570_v16, %v7593_v30 }
 0x871   : > { %v7595_v31 = vpop.f32.mrf.mxu0 }
 0x872   : > { %v2373_v12 = vadd.f32 %v7574_v18, %v7595_v31 }
 0x873   : > { %v2455_v32 = vpop.f32.mrf.mxu0 }
 0x874   : > { %v2537_v33 = vmul.f32 0.5, %v2455_v32  ;;  %v3131_v32 = vrot.slane %v7614_v54, 4 }
 0x875   : > { %v6066_v34 = vpop.f32.mrf.mxu0 }
 0x876   : > { %v2539_v35 = vsel %vm1709_vm4, %v2537_v33, -inf }
 0x877   : > { %2540 = vmax.xlane.f32.xlu0 %v2539_v35 }
 0x87b   : > { %2555 = vadd.xlane.f32.xlu0 %v2554_v37 }
 0x900   : > { %v2541_v21 = vpop.xlane.xlu0 %2540 }
 0x901   : > { %v2545_v22 = vsub.f32 %v2537_v33, %v2541_v21 }
 0x903   : > { %v2547_v39 = vmul.f32 1.442695, %v2545_v22 }
 0x904   : > { %v2556_v38 = vpop.xlane.xlu0 %2555 }
 0x905   : > { %6298 = vpow2.f32 %v2547_v39 }
 0x906   : > { %6300 = vrcp.f32 %v2556_v38 }
 0x912   : > { %v6299_v42 = vpop.eup %6298 }
 0x913   : > { %v6301_v43 = vpop.eup %6300  ;;  %v2551_v44 = vsel %vm1709_vm4, %v6299_v42, 0.0 }
 0x914   : > { %2552 = vadd.xlane.f32.xlu0 %v2551_v44  ;;  %v2560_v45 = vmul.f32 %v6301_v43, %v6297_v36 }
 0x916   : > { %6080 = vmatmul.mubr.msk.f32.vlgmr.msra.gmra.mxu1 %vm1709_vm4, %v2560_v45 }
 0x917   : > { %6088 = vmatpush3.xpose.msk.msra.mxu1 %vm1554_vm3, %v2802_v46  ;;  %6089 = vmatprep.mubr.msk.f32.mxu1 %vm6401_vm2, %v6400_v52 }
 0x918   : > { %6097 = vmatprep.subr.mxu1 %v6400_v52 }
 0x92a   : > { %2561 = vrot.lane.b32.xlu0 %v7500_v3, %s6403_s24  ;;  %s4953_s24 = scalar_lea.vmem %s7916_s14, %s6396_s29 }
 0x92e   : > { %2799 = vrot.lane.b32.xlu0 %v7478_v62, %s6404_s28 }
 0x99d   : > { %v2553_v47 = vpop.xlane.xlu0 %2552 }
 0x99e   : > { %6302 = vrcp.f32 %v2553_v47 }
 0x9a1   : > { %v2562_v13 = vpop.permute.xlu0 %2561 }
 0x9a2   : > { %6073 = vmatpush3.msra.mxu0 %v2562_v13 }
 0x9a3   : > { %6082 = vmatprep.subr.msk.mxu0 %vm2220_vm5, %v7614_v54 }
 0x9a5   : > { %v2800_v48 = vpop.permute.xlu0 %2799 }
 0x9a6   : > { %6090 = vmatmul.mubr.msk.f32.vlgmr.msra.gmra.mxu1 %vm1554_vm3, %v2800_v48 }
 0x9a7   : > { %6099 = vmatprep.mubr.msk.f32.mxu1 %vm6401_vm2, %v6400_v52 }
 0x9ab   : > { %v6303_v49 = vpop.eup %6302 }
 0x9ac   : > { %v2558_v50 = vmul.f32 %v6303_v49, %v6299_v42 }
 0x9ae   : > { %6075 = vmatmul.mubr.msk.f32.vlgmr.msra.gmra.mxu0 %vm1709_vm4, %v2558_v50 }
 0x9af   : > { %6083 = vmatpush3.msk.msra.mxu0 %vm2220_vm5, %v7614_v54 }
 0x9b0   : > { %6092 = vmatprep.subr.mxu0 %v6400_v52 }
 0x9d6   : > { %v2709_v51 = vpop.f32.mrf.mxu1 }
 0x9d8   : > { %v6081_v53 = vpop.f32.mrf.mxu1 }
 0xa66   : > { %v2873_v55 = vpop.f32.mrf.mxu1 }
 0xa67   : > { %v2955_v56 = vmul.f32 0.5, %v2873_v55 }
 0xa68   : > { %v6091_v59 = vpop.f32.mrf.mxu1 }
 0xa69   : > { %v2957_v60 = vsel %vm1709_vm4, %v2955_v56, -inf }
 0xa6a   : > { %2958 = vmax.xlane.f32.xlu0 %v2957_v60 }
 0xa6e   : > { %v2633_v0 = vpop.f32.mrf.mxu0 }
 0xa6f   : > { %6084 = vmatprep.mubr.msk.f32.mxu0 %vm1554_vm3, %v2633_v0 }
 0xa70   : > { %v6076_v2 = vpop.f32.mrf.mxu0  ;;  %6085 = vmatmul.mubr.msk.f32.vlgmr.msra.gmra.mxu0 %vm1554_vm3, %v2709_v51 }
 0xa71   : > { %6093 = vmatpush3.xpose.msk.msra.mxu0 %vm1554_vm3, %v2880_v63  ;;  %6094 = vmatprep.mubr.msk.f32.mxu0 %vm6401_vm2, %v6400_v52 }
 0xa72   : > { %6102 = vmatprep.subr.mxu0 %v6400_v52 }
 0xa74   : > { %6095 = vmatmul.mubr.msk.f32.vlgmr.msra.gmra.mxu0 %vm1554_vm3, %v2878_v4 }
 0xa75   : > { %6104 = vmatprep.mubr.msk.f32.mxu0 %vm6401_vm2, %v6400_v52 }
 0xaf3   : > { %v2959_v5 = vpop.xlane.xlu0 %2958 }
 0xaf4   : > { %v2963_v6 = vsub.f32 %v2955_v56, %v2959_v5 }
 0xaf6   : > { %v2965_v7 = vmul.f32 1.442695, %v2963_v6 }
 0xaf8   : > { %6304 = vpow2.f32 %v2965_v7 }
 0xb05   : > { %v6305_v8 = vpop.eup %6304 }
 0xb06   : > { %v2969_v9 = vsel %vm1709_vm4, %v6305_v8, 0.0 }
 0xb07   : > { %2970 = vadd.xlane.f32.xlu0 %v2969_v9 }
 0xb30   : > { %v6086_v11 = vpop.f32.mrf.mxu0 }
 0xb31   : > { %v7636_v14 = vadd.f32 %v6086_v11, %v2378_v10 }
 0xb32   : > { %v2788_v15 = vpop.f32.mrf.mxu0 }
 0xb33   : > { %v7638_v17 = vadd.f32 %v2788_v15, %v2373_v12 }
 0xb34   : > { %v2951_v19 = vpop.f32.mrf.mxu0 }
 0xb35   : > { %v2956_v20 = vmul.f32 0.5, %v2951_v19 }
 0xb36   : > { %v6096_v23 = vpop.f32.mrf.mxu0 }
 0xb37   : > { %v2960_v24 = vsel %vm1709_vm4, %v2956_v20, -inf }
 0xb38   : > { %2961 = vmax.xlane.f32.xlu1 %v2960_v24  ;;  %v7710_v24 = vld [vmem:[%s7548_s3 + $0x10] sm:$0xff] }
 0xb49   : > { %3055 = vrot.lane.b32.xlu1 %v7498_v1, %s6404_s28 }
 0xb4d   : > { %3219 = vrot.lane.b32.xlu1 %v7472_v61, %s6405_s26 }
 0xb51   : > { %3297 = vrot.lane.b32.xlu1 %v7468_v57, %s6405_s26 }
 0xb55   : > { %3295 = vrot.lane.b32.xlu1 %v7470_v58, %s6405_s26 }
 0xb90   : > { %v2971_v29 = vpop.xlane.xlu0 %2970 }
 0xbc1   : > { %v2962_v16 = vpop.xlane.xlu1 %2961 }
 0xbc2   : > { %v2964_v18 = vsub.f32 %v2956_v20, %v2962_v16 }
 0xbc4   : > { %v2967_v25 = vmul.f32 1.442695, %v2964_v18 }
 0xbc5   : > { %v3056_v26 = vpop.permute.xlu1 %3055 }
 0xbc6   : > { %6306 = vpow2.f32 %v2967_v25  ;;  %6103 = vmatpush3.msra.mxu0 %v3056_v26 }
 0xbc7   : > { %6112 = vmatprep.subr.mxu0 %v6400_v52  ;;  %6308 = vrcp.f32 %v2971_v29 }
 0xbc9   : > { %v3220_v37 = vpop.permute.xlu1 %3219 }
 0xbcd   : > { %v3298_v38 = vpop.permute.xlu1 %3297 }
 0xbd1   : > { %v3296_v44 = vpop.permute.xlu1 %3295 }
 0xbd3   : > { %v6307_v27 = vpop.eup %6306 }
 0xbd4   : > { %v2972_v28 = vsel %vm1709_vm4, %v6307_v27, 0.0  ;;  %v6309_v31 = vpop.eup %6308 }
 0xbd5   : > { %2973 = vadd.xlane.f32.xlu0 %v2972_v28  ;;  %v2976_v34 = vmul.f32 %v6309_v31, %v6305_v8 }
 0xbeb   : > { %2979 = vrot.lane.b32.xlu0 %v7500_v3, %s6404_s28 }
 0xbef   : > { %3217 = vrot.lane.b32.xlu0 %v7478_v62, %s6405_s26 }
 0xc5e   : > { %v2974_v30 = vpop.xlane.xlu0 %2973 }
 0xc5f   : > { %6310 = vrcp.f32 %v2974_v30 }
 0xc62   : > { %v2980_v33 = vpop.permute.xlu0 %2979 }
 0xc63   : > { %6098 = vmatpush3.msra.mxu1 %v2980_v33 }
 0xc64   : > { %6100 = vmatmul.mubr.msk.f32.vlgmr.msra.gmra.mxu1 %vm1709_vm4, %v2976_v34  ;;  %6107 = vmatprep.subr.msk.mxu1 %vm2220_vm5, %v3131_v32 }
 0xc65   : > { %6108 = vmatpush3.msk.msra.mxu1 %vm2220_vm5, %v3131_v32 }
 0xc66   : > { %6117 = vmatprep.subr.mxu1 %v6400_v52  ;;  %v3218_v21 = vpop.permute.xlu0 %3217 }
 0xc6c   : > { %v6311_v35 = vpop.eup %6310 }
 0xc6d   : > { %v2978_v36 = vmul.f32 %v6311_v35, %v6307_v27 }
 0xc6f   : > { %6105 = vmatmul.mubr.msk.f32.vlgmr.msra.gmra.mxu0 %vm1709_vm4, %v2978_v36 }
 0xc70   : > { %6113 = vmatpush3.xpose.msk.msra.mxu0 %vm1554_vm3, %v3220_v37  ;;  %6114 = vmatprep.mubr.msk.f32.mxu0 %vm6401_vm2, %v6400_v52 }
 0xc71   : > { %6122 = vmatprep.subr.mxu0 %v6400_v52 }
 0xc73   : > { %6115 = vmatmul.mubr.msk.f32.vlgmr.msra.gmra.mxu0 %vm1554_vm3, %v3218_v21 }
 0xc74   : > { %6124 = vmatprep.mubr.msk.f32.mxu0 %vm6401_vm2, %v6400_v52 }
 0xd24   : > { %v3051_v22 = vpop.f32.mrf.mxu1 }
 0xd25   : > { %6109 = vmatprep.mubr.msk.f32.mxu1 %vm1554_vm3, %v3051_v22 }
 0xd26   : > { %v6101_v39 = vpop.f32.mrf.mxu1 }
 0xd2f   : > { %v3127_v42 = vpop.f32.mrf.mxu0 }
 0xd30   : > { %6110 = vmatmul.mubr.msk.f32.vlgmr.msra.gmra.mxu1 %vm1554_vm3, %v3127_v42 }
 0xd31   : > { %6118 = vmatpush3.xpose.msk.msra.mxu1 %vm1554_vm3, %v3298_v38  ;;  %v6106_v43 = vpop.f32.mrf.mxu0  ;;  %6119 = vmatprep.mubr.msk.f32.mxu1 %vm6401_vm2, %v6400_v52 }
 0xd32   : > { %6127 = vmatprep.subr.mxu1 %v6400_v52 }
 0xd33   : > { %v3291_v45 = vpop.f32.mrf.mxu0 }
 0xd34   : > { %v3373_v46 = vmul.f32 0.5, %v3291_v45  ;;  %6120 = vmatmul.mubr.msk.f32.vlgmr.msra.gmra.mxu1 %vm1554_vm3, %v3296_v44 }
 0xd35   : > { %v6116_v47 = vpop.f32.mrf.mxu0  ;;  %6129 = vmatprep.mubr.msk.f32.mxu1 %vm6401_vm2, %v6400_v52 }
 0xd36   : > { %v3375_v13 = vsel %vm1709_vm4, %v3373_v46, -inf }
 0xd37   : > { %3376 = vmax.xlane.f32.xlu0 %v3375_v13 }
 0xdc0   : > { %v3377_v48 = vpop.xlane.xlu0 %3376 }
 0xdc1   : > { %v3381_v49 = vsub.f32 %v3373_v46, %v3377_v48 }
 0xdc3   : > { %v3383_v50 = vmul.f32 1.442695, %v3381_v49 }
 0xdc5   : > { %6312 = vpow2.f32 %v3383_v50 }
 0xdd2   : > { %v6313_v51 = vpop.eup %6312 }
 0xdd3   : > { %v3387_v53 = vsel %vm1709_vm4, %v6313_v51, 0.0 }
 0xdd4   : > { %3388 = vadd.xlane.f32.xlu0 %v3387_v53 }
 0xdf0   : > { %v6111_v54 = vpop.f32.mrf.mxu1 }
 0xdf1   : > { %v7680_v55 = vadd.f32 %v6111_v54, %v7636_v14 }
 0xdf2   : > { %v3206_v56 = vpop.f32.mrf.mxu1 }
 0xdf3   : > { %v7683_v59 = vadd.f32 %v3206_v56, %v7638_v17 }
 0xdf4   : > { %v3369_v60 = vpop.f32.mrf.mxu1 }
 0xdf5   : > { %v3374_v63 = vmul.f32 0.5, %v3369_v60 }
 0xdf6   : > { %v6121_v0 = vpop.f32.mrf.mxu1 }
 0xdf7   : > { %v3378_v2 = vsel %vm1709_vm4, %v3374_v63, -inf }
 0xdf8   : > { %3379 = vmax.xlane.f32.xlu1 %v3378_v2 }
 0xe09   : > { %3473 = vrot.lane.b32.xlu1 %v7498_v1, %s6405_s26 }
 0xe0d   : > { %3637 = vrot.lane.b32.xlu1 %v7472_v61, %s6406_s0 }
 0xe11   : > { %3715 = vrot.lane.b32.xlu1 %v7468_v57, %s6406_s0 }
 0xe15   : > { %3713 = vrot.lane.b32.xlu1 %v7470_v58, %s6406_s0 }
 0xe5d   : > { %v3389_v10 = vpop.xlane.xlu0 %3388 }
 0xe81   : > { %v3380_v4 = vpop.xlane.xlu1 %3379 }
 0xe82   : > { %v3382_v5 = vsub.f32 %v3374_v63, %v3380_v4 }
 0xe84   : > { %v3385_v6 = vmul.f32 1.442695, %v3382_v5 }
 0xe85   : > { %v3474_v7 = vpop.permute.xlu1 %3473 }
 0xe86   : > { %6314 = vpow2.f32 %v3385_v6  ;;  %6128 = vmatpush3.msra.mxu1 %v3474_v7 }
 0xe87   : > { %6137 = vmatprep.subr.mxu1 %v6400_v52  ;;  %6316 = vrcp.f32 %v3389_v10 }
 0xe89   : > { %v3638_v20 = vpop.permute.xlu1 %3637 }
 0xe8d   : > { %v3716_v25 = vpop.permute.xlu1 %3715 }
 0xe91   : > { %v3714_v28 = vpop.permute.xlu1 %3713 }
 0xe93   : > { %v6315_v8 = vpop.eup %6314 }
 0xe94   : > { %v3390_v9 = vsel %vm1709_vm4, %v6315_v8, 0.0  ;;  %v6317_v12 = vpop.eup %6316 }
 0xe95   : > { %3391 = vadd.xlane.f32.xlu0 %v3390_v9  ;;  %v3394_v15 = vmul.f32 %v6317_v12, %v6313_v51 }
 0xeab   : > { %3397 = vrot.lane.b32.xlu0 %v7500_v3, %s6405_s26  ;;  %s7850_s26 = scalar_lea.vmem %s7917_s15, %s5571_s27 }
 0xeaf   : > { %3635 = vrot.lane.b32.xlu0 %v7478_v62, %s6406_s0 }
 0xf1e   : > { %v3392_v11 = vpop.xlane.xlu0 %3391 }
 0xf1f   : > { %6318 = vrcp.f32 %v3392_v11 }
 0xf22   : > { %v3398_v14 = vpop.permute.xlu0 %3397 }
 0xf23   : > { %6123 = vmatpush3.msra.mxu0 %v3398_v14 }
 0xf24   : > { %6125 = vmatmul.mubr.msk.f32.vlgmr.msra.gmra.mxu0 %vm1709_vm4, %v3394_v15  ;;  %6132 = vmatprep.subr.msk.mxu0 %vm2220_vm5, %v7710_v24 }
 0xf25   : > { %6133 = vmatpush3.msk.msra.mxu0 %vm2220_vm5, %v7710_v24 }
 0xf26   : > { %v3636_v23 = vpop.permute.xlu0 %3635  ;;  %6142 = vmatprep.subr.mxu0 %v6400_v52 }
 0xf2c   : > { %v6319_v17 = vpop.eup %6318 }
 0xf2d   : > { %v3396_v19 = vmul.f32 %v6319_v17, %v6315_v8 }
 0xf2f   : > { %6130 = vmatmul.mubr.msk.f32.vlgmr.msra.gmra.mxu1 %vm1709_vm4, %v3396_v19 }
 0xf30   : > { %6138 = vmatpush3.xpose.msk.msra.mxu1 %vm1554_vm3, %v3638_v20  ;;  %6139 = vmatprep.mubr.msk.f32.mxu1 %vm6401_vm2, %v6400_v52 }
 0xf31   : > { %6147 = vmatprep.subr.mxu1 %v6400_v52 }
 0xf33   : > { %6140 = vmatmul.mubr.msk.f32.vlgmr.msra.gmra.mxu1 %vm1554_vm3, %v3636_v23 }
 0xf34   : > { %6149 = vmatprep.mubr.msk.f32.mxu1 %vm6401_vm2, %v6400_v52 }
 0xfe4   : > { %v3469_v16 = vpop.f32.mrf.mxu0 }
 0xfe5   : > { %6134 = vmatprep.mubr.msk.f32.mxu0 %vm1554_vm3, %v3469_v16 }
 0xfe6   : > { %v6126_v18 = vpop.f32.mrf.mxu0 }
 0xfef   : > { %v3545_v26 = vpop.f32.mrf.mxu1 }
 0xff0   : > { %6135 = vmatmul.mubr.msk.f32.vlgmr.msra.gmra.mxu0 %vm1554_vm3, %v3545_v26 }
 0xff1   : > { %6143 = vmatpush3.xpose.msk.msra.mxu0 %vm1554_vm3, %v3716_v25  ;;  %v6131_v27 = vpop.f32.mrf.mxu1  ;;  %6144 = vmatprep.mubr.msk.f32.mxu0 %vm6401_vm2, %v6400_v52 }
 0xff2   : > { %6152 = vmatprep.subr.mxu0 %v6400_v52 }
 0xff3   : > { %v3709_v29 = vpop.f32.mrf.mxu1 }
 0xff4   : > { %v3791_v30 = vmul.f32 0.5, %v3709_v29  ;;  %6145 = vmatmul.mubr.msk.f32.vlgmr.msra.gmra.mxu0 %vm1554_vm3, %v3714_v28 }
 0xff5   : > { %v6141_v31 = vpop.f32.mrf.mxu1  ;;  %6154 = vmatprep.mubr.msk.f32.mxu0 %vm6401_vm2, %v6400_v52 }
 0xff6   : > { %v3793_v32 = vsel %vm1709_vm4, %v3791_v30, -inf }
 0xff7   : > { %3794 = vmax.xlane.f32.xlu0 %v3793_v32 }
0x1080   : > { %v3795_v33 = vpop.xlane.xlu0 %3794 }
0x1081   : > { %v3799_v34 = vsub.f32 %v3791_v30, %v3795_v33 }
0x1083   : > { %v3801_v35 = vmul.f32 1.442695, %v3799_v34 }
0x1085   : > { %6320 = vpow2.f32 %v3801_v35 }
0x1092   : > { %v6321_v36 = vpop.eup %6320 }
0x1093   : > { %v3805_v37 = vsel %vm1709_vm4, %v6321_v36, 0.0 }
0x1094   : > { %3806 = vadd.xlane.f32.xlu0 %v3805_v37 }
0x10b0   : > { %v6136_v21 = vpop.f32.mrf.mxu0 }
0x10b1   : > { %v7729_v22 = vadd.f32 %v6136_v21, %v7680_v55  ;;  %v3967_v55 = vrot.slane %v7710_v24, 4 }
0x10b2   : > { %v3624_v39 = vpop.f32.mrf.mxu0 }
0x10b3   : > { %v7732_v38 = vadd.f32 %v3624_v39, %v7683_v59 }
0x10b4   : > { %v3787_v42 = vpop.f32.mrf.mxu0 }
0x10b5   : > { %v3792_v43 = vmul.f32 0.5, %v3787_v42 }
0x10b6   : > { %v6146_v44 = vpop.f32.mrf.mxu0 }
0x10b7   : > { %v3796_v45 = vsel %vm1709_vm4, %v3792_v43, -inf }
0x10b8   : > { %3797 = vmax.xlane.f32.xlu1 %v3796_v45 }
0x10c9   : > { %3891 = vrot.lane.b32.xlu1 %v7498_v1, %s6406_s0 }
0x10cd   : > { %4055 = vrot.lane.b32.xlu1 %v7472_v61, %s6407_s4 }
0x10d1   : > { %4133 = vrot.lane.b32.xlu1 %v7468_v57, %s6407_s4 }
0x10d5   : > { %4131 = vrot.lane.b32.xlu1 %v7470_v58, %s6407_s4 }
0x111d   : > { %v3807_v51 = vpop.xlane.xlu0 %3806 }
0x1141   : > { %v3798_v46 = vpop.xlane.xlu1 %3797 }
0x1142   : > { %v3800_v47 = vsub.f32 %v3792_v43, %v3798_v46 }
0x1144   : > { %v3803_v13 = vmul.f32 1.442695, %v3800_v47 }
0x1145   : > { %v3892_v48 = vpop.permute.xlu1 %3891 }
0x1146   : > { %6322 = vpow2.f32 %v3803_v13  ;;  %6153 = vmatpush3.msra.mxu0 %v3892_v48 }
0x1147   : > { %6162 = vmatprep.subr.mxu0 %v6400_v52  ;;  %6324 = vrcp.f32 %v3807_v51 }
0x1149   : > { %v4056_v0 = vpop.permute.xlu1 %4055 }
0x114d   : > { %v4134_v6 = vpop.permute.xlu1 %4133 }
0x1151   : > { %v4132_v9 = vpop.permute.xlu1 %4131 }
0x1153   : > { %v6323_v49 = vpop.eup %6322 }
0x1154   : > { %v3808_v50 = vsel %vm1709_vm4, %v6323_v49, 0.0  ;;  %v6325_v54 = vpop.eup %6324 }
0x1155   : > { %3809 = vadd.xlane.f32.xlu0 %v3808_v50  ;;  %v3812_v59 = vmul.f32 %v6325_v54, %v6321_v36 }
0x116b   : > { %3815 = vrot.lane.b32.xlu0 %v7500_v3, %s6406_s0 }
0x116f   : > { %4053 = vrot.lane.b32.xlu0 %v7478_v62, %s6407_s4 }
0x11de   : > { %v3810_v53 = vpop.xlane.xlu0 %3809 }
0x11df   : > { %6326 = vrcp.f32 %v3810_v53 }
0x11e2   : > { %v3816_v56 = vpop.permute.xlu0 %3815 }
0x11e3   : > { %6148 = vmatpush3.msra.mxu1 %v3816_v56 }
0x11e4   : > { %6150 = vmatmul.mubr.msk.f32.vlgmr.msra.gmra.mxu1 %vm1709_vm4, %v3812_v59  ;;  %6157 = vmatprep.subr.msk.mxu1 %vm2220_vm5, %v3967_v55 }
0x11e5   : > { %6158 = vmatpush3.msk.msra.mxu1 %vm2220_vm5, %v3967_v55 }
0x11e6   : > { %6167 = vmatprep.subr.mxu1 %v6400_v52  ;;  %v4054_v2 = vpop.permute.xlu0 %4053 }
0x11ec   : > { %v6327_v60 = vpop.eup %6326 }
0x11ed   : > { %v3814_v63 = vmul.f32 %v6327_v60, %v6323_v49 }
0x11ef   : > { %6155 = vmatmul.mubr.msk.f32.vlgmr.msra.gmra.mxu0 %vm1709_vm4, %v3814_v63 }
0x11f0   : > { %6163 = vmatpush3.xpose.msk.msra.mxu0 %vm1554_vm3, %v4056_v0  ;;  %6164 = vmatprep.mubr.msk.f32.mxu0 %vm6401_vm2, %v6400_v52 }
0x11f1   : > { %6172 = vmatprep.subr.mxu0 %v6400_v52 }
0x11f3   : > { %6165 = vmatmul.mubr.msk.f32.vlgmr.msra.gmra.mxu0 %vm1554_vm3, %v4054_v2 }
0x11f4   : > { %6174 = vmatprep.mubr.msk.f32.mxu0 %vm6401_vm2, %v6400_v52 }
0x12a4   : > { %v3887_v4 = vpop.f32.mrf.mxu1 }
0x12a5   : > { %6159 = vmatprep.mubr.msk.f32.mxu1 %vm1554_vm3, %v3887_v4 }
0x12a6   : > { %v6151_v5 = vpop.f32.mrf.mxu1 }
0x12af   : > { %v3963_v7 = vpop.f32.mrf.mxu0 }
0x12b0   : > { %6160 = vmatmul.mubr.msk.f32.vlgmr.msra.gmra.mxu1 %vm1554_vm3, %v3963_v7 }
0x12b1   : > { %6168 = vmatpush3.xpose.msk.msra.mxu1 %vm1554_vm3, %v4134_v6  ;;  %v6156_v8 = vpop.f32.mrf.mxu0  ;;  %6169 = vmatprep.mubr.msk.f32.mxu1 %vm6401_vm2, %v6400_v52 }
0x12b2   : > { %6177 = vmatprep.subr.mxu1 %v6400_v52 }
0x12b3   : > { %v4127_v10 = vpop.f32.mrf.mxu0 }
0x12b4   : > { %v4209_v11 = vmul.f32 0.5, %v4127_v10  ;;  %6170 = vmatmul.mubr.msk.f32.vlgmr.msra.gmra.mxu1 %vm1554_vm3, %v4132_v9 }
0x12b5   : > { %v6166_v12 = vpop.f32.mrf.mxu0  ;;  %6179 = vmatprep.mubr.msk.f32.mxu1 %vm6401_vm2, %v6400_v52 }
0x12b6   : > { %v4211_v14 = vsel %vm1709_vm4, %v4209_v11, -inf }
0x12b7   : > { %4212 = vmax.xlane.f32.xlu0 %v4211_v14 }
0x1340   : > { %v4213_v15 = vpop.xlane.xlu0 %4212 }
0x1341   : > { %v4217_v17 = vsub.f32 %v4209_v11, %v4213_v15 }
0x1343   : > { %v4219_v19 = vmul.f32 1.442695, %v4217_v17 }
0x1345   : > { %6328 = vpow2.f32 %v4219_v19 }
0x1352   : > { %v6329_v20 = vpop.eup %6328 }
0x1353   : > { %v4223_v23 = vsel %vm1709_vm4, %v6329_v20, 0.0 }
0x1354   : > { %4224 = vadd.xlane.f32.xlu0 %v4223_v23 }
0x1370   : > { %v6161_v24 = vpop.f32.mrf.mxu1 }
0x1371   : > { %v7774_v16 = vadd.f32 %v6161_v24, %v7729_v22 }
0x1372   : > { %v4042_v18 = vpop.f32.mrf.mxu1 }
0x1373   : > { %v7777_v25 = vadd.f32 %v4042_v18, %v7732_v38  ;;  %v1553_v38 = vld [vmem:[%s7548_s3 + $0x18] sm:$0xff]  ;;  %s5054_s3 = scalar_lea.vmem %s7918_s16, %s6396_s29 }
0x1374   : > { %v4205_v26 = vpop.f32.mrf.mxu1  ;;  %v4803_v17 = vrot.slane %v1553_v38, 4 }
0x1375   : > { %v4210_v27 = vmul.f32 0.5, %v4205_v26  ;;  %v5565_v26 = vld [vmem:[%s4889_s23] ss:$0 sm:$0xff] }
0x1376   : > { %v6171_v28 = vpop.f32.mrf.mxu1 }
0x1377   : > { %v4214_v29 = vsel %vm1709_vm4, %v4210_v27, -inf }
0x1378   : > { %4215 = vmax.xlane.f32.xlu1 %v4214_v29 }
0x1389   : > { %4309 = vrot.lane.b32.xlu1 %v7498_v1, %s6407_s4 }
0x138d   : > { %4473 = vrot.lane.b32.xlu1 %v7472_v61, %s6408_s30 }
0x1391   : > { %4551 = vrot.lane.b32.xlu1 %v7468_v57, %s6408_s30 }
0x1395   : > { %4549 = vrot.lane.b32.xlu1 %v7470_v58, %s6408_s30 }
0x13dd   : > { %v4225_v57 = vpop.xlane.xlu0 %4224 }
0x1401   : > { %v4216_v30 = vpop.xlane.xlu1 %4215 }
0x1402   : > { %v4218_v31 = vsub.f32 %v4210_v27, %v4216_v30 }
0x1404   : > { %v4221_v32 = vmul.f32 1.442695, %v4218_v31 }
0x1405   : > { %v4310_v33 = vpop.permute.xlu1 %4309 }
0x1406   : > { %6330 = vpow2.f32 %v4221_v32  ;;  %6178 = vmatpush3.msra.mxu1 %v4310_v33 }
0x1407   : > { %6187 = vmatprep.subr.mxu1 %v6400_v52  ;;  %6332 = vrcp.f32 %v4225_v57 }
0x1409   : > { %v4474_v39 = vpop.permute.xlu1 %4473 }
0x140d   : > { %v4552_v44 = vpop.permute.xlu1 %4551 }
0x1411   : > { %v4550_v47 = vpop.permute.xlu1 %4549 }
0x1413   : > { %v6331_v34 = vpop.eup %6330 }
0x1414   : > { %v4226_v35 = vsel %vm1709_vm4, %v6331_v34, 0.0  ;;  %v6333_v61 = vpop.eup %6332 }
0x1415   : > { %4227 = vadd.xlane.f32.xlu0 %v4226_v35  ;;  %v4230_v37 = vmul.f32 %v6333_v61, %v6329_v20 }
0x142b   : > { %4233 = vrot.lane.b32.xlu0 %v7500_v3, %s6407_s4  ;;  %s4901_s4 = scalar_lea.vmem %s7919_s17, %s6396_s29 }
0x142f   : > { %4471 = vrot.lane.b32.xlu0 %v7478_v62, %s6408_s30 }
0x149e   : > { %v4228_v58 = vpop.xlane.xlu0 %4227 }
0x149f   : > { %6334 = vrcp.f32 %v4228_v58 }
0x14a2   : > { %v4234_v36 = vpop.permute.xlu0 %4233 }
0x14a3   : > { %6173 = vmatpush3.msra.mxu0 %v4234_v36 }
0x14a4   : > { %6175 = vmatmul.mubr.msk.f32.vlgmr.msra.gmra.mxu0 %vm1709_vm4, %v4230_v37  ;;  %6182 = vmatprep.subr.msk.mxu0 %vm2220_vm5, %v1553_v38 }
0x14a5   : > { %6183 = vmatpush3.msk.msra.mxu0 %vm2220_vm5, %v1553_v38  ;;  %v4951_v38 = vld [vmem:[%s4948_s25 + $0x10] sm:$0xff] }
0x14a6   : > { %v4472_v62 = vpop.permute.xlu0 %4471  ;;  %6192 = vmatprep.subr.mxu0 %v6400_v52 }
0x14ac   : > { %v6335_v21 = vpop.eup %6334 }
0x14ad   : > { %v4232_v22 = vmul.f32 %v6335_v21, %v6331_v34 }
0x14af   : > { %6180 = vmatmul.mubr.msk.f32.vlgmr.msra.gmra.mxu1 %vm1709_vm4, %v4232_v22 }
0x14b0   : > { %6188 = vmatpush3.xpose.msk.msra.mxu1 %vm1554_vm3, %v4474_v39  ;;  %6189 = vmatprep.mubr.msk.f32.mxu1 %vm6401_vm2, %v6400_v52 }
0x14b1   : > { %6197 = vmatprep.subr.mxu1 %v6400_v52 }
0x14b3   : > { %6190 = vmatmul.mubr.msk.f32.vlgmr.msra.gmra.mxu1 %vm1554_vm3, %v4472_v62 }
0x14b4   : > { %6199 = vmatprep.mubr.msk.f32.mxu1 %vm6401_vm2, %v6400_v52 }
0x1564   : > { %v4305_v42 = vpop.f32.mrf.mxu0 }
0x1565   : > { %6184 = vmatprep.mubr.msk.f32.mxu0 %vm1554_vm3, %v4305_v42  ;;  %v4950_v42 = vld [vmem:[%s4948_s25 + $0x8] sm:$0xff] }
0x1566   : > { %v6176_v43 = vpop.f32.mrf.mxu0 }
0x1567   : > { %v4949_v43 = vld [vmem:[%s4948_s25] sm:$0xff] }
0x156f   : > { %v4381_v45 = vpop.f32.mrf.mxu1 }
0x1570   : > { %6185 = vmatmul.mubr.msk.f32.vlgmr.msra.gmra.mxu0 %vm1554_vm3, %v4381_v45  ;;  %v5052_v45 = vld [vmem:[%s7850_s26 + $0x30] sm:$0xff] }
0x1571   : > { %6193 = vmatpush3.xpose.msk.msra.mxu0 %vm1554_vm3, %v4552_v44  ;;  %v6181_v46 = vpop.f32.mrf.mxu1  ;;  %6194 = vmatprep.mubr.msk.f32.mxu0 %vm6401_vm2, %v6400_v52  ;;  %v5053_v44 = vld [vmem:[%s7850_s26 + $0x38] sm:$0xff] }
0x1572   : > { %6202 = vmatprep.subr.mxu0 %v6400_v52  ;;  %v5051_v46 = vld [vmem:[%s7850_s26 + $0x28] sm:$0xff] }
0x1573   : > { %v4545_v13 = vpop.f32.mrf.mxu1 }
0x1574   : > { %v4627_v48 = vmul.f32 0.5, %v4545_v13  ;;  %6195 = vmatmul.mubr.msk.f32.vlgmr.msra.gmra.mxu0 %vm1554_vm3, %v4550_v47  ;;  %v5050_v47 = vld [vmem:[%s7850_s26 + $0x20] sm:$0xff] }
0x1575   : > { %v6191_v49 = vpop.f32.mrf.mxu1  ;;  %6204 = vmatprep.mubr.msk.f32.mxu0 %vm6401_vm2, %v6400_v52 }
0x1576   : > { %v4629_v50 = vsel %vm1709_vm4, %v4627_v48, -inf }
0x1577   : > { %4630 = vmax.xlane.f32.xlu0 %v4629_v50 }
0x1600   : > { %v4631_v51 = vpop.xlane.xlu0 %4630 }
0x1601   : > { %v4635_v53 = vsub.f32 %v4627_v48, %v4631_v51 }
0x1603   : > { %v4637_v54 = vmul.f32 1.442695, %v4635_v53 }
0x1605   : > { %6336 = vpow2.f32 %v4637_v54 }
0x1612   : > { %v6337_v55 = vpop.eup %6336 }
0x1613   : > { %v4641_v56 = vsel %vm1709_vm4, %v6337_v55, 0.0 }
0x1614   : > { %4642 = vadd.xlane.f32.xlu0 %v4641_v56 }
0x1630   : > { %v6186_v59 = vpop.f32.mrf.mxu0 }
0x1631   : > { %v4470_v60 = vadd.f32 %v6186_v59, %v7774_v16 }
0x1632   : > { %v4460_v63 = vpop.f32.mrf.mxu0 }
0x1633   : > { %v4469_v0 = vadd.f32 %v4460_v63, %v7777_v25 }
0x1634   : > { %v4623_v2 = vpop.f32.mrf.mxu0 }
0x1635   : > { %v4628_v4 = vmul.f32 0.5, %v4623_v2 }
0x1636   : > { %v6196_v52 = vpop.f32.mrf.mxu0 }
0x1637   : > { %v4632_v5 = vsel %vm1709_vm4, %v4628_v4, -inf }
0x1638   : > { %4633 = vmax.xlane.f32.xlu1 %v4632_v5  ;;  %v5049_v5 = vld [vmem:[%s7850_s26 + $0x18] sm:$0xff] }
0x1649   : > { %4727 = vrot.lane.b32.xlu1 %v7498_v1, %s6408_s30 }
0x169d   : > { %v4643_v12 = vpop.xlane.xlu0 %4642 }
0x16c1   : > { %v4634_v6 = vpop.xlane.xlu1 %4633 }
0x16c2   : > { %v4636_v7 = vsub.f32 %v4628_v4, %v4634_v6  ;;  %v5048_v6 = vld [vmem:[%s7850_s26 + $0x10] sm:$0xff] }
0x16c4   : > { %v4639_v8 = vmul.f32 1.442695, %v4636_v7  ;;  %v5047_v7 = vld [vmem:[%s7850_s26 + $0x8] sm:$0xff] }
0x16c5   : > { %v4728_v9 = vpop.permute.xlu1 %4727 }
0x16c6   : > { %6338 = vpow2.f32 %v4639_v8  ;;  %6203 = vmatpush3.msra.mxu0 %v4728_v9  ;;  %v5046_v8 = vld [vmem:[%s7850_s26] sm:$0xff] }
0x16c7   : > { %6340 = vrcp.f32 %v4643_v12  ;;  %v5568_v9 = vld [vmem:[%s4953_s24] ss:$0 sm:$0xff] }
0x16d3   : > { %v6339_v10 = vpop.eup %6338 }
0x16d4   : > { %v4644_v11 = vsel %vm1709_vm4, %v6339_v10, 0.0  ;;  %v6341_v15 = vpop.eup %6340 }
0x16d5   : > { %4645 = vadd.xlane.f32.xlu0 %v4644_v11  ;;  %v4648_v19 = vmul.f32 %v6341_v15, %v6337_v55  ;;  %v5566_v55 = vld [vmem:[%s4901_s4] ss:$0 sm:$0xff] }
0x16eb   : > { %4651 = vrot.lane.b32.xlu0 %v7500_v3, %s6408_s30  ;;  %s5148_s30 = scalar_lea.vmem %s7922_s20, %s6396_s29  ;;  %s1275_s29 = sadd.s32 1, %s6396_s29  }
0x16ec   : > { %p1272_p0 = scmp.ge.s32.totalorder %s1275_s29, 8  }
0x16ed   :  { %s6409_s5 = smov (%p1272_p0), [#allocation3]  }
0x175e   : > { %v4646_v14 = vpop.xlane.xlu0 %4645 }
0x175f   : > { %6342 = vrcp.f32 %v4646_v14 }
0x1762   : > { %v4652_v1 = vpop.permute.xlu0 %4651 }
0x1763   : > { %6198 = vmatpush3.msra.mxu1 %v4652_v1  ;;  %v5572_v1 = vld [vmem:[%s5054_s3] ss:$0 sm:$0xff] }
0x1764   : > { %6200 = vmatmul.mubr.msk.f32.vlgmr.msra.gmra.mxu1 %vm1709_vm4, %v4648_v19  ;;  %6207 = vmatprep.subr.msk.mxu1 %vm2220_vm5, %v4803_v17 }
0x1765   : > { %6208 = vmatpush3.msk.msra.mxu1 %vm2220_vm5, %v4803_v17 }
0x1766   : > { %6223 = vmatprep.subr.mxu1 %v5053_v44 }
0x176c   : > { %v6343_v20 = vpop.eup %6342 }
0x176d   : > { %v4650_v23 = vmul.f32 %v6343_v20, %v6339_v10 }
0x176f   : > { %6205 = vmatmul.mubr.msk.f32.vlgmr.msra.gmra.mxu0 %vm1709_vm4, %v4650_v23 }
0x1824   : > { %v4723_v3 = vpop.f32.mrf.mxu1 }
0x1825   : > { %6209 = vmatprep.mubr.msk.f32.mxu1 %vm1554_vm3, %v4723_v3 }
0x1826   : > { %v6201_v24 = vpop.f32.mrf.mxu1 }
0x182f   : > { %v4799_v16 = vpop.f32.mrf.mxu0 }
0x1830   : > { %6210 = vmatmul.mubr.msk.f32.vlgmr.msra.gmra.mxu1 %vm1554_vm3, %v4799_v16 }
0x1831   : > { %v6206_v18 = vpop.f32.mrf.mxu0  ;;  %6224 = vmatpush3.msra.mxu1 %v5053_v44 }
0x1832   : > { %6225 = vmatprep.subr.mxu1 %v5052_v45 }
0x1833   : > { %6226 = vmatpush3.msra.mxu1 %v5052_v45 }
0x1834   : > { %6227 = vmatprep.subr.mxu1 %v5051_v46 }
0x1835   : > { %6228 = vmatpush3.msra.mxu1 %v5051_v46 }
0x1836   : > { %6229 = vmatprep.subr.mxu1 %v5050_v47 }
0x1837   : > { %6230 = vmatpush3.msra.mxu1 %v5050_v47 }
0x1838   : > { %6231 = vmatprep.subr.mxu1 %v5049_v5 }
0x1839   : > { %6232 = vmatpush3.msra.mxu1 %v5049_v5 }
0x183a   : > { %6233 = vmatprep.subr.mxu1 %v5048_v6 }
0x183b   : > { %6234 = vmatpush3.msra.mxu1 %v5048_v6 }
0x183c   : > { %6235 = vmatprep.subr.mxu1 %v5047_v7 }
0x183d   : > { %6236 = vmatpush3.msra.mxu1 %v5047_v7 }
0x183e   : > { %6237 = vmatprep.subr.mxu1 %v5046_v8 }
0x183f   : > { %6238 = vmatpush3.msra.mxu1 %v5046_v8 }
0x18f0   : > { %v6211_v25 = vpop.f32.mrf.mxu1 }
0x18f1   : > { %v4888_v27 = vadd.f32 %v6211_v25, %v4470_v60 }
0x18f2   : > { %v4878_v28 = vpop.f32.mrf.mxu1 }
0x18f3   : > { %v4898_v29 = vadd.f32 %v5565_v26, %v4888_v27  ;;  %v4887_v30 = vadd.f32 %v4878_v28, %v4469_v0  ;;  %v5567_v0 = vld [vmem:[%s4903_s22] ss:$0 sm:$0xff]  ;;  %s5199_s22 = sshll.u32 (%p1272_p0), %s6409_s5, 4  ;;  %s5200_s22 = int_to_ptr.vmem [resolvable:$true] %s5199_s22 }
0x18f4   :  { %s6352_s23 = scalar_lea.vmem (%p1272_p0), %s5200_s22, 256  ;;  %p6357_p2 = scmp.lt.s32.totalorder (%p1272_p0), %s5200_s22, %s5200_s22 }
0x18f5   : > { %v4897_v31 = vadd.f32 %v5565_v26, %v4887_v30  ;;  %v4900_v32 = vadd.f32 %v6388_v41, %v4898_v29  ;;  %p6353_p1 = scmp.ne.s32.totalorder (%p1272_p0), %s5200_s22, %s6352_s23  ;;  %p6358_p3 = scmp.lt.s32.totalorder (%p1272_p0), %s6352_s23, %s6352_s23 }
0x18f7   : > { %v4908_v33 = vsel %vm90_vm0, %v4900_v32, 0.0  ;;  %v4899_v34 = vadd.f32 %v6392_v40, %v4897_v31  ;;  %v4952_v40 = vld [vmem:[%s4948_s25 + $0x18] sm:$0xff]  ;;  %p6359_p4 = por (%p1272_p0), %p6358_p3, %p6357_p2 }
0x18f8   : > { %4909 = vadd.xlane.f32.xlu0 %v4908_v33  ;;  %6212 = vmatprep.subr.mxu0 %v4952_v40 }
0x18f9   : > { %v4905_v35 = vsel %vm90_vm0, %v4899_v34, 0.0  ;;  %6213 = vmatpush3.msra.mxu0 %v4952_v40  ;;  %v5576_v40 = vld [vmem:[%s5148_s30] ss:$0 sm:$0xff]  ;;  %p6360_p5 = pnand (%p1272_p0), %p6359_p4, %p6353_p1 }
0x18fa   : > { %4906 = vadd.xlane.f32.xlu1 %v4905_v35  ;;  %6214 = vmatprep.subr.mxu0 %v4951_v38 }
0x18fb   : > { %6215 = vmatpush3.msra.mxu0 %v4951_v38 }
0x18fc   : > { %6216 = vmatprep.subr.mxu0 %v4950_v42 }
0x18fd   : > { %6217 = vmatpush3.msra.mxu0 %v4950_v42 }
0x18fe   : > { %6218 = vmatprep.subr.mxu0 %v4949_v43 }
0x18ff   : > { %6219 = vmatpush3.msra.mxu0 %v4949_v43 }
0x1981   : > { %v4910_v57 = vpop.xlane.xlu0 %4909 }
0x1982   : > { %v4913_v58 = vmul.f32 0.03125, %v4910_v57 }
0x1983   : > { %v4907_v61 = vpop.xlane.xlu1 %4906 }
0x1984   : > { %v4915_v36 = vsub.f32 %v4900_v32, %v4913_v58  ;;  %v4912_v37 = vmul.f32 0.03125, %v4907_v61 }
0x1986   : > { %v4914_v21 = vsub.f32 %v4899_v34, %v4912_v37  ;;  %v4917_v22 = vmul.f32 %v4915_v36, %v4915_v36 }
0x1988   : > { %v4921_v39 = vsel %vm90_vm0, %v4917_v22, 0.0  ;;  %v4916_v62 = vmul.f32 %v4914_v21, %v4914_v21 }
0x1989   : > { %4922 = vadd.xlane.f32.xlu1 %v4921_v39  ;;  %v5575_v39 = vld [vmem:[%s5146_s2] ss:$0 sm:$0xff] }
0x198a   : > { %v4918_v41 = vsel %vm90_vm0, %v4916_v62, 0.0 }
0x198b   : > { %4919 = vadd.xlane.f32.xlu0 %v4918_v41 }
0x1a12   : > { %v4923_v13 = vpop.xlane.xlu1 %4922 }
0x1a13   : > { %v4925_v48 = vmul.f32 0.03125, %v4923_v13 }
0x1a14   : > { %v4920_v49 = vpop.xlane.xlu0 %4919 }
0x1a15   : > { %v4927_v50 = vadd.f32 1e-05, %v4925_v48  ;;  %v4924_v51 = vmul.f32 0.03125, %v4920_v49 }
0x1a17   : > { %6344 = vrsqrt.f32 %v4927_v50  ;;  %v4926_v53 = vadd.f32 1e-05, %v4924_v51 }
0x1a19   : > { %6346 = vrsqrt.f32 %v4926_v53 }
0x1a24   : > { %v6345_v54 = vpop.eup %6344 }
0x1a25   : > { %v4931_v56 = vmul.f32 %v6345_v54, %v4915_v36 }
0x1a26   : > { %v6347_v59 = vpop.eup %6346 }
0x1a27   : > { %v4930_v60 = vmul.f32 %v6347_v59, %v4914_v21  ;;  %v4939_v63 = vmul.f32 %v5566_v55, %v4931_v56 }
0x1a29   : > { %v4938_v2 = vmul.f32 %v5566_v55, %v4930_v60  ;;  %v4947_v52 = vadd.f32 %v5567_v0, %v4939_v63 }
0x1a2b   : > { %v4946_v4 = vadd.f32 %v5567_v0, %v4938_v2 }
0x1a2d   : > { %6220 = vmatprep.mubr.msk.f32.mxu0 %vm90_vm0, %v4946_v4 }
0x1a2e   : > { %6221 = vmatmul.mubr.msk.f32.vlgmr.msra.gmra.mxu0 %vm90_vm0, %v4947_v52 }
0x1aee   : > { %v6222_v10 = vpop.f32.mrf.mxu0 }
0x1aef   : > { %v5039_v11 = vadd.f32 %v6222_v10, %v5568_v9 }
0x1af0   : > { %v5033_v12 = vpop.f32.mrf.mxu0 }
0x1af1   : > { %v5034_v14 = vadd.f32 %v5568_v9, %v5033_v12  ;;  %v5043_v17 = vmax.f32 %v5039_v11, 0.0 }
0x1af3   : > { %v5042_v15 = vmax.f32 %v5034_v14, 0.0 }
0x1af5   : > { %6239 = vmatprep.mubr.msk.f32.mxu1 %vm5062_vm6, %v5042_v15 }
0x1af6   : > { %6240 = vmatmul.mubr.msk.f32.vlgmr.msra.gmra.mxu1 %vm5062_vm6, %v5043_v17 }
0x1bb6   : > { %v6241_v19 = vpop.f32.mrf.mxu1 }
0x1bb7   : > { %v5141_v20 = vadd.f32 %v6241_v19, %v5572_v1 }
0x1bb8   : > { %v5135_v23 = vpop.f32.mrf.mxu1 }
0x1bb9   : > { %v5136_v3 = vadd.f32 %v5572_v1, %v5135_v23  ;;  %v5145_v24 = vadd.f32 %v5141_v20, %v4947_v52 }
0x1bbb   : > { %v5153_v16 = vsel %vm90_vm0, %v5145_v24, 0.0  ;;  %v5144_v18 = vadd.f32 %v5136_v3, %v4946_v4 }
0x1bbc   : > { %5154 = vadd.xlane.f32.xlu1 %v5153_v16 }
0x1bbd   : > { %v5150_v25 = vsel %vm90_vm0, %v5144_v18, 0.0 }
0x1bbe   : > { %5151 = vadd.xlane.f32.xlu0 %v5150_v25 }
0x1c45   : > { %v5155_v26 = vpop.xlane.xlu1 %5154 }
0x1c46   : > { %v5157_v27 = vmul.f32 0.03125, %v5155_v26 }
0x1c47   : > { %v5152_v28 = vpop.xlane.xlu0 %5151 }
0x1c48   : > { %v5159_v29 = vsub.f32 %v5145_v24, %v5157_v27  ;;  %v5156_v30 = vmul.f32 0.03125, %v5152_v28 }
0x1c4a   : > { %v5158_v31 = vsub.f32 %v5144_v18, %v5156_v30  ;;  %v5161_v32 = vmul.f32 %v5159_v29, %v5159_v29 }
0x1c4c   : > { %v5165_v33 = vsel %vm90_vm0, %v5161_v32, 0.0  ;;  %v5160_v34 = vmul.f32 %v5158_v31, %v5158_v31 }
0x1c4d   : > { %5166 = vadd.xlane.f32.xlu1 %v5165_v33 }
0x1c4e   : > { %v5162_v35 = vsel %vm90_vm0, %v5160_v34, 0.0 }
0x1c4f   : > { %5163 = vadd.xlane.f32.xlu0 %v5162_v35 }
0x1cd6   : > { %v5167_v57 = vpop.xlane.xlu1 %5166 }
0x1cd7   : > { %v5169_v58 = vmul.f32 0.03125, %v5167_v57 }
0x1cd8   : > { %v5164_v61 = vpop.xlane.xlu0 %5163 }
0x1cd9   : > { %v5171_v36 = vadd.f32 1e-05, %v5169_v58  ;;  %v5168_v37 = vmul.f32 0.03125, %v5164_v61 }
0x1cdb   : > { %6348 = vrsqrt.f32 %v5171_v36  ;;  %v5170_v21 = vadd.f32 1e-05, %v5168_v37 }
0x1cdd   : > { %6350 = vrsqrt.f32 %v5170_v21 }
0x1ce8   : > { %v6349_v22 = vpop.eup %6348 }
0x1ce9   : > { %v5175_v62 = vmul.f32 %v6349_v22, %v5159_v29 }
0x1cea   : > { %v6351_v41 = vpop.eup %6350 }
0x1ceb   : > { %v5183_v38 = vmul.f32 %v5575_v39, %v5175_v62  ;;  %v5174_v42 = vmul.f32 %v6351_v41, %v5158_v31 }
0x1ced   : > { %v5191_v43 = vadd.f32 %v5576_v40, %v5183_v38   ;;  %v5182_v44 = vmul.f32 %v5575_v39, %v5174_v42  ;;  %1274 = sbr.rel (!%p1272_p0) target bundleno = 534 (0x216), region = 141 }
0x1cef   : > { %v5190_v45 = vadd.f32 %v5576_v40, %v5182_v44   ;;  %v7939_v41 = vmov %v5191_v43  ;;  %5193 = vst.msk [vmem:[#allocation3 + $0x8] sm:$0xff] (%p1272_p0), %vm90_vm0, %v5191_v43 }
0x1cf1   : > { %v7940_v40 = vmov %v5190_v45  ;;  %5192 = vst.msk [vmem:[#allocation3] sm:$0xff] (%p1272_p0), %vm90_vm0, %v5190_v45 }
0x1cf2   :  { %6363 = shalt.err (!%p6360_p5)
}
0x1cf3   :  { %s6410_s1 = smov 128   ;;  %s6411_s24 = smov 8  }
0x1cf4   :  { %5205 = dma.vmem_to_hbm [thread:$0]  %s5200_s22, 256, %s7923_s21, [#allocation4], %s6410_s1, %s6410_s1, %s6411_s24  }
0x1cf5   :  { %6384 = dma.done.wait [#allocation4], 256  }
0x1cf6   :  { %6385 = vsyncadd [#allocation4], 4294967040 }
0x1cf7   :  { %5209 = vsyncpa [#allocation4], 1 }

</bundles_post_ra>
